<compile_context>
chip_gen: v6e
topology: v6e:2x2x1
jax: 0.10.0
libtpu: 0.0.40
codegen_flags: <defaults>
</compile_context>

<pallas_src>
import math
from functools import partial

import jax
import jax.numpy as jnp
from jax import lax
from jax.experimental import pallas as pl
from jax.experimental.pallas import tpu as pltpu


# ----------------------------- small helpers -----------------------------

def _round_up(x, m):
    return (x + m - 1) // m * m


def _sigmoid(x):
    # numerically stable, exact (matches PyTorch SiLU up to f32 rounding)
    ex = jnp.exp(-jnp.abs(x))
    return jnp.where(x >= 0.0, 1.0, ex) / (1.0 + ex)


def _silu(x):
    return x * _sigmoid(x)


# ----------------------------- fused LayerNorm -> in_proj -----------------------------

def _ln_in_proj_kernel(eps, d_inner, x_ref, g_ref, b_ref, w_ref, o1_ref, o2_ref):
    x = x_ref[...].astype(jnp.float32)
    mu = jnp.mean(x, axis=-1, keepdims=True)
    xc = x - mu
    var = jnp.mean(xc * xc, axis=-1, keepdims=True)
    ln = xc * lax.rsqrt(var + eps) * g_ref[...].astype(jnp.float32) \
        + b_ref[...].astype(jnp.float32)
    # single matmul against the concatenated (C, 2*Di) weight; split halves in-kernel
    proj = jnp.dot(ln, w_ref[...].astype(jnp.float32),
                   preferred_element_type=jnp.float32)
    o1_ref[...] = proj[:, :d_inner].astype(o1_ref.dtype)
    o2_ref[...] = proj[:, d_inner:].astype(o2_ref.dtype)


def ln_in_proj(x2d, g, b, w, d_inner, eps=1e-5, bm=512, out_dtype=jnp.bfloat16):
    M, C = x2d.shape
    N2 = w.shape[1]
    bm = min(bm, _round_up(M, 8))
    Mp = _round_up(M, bm)
    if Mp != M:
        x2d = jnp.pad(x2d, ((0, Mp - M), (0, 0)))
    o1, o2 = pl.pallas_call(
        partial(_ln_in_proj_kernel, eps, d_inner),
        out_shape=(jax.ShapeDtypeStruct((Mp, d_inner), out_dtype),
                   jax.ShapeDtypeStruct((Mp, N2 - d_inner), out_dtype)),
        grid=(Mp // bm,),
        in_specs=[pl.BlockSpec((bm, C), lambda i: (i, 0)),
                  pl.BlockSpec((1, C), lambda i: (0, 0)),
                  pl.BlockSpec((1, C), lambda i: (0, 0)),
                  pl.BlockSpec((C, N2), lambda i: (0, 0))],
        out_specs=[pl.BlockSpec((bm, d_inner), lambda i: (i, 0)),
                   pl.BlockSpec((bm, d_inner), lambda i: (i, 0))],
        compiler_params=pltpu.CompilerParams(dimension_semantics=("parallel",)),
    )(x2d, g, b, w)
    if Mp != M:
        o1, o2 = o1[:M], o2[:M]
    return o1, o2


# ---------------- fused gated LayerNorm -> out_proj -> +residual ----------------

def _gated_ln_out_proj_kernel(eps, y_ref, z_ref, g_ref, b_ref, w_ref, r_ref, o_ref):
    y = y_ref[...].astype(jnp.float32)
    mu = jnp.mean(y, axis=-1, keepdims=True)
    yc = y - mu
    var = jnp.mean(yc * yc, axis=-1, keepdims=True)
    ln = yc * lax.rsqrt(var + eps) * g_ref[...].astype(jnp.float32) \
        + b_ref[...].astype(jnp.float32)
    gated = ln * _silu(z_ref[...].astype(jnp.float32))
    proj = jnp.dot(gated, w_ref[...].astype(jnp.float32),
                   preferred_element_type=jnp.float32)
    o_ref[...] = (r_ref[...].astype(jnp.float32) + proj).astype(o_ref.dtype)


def gated_ln_out_proj(y2d, z2d, g, b, w, resid, eps=1e-5, bm=512):
    M, Di = y2d.shape
    C = w.shape[1]
    bm = min(bm, _round_up(M, 8))
    Mp = _round_up(M, bm)
    if Mp != M:
        pad = ((0, Mp - M), (0, 0))
        y2d = jnp.pad(y2d, pad)
        z2d = jnp.pad(z2d, pad)
        resid = jnp.pad(resid, pad)
    out = pl.pallas_call(
        partial(_gated_ln_out_proj_kernel, eps),
        out_shape=jax.ShapeDtypeStruct((Mp, C), jnp.float32),
        grid=(Mp // bm,),
        in_specs=[pl.BlockSpec((bm, Di), lambda i: (i, 0)),
                  pl.BlockSpec((bm, Di), lambda i: (i, 0)),
                  pl.BlockSpec((1, Di), lambda i: (0, 0)),
                  pl.BlockSpec((1, Di), lambda i: (0, 0)),
                  pl.BlockSpec((Di, C), lambda i: (0, 0)),
                  pl.BlockSpec((bm, C), lambda i: (i, 0))],
        out_specs=pl.BlockSpec((bm, C), lambda i: (i, 0)),
        compiler_params=pltpu.CompilerParams(dimension_semantics=("parallel",)),
    )(y2d, z2d, g, b, w, resid)
    return out[:M] if Mp != M else out


# ---------------- depthwise conv 3x3 + SiLU (in-kernel halo, ring-only zero) ----------------

def _dwconv_silu_kernel(H, W, x_ref, w_ref, b_ref, o_ref, pad_ref):
    C = o_ref.shape[-1]
    # zero only the 1-pixel halo ring (interior is overwritten below every step)
    pad_ref[0:1, :, :] = jnp.zeros((1, W + 2, C), jnp.float32)
    pad_ref[H + 1:H + 2, :, :] = jnp.zeros((1, W + 2, C), jnp.float32)
    pad_ref[1:H + 1, 0:1, :] = jnp.zeros((H, 1, C), jnp.float32)
    pad_ref[1:H + 1, W + 1:W + 2, :] = jnp.zeros((H, 1, C), jnp.float32)
    pad_ref[1:H + 1, 1:W + 1, :] = x_ref[...].astype(jnp.float32)

    acc = jnp.zeros((H, W, C), jnp.float32)
    for kh in range(3):
        for kw in range(3):
            tap = pad_ref[kh:kh + H, kw:kw + W, :]
            wt = w_ref[kh * 3 + kw:kh * 3 + kw + 1, :].reshape(1, 1, C)
            acc = acc + tap * wt
    acc = acc + b_ref[...].reshape(1, 1, C)
    o_ref[...] = _silu(acc).astype(o_ref.dtype)


def dwconv3x3_silu(x, w9, bias, out_dtype=jnp.bfloat16):
    # TODO(synk): tile over H with a 2-row halo for VMamba-scale H,W on v7x.
    B, H, W, C = x.shape
    return pl.pallas_call(
        partial(_dwconv_silu_kernel, H, W),
        out_shape=jax.ShapeDtypeStruct((B, H, W, C), out_dtype),
        grid=(B,),
        in_specs=[pl.BlockSpec((None, H, W, C), lambda b: (b, 0, 0, 0)),
                  pl.BlockSpec((9, C), lambda b: (0, 0)),
                  pl.BlockSpec((1, C), lambda b: (0, 0))],
        out_specs=pl.BlockSpec((None, H, W, C), lambda b: (b, 0, 0, 0)),
        scratch_shapes=[pltpu.VMEM((H + 2, W + 2, C), jnp.float32)],
        compiler_params=pltpu.CompilerParams(dimension_semantics=("parallel",)),
    )(x, w9, bias)


# ---------------- SS2D selective scan: grid (B, K, L-tiles), carried state ----------------

def _ss2d_scan_kernel(N, T, x_ref, w_ref, dtb_ref, a_ref, ds_ref, y_ref,
                      h_ref, dt_s, b_s, c_s, hst_s):
    TL, Di = x_ref.shape
    l = pl.program_id(2)

    @pl.when(l == 0)
    def _():
        h_ref[...] = jnp.zeros_like(h_ref)

    x_all = x_ref[...].astype(jnp.float32)                        # (TL, Di)

    # dt / B / C projection for this L-tile in ONE per-direction matmul: (TL, Di+2N)
    dtbc = jnp.dot(x_all, w_ref[...].astype(jnp.float32),
                   preferred_element_type=jnp.float32)
    dt = dtbc[:, :Di] + dtb_ref[...].astype(jnp.float32)
    dt = jnp.where(dt > 20.0, dt,
                   jnp.log(1.0 + jnp.exp(jnp.minimum(dt, 20.0))))  # softplus
    dt_s[...] = dt
    b_s[...] = dtbc[:, Di:Di + N]
    c_s[...] = dtbc[:, Di + N:]

    A = a_ref[...].astype(jnp.float32)                             # (N, Di)
    Dskip = ds_ref[...].astype(jnp.float32)                        # (1, Di)

    def chunk_body(c, h):
        t0 = pl.multiple_of(c * T, T)
        x_c = x_ref[pl.ds(t0, T), :].astype(jnp.float32)           # (T, Di)
        dt_c = dt_s[pl.ds(t0, T), :]                               # (T, Di)
        b_c = b_s[pl.ds(t0, T), :]                                 # (T, N)
        c_c = c_s[pl.ds(t0, T), :]                                 # (T, N)

        dA = jnp.exp(dt_c[:, None, :] * A[None, :, :])             # (T, N, Di)
        dBu = b_c[:, :, None] * (dt_c * x_c)[:, None, :]           # (T, N, Di)

        # serial recurrence only; state snapshots go to the stack scratch
        for tt in range(T):
            h = dA[tt] * h + dBu[tt]
            hst_s[tt] = h
        # batched output reduction off the serial path
        y_c = jnp.sum(c_c[:, :, None] * hst_s[...], axis=1)        # (T, Di)
        y_c = y_c + Dskip * x_c
        y_ref[pl.ds(t0, T), :] = y_c.astype(y_ref.dtype)
        return h

    h_out = lax.fori_loop(0, TL // T, chunk_body, h_ref[...])
    h_ref[...] = h_out


def ss2d_selective_scan(xs, w_cat, dtb, A_f, ds_f, d_state, tl_max=256):
    """xs: (B, K, Lp, Di) bf16, Lp a multiple of 16.  Returns (B, K, Lp, Di) bf16."""
    B, K, Lp, Di = xs.shape
    N = d_state
    T = 8
    start = (min(tl_max, Lp) // 16) * 16
    TL = next(c for c in range(start, 0, -16) if Lp % c == 0)
    n_lt = Lp // TL
    return pl.pallas_call(
        partial(_ss2d_scan_kernel, N, T),
        out_shape=jax.ShapeDtypeStruct((B, K, Lp, Di), xs.dtype),
        grid=(B, K, n_lt),
        in_specs=[
            pl.BlockSpec((None, None, TL, Di), lambda b, k, l: (b, k, l, 0)),
            pl.BlockSpec((None, Di, Di + 2 * N), lambda b, k, l: (k, 0, 0)),
            pl.BlockSpec((None, 1, Di), lambda b, k, l: (k, 0, 0)),
            pl.BlockSpec((None, N, Di), lambda b, k, l: (k, 0, 0)),
            pl.BlockSpec((None, 1, Di), lambda b, k, l: (k, 0, 0)),
        ],
        out_specs=pl.BlockSpec((None, None, TL, Di), lambda b, k, l: (b, k, l, 0)),
        scratch_shapes=[
            pltpu.VMEM((N, Di), jnp.float32),       # carried state h (across L tiles)
            pltpu.VMEM((TL, Di), jnp.float32),      # softplus(dt)
            pltpu.VMEM((TL, N), jnp.float32),       # B
            pltpu.VMEM((TL, N), jnp.float32),       # C
            pltpu.VMEM((T, N, Di), jnp.float32),    # per-chunk h stack
        ],
        compiler_params=pltpu.CompilerParams(
            dimension_semantics=("parallel", "parallel", "arbitrary")),
    )(xs, w_cat, dtb, A_f, ds_f)


# ----------------------------- SS2D / VSSBlock / VSSLayer glue -----------------------------

def _fold_directions(xconv, L_pad):
    """(B,H,W,Di) -> (B, 4, L_pad, Di): hw-scan, wh-scan, and their reverses."""
    B, H, W, Di = xconv.shape
    L = H * W
    d0 = xconv.reshape(B, L, Di)
    d1 = jnp.transpose(xconv, (0, 2, 1, 3)).reshape(B, L, Di)
    xs = jnp.stack([d0, d1, jnp.flip(d0, axis=1), jnp.flip(d1, axis=1)], axis=1)
    if L_pad != L:
        xs = jnp.pad(xs, ((0, 0), (0, 0), (0, L_pad - L), (0, 0)))
    return xs
    # TODO(synk): handle the two reversed directions in-kernel (back-to-front tile
    # traversal) so xs/ys only carry 2 directions of HBM traffic.


def _unfold_directions(ys, B, H, W, Di):
    L = H * W
    ys = ys[:, :, :L, :]

    def wh2hw(t):
        return jnp.transpose(t.reshape(B, W, H, Di), (0, 2, 1, 3)).reshape(B, L, Di)

    y = (ys[:, 0].astype(jnp.float32)
         + jnp.flip(ys[:, 2], axis=1).astype(jnp.float32)
         + wh2hw(ys[:, 1]).astype(jnp.float32)
         + wh2hw(jnp.flip(ys[:, 3], axis=1)).astype(jnp.float32))
    return y.astype(ys.dtype)


def vss_block_forward(x, p, d_inner, d_state):
    B, H, W, C = x.shape
    L = H * W
    Di = d_inner
    x2d = x.reshape(B * L, C)

    # ln_1 + in_proj (one matmul, two heads)
    xc2d, z2d = ln_in_proj(x2d, p['ln1_g'], p['ln1_b'], p['in_proj_w'], Di)

    # depthwise 3x3 conv + SiLU
    xconv = dwconv3x3_silu(xc2d.reshape(B, H, W, Di), p['conv_w'], p['conv_b'])

    # 4-direction selective scan (directions on a grid axis, L tiled with carried state)
    Lp = _round_up(L, 16)
    xs = _fold_directions(xconv, Lp)
    ys = ss2d_selective_scan(xs, p['scan_w'], p['scan_dtb'], p['scan_A'],
                             p['scan_ds'], d_state)
    y2d = _unfold_directions(ys, B, H, W, Di).reshape(B * L, Di)

    # out_norm * SiLU(z) -> out_proj -> + residual (fused)
    out2d = gated_ln_out_proj(y2d, z2d, p['on_g'], p['on_b'], p['out_proj_w'], x2d)
    return out2d.reshape(B, H, W, C)


def vss_layer_forward(x, params, d_inner, d_state):
    for p in params:                       # depth blocks, no downsample
        x = vss_block_forward(x, p, d_inner, d_state)
    return x


# ----------------------------- parameter preparation -----------------------------

def _fold_scan_params(x_proj_w, dt_w, dt_b, A_log, Ds, d_inner, d_state, dt_rank):
    """Fold per-direction scan weights ONCE at param-prep time.

    Returns:
      w_cat (K, Di, Di+2N): per-direction [fused dt-proj | B-proj | C-proj]
      dtb   (K, 1, Di), A (K, N, Di), Ds (K, 1, Di)
    """
    K = x_proj_w.shape[0]
    R, N, Di = dt_rank, d_state, d_inner
    blocks = []
    for k in range(K):
        wdt = x_proj_w[k, :R, :].T @ dt_w[k].T                     # (Di, Di)
        wB = x_proj_w[k, R:R + N, :].T                             # (Di, N)
        wC = x_proj_w[k, R + N:R + 2 * N, :].T                     # (Di, N)
        blocks.append(jnp.concatenate([wdt, wB, wC], axis=1))
    w_cat = jnp.stack(blocks, axis=0)                              # (K, Di, Di+2N)
    A_f = -jnp.exp(A_log).transpose(0, 2, 1)                       # (K, N, Di)
    dtb_f = dt_b.reshape(K, 1, Di)
    ds_f = Ds.reshape(K, 1, Di)
    return w_cat, dtb_f, A_f, ds_f


def init_block_params(key, dim, d_state, d_inner, dt_rank):
    K = 4
    ks = jax.random.split(key, 6)
    p = {}
    p['ln1_g'] = jnp.ones((1, dim), jnp.float32)
    p['ln1_b'] = jnp.zeros((1, dim), jnp.float32)
    p['in_proj_w'] = jax.random.normal(ks[0], (dim, 2 * d_inner), jnp.float32) / math.sqrt(dim)
    p['conv_w'] = jax.random.normal(ks[1], (9, d_inner), jnp.float32) / 3.0
    p['conv_b'] = jnp.zeros((1, d_inner), jnp.float32)

    x_proj_w = jax.random.normal(
        ks[2], (K, dt_rank + 2 * d_state, d_inner), jnp.float32) / math.sqrt(d_inner)
    dt_w = jax.random.normal(ks[3], (K, d_inner, dt_rank), jnp.float32) * dt_rank ** -0.5
    dt = jnp.exp(jax.random.uniform(ks[4], (K, d_inner), jnp.float32)
                 * (math.log(0.1) - math.log(0.001)) + math.log(0.001))
    dt = jnp.clip(dt, 1e-4, None)
    dt_b = dt + jnp.log(-jnp.expm1(-dt))                           # inverse softplus
    A_log = jnp.log(jnp.tile(jnp.arange(1, d_state + 1, dtype=jnp.float32)[None, None, :],
                             (K, d_inner, 1)))                     # (K, Di, N)
    Ds = jnp.ones((K, d_inner), jnp.float32)
    p['scan_w'], p['scan_dtb'], p['scan_A'], p['scan_ds'] = _fold_scan_params(
        x_proj_w, dt_w, dt_b, A_log, Ds, d_inner, d_state, dt_rank)

    p['on_g'] = jnp.ones((1, d_inner), jnp.float32)
    p['on_b'] = jnp.zeros((1, d_inner), jnp.float32)
    p['out_proj_w'] = jax.random.normal(ks[5], (d_inner, dim), jnp.float32) / math.sqrt(d_inner)
    return p


if __name__ == "__main__":
    dim, depth, d_state = 16, 2, 16
    expand = 2
    d_inner = expand * dim                       # 32
    dt_rank = math.ceil(dim / 16)
    B, H, W = 2, 8, 8

    key = jax.random.PRNGKey(0)
    kx, kp = jax.random.split(key)
    x = jax.random.normal(kx, (B, H, W, dim), jnp.float32)
    block_keys = jax.random.split(kp, depth)
    params = [init_block_params(block_keys[i], dim, d_state, d_inner, dt_rank)
              for i in range(depth)]

    fwd = jax.jit(lambda xx, pp: vss_layer_forward(xx, pp, d_inner, d_state))
    out = jax.block_until_ready(fwd(x, params))
    assert out.shape == x.shape
    assert bool(jnp.all(jnp.isfinite(out)))
    print("KERNEL_OK")
</pallas_src>

<mosaic_0001>
module attributes {stable_mosaic.version = 11 : i64} {
  func.func @_ln_in_proj_kernel(%arg0: i32, %arg1: memref<128x16xf32, #tpu.memory_space<vmem>>, %arg2: memref<1x16xf32, #tpu.memory_space<vmem>>, %arg3: memref<1x16xf32, #tpu.memory_space<vmem>>, %arg4: memref<16x64xf32, #tpu.memory_space<vmem>>, %arg5: memref<128x32xbf16, #tpu.memory_space<vmem>>, %arg6: memref<128x32xbf16, #tpu.memory_space<vmem>>) attributes {dimension_semantics = [#tpu.dimension_semantics<parallel>], iteration_bounds = array<i64: 1>, scalar_prefetch = 0 : i64, scratch_operands = 0 : i64, tpu.core_type = #tpu.core_type<tc>, window_params = [{transform_indices = @transform_0, window_bounds = array<i64: 128, 16>}, {pipeline_mode = #tpu.pipeline_mode<synchronous>, transform_indices = @transform_1, window_bounds = array<i64: 1, 16>}, {pipeline_mode = #tpu.pipeline_mode<synchronous>, transform_indices = @transform_2, window_bounds = array<i64: 1, 16>}, {pipeline_mode = #tpu.pipeline_mode<synchronous>, transform_indices = @transform_3, window_bounds = array<i64: 16, 64>}, {transform_indices = @transform_4, window_bounds = array<i64: 128, 32>}, {transform_indices = @transform_5, window_bounds = array<i64: 128, 32>}]} {
    %c0 = arith.constant 0 : index
    %c0_0 = arith.constant 0 : index
    %0 = vector.load %arg1[%c0, %c0_0] : memref<128x16xf32, #tpu.memory_space<vmem>>, vector<128x16xf32>
    %cst = arith.constant dense<0.000000e+00> : vector<128xf32>
    %1 = vector.multi_reduction <add>, %0, %cst [1] : vector<128x16xf32> to vector<128xf32>
    %2 = vector.shape_cast %1 : vector<128xf32> to vector<128x1xf32>
    %cst_1 = arith.constant 1.600000e+01 : f32
    %3 = vector.broadcast %cst_1 : f32 to vector<128x1xf32>
    %4 = arith.divf %2, %3 : vector<128x1xf32>
    %5 = vector.broadcast %4 : vector<128x1xf32> to vector<128x16xf32>
    %6 = arith.subf %0, %5 : vector<128x16xf32>
    %7 = arith.mulf %6, %6 : vector<128x16xf32>
    %cst_2 = arith.constant dense<0.000000e+00> : vector<128xf32>
    %8 = vector.multi_reduction <add>, %7, %cst_2 [1] : vector<128x16xf32> to vector<128xf32>
    %9 = vector.shape_cast %8 : vector<128xf32> to vector<128x1xf32>
    %cst_3 = arith.constant 1.600000e+01 : f32
    %10 = vector.broadcast %cst_3 : f32 to vector<128x1xf32>
    %11 = arith.divf %9, %10 : vector<128x1xf32>
    %cst_4 = arith.constant 9.99999974E-6 : f32
    %12 = vector.broadcast %cst_4 : f32 to vector<128x1xf32>
    %13 = arith.addf %11, %12 : vector<128x1xf32>
    %14 = math.rsqrt %13 : vector<128x1xf32>
    %15 = vector.broadcast %14 : vector<128x1xf32> to vector<128x16xf32>
    %16 = arith.mulf %6, %15 : vector<128x16xf32>
    %c0_5 = arith.constant 0 : index
    %c0_6 = arith.constant 0 : index
    %17 = vector.load %arg2[%c0_5, %c0_6] : memref<1x16xf32, #tpu.memory_space<vmem>>, vector<1x16xf32>
    %18 = vector.broadcast %17 : vector<1x16xf32> to vector<128x16xf32>
    %19 = arith.mulf %16, %18 : vector<128x16xf32>
    %c0_7 = arith.constant 0 : index
    %c0_8 = arith.constant 0 : index
    %20 = vector.load %arg3[%c0_7, %c0_8] : memref<1x16xf32, #tpu.memory_space<vmem>>, vector<1x16xf32>
    %21 = vector.broadcast %20 : vector<1x16xf32> to vector<128x16xf32>
    %22 = arith.addf %19, %21 : vector<128x16xf32>
    %c0_9 = arith.constant 0 : index
    %c0_10 = arith.constant 0 : index
    %23 = vector.load %arg4[%c0_9, %c0_10] : memref<16x64xf32, #tpu.memory_space<vmem>>, vector<16x64xf32>
    %cst_11 = arith.constant dense<0.000000e+00> : vector<128x64xf32>
    %24 = tpu.matmul %22, %23, %cst_11 {dimension_numbers = #tpu.dot_dimension_numbers<[1], [0], [0], [1], [0, 0, 1, 1], [], []>} : vector<128x16xf32>, vector<16x64xf32>, vector<128x64xf32> -> vector<128x64xf32>
    %25 = vector.extract_strided_slice %24 {offsets = [0, 0], sizes = [128, 32], strides = [1, 1]} : vector<128x64xf32> to vector<128x32xf32>
    %26 = arith.truncf %25 : vector<128x32xf32> to vector<128x32xbf16>
    %c0_12 = arith.constant 0 : index
    %c0_13 = arith.constant 0 : index
    %27 = vector.load %arg5[%c0_12, %c0_13] : memref<128x32xbf16, #tpu.memory_space<vmem>>, vector<128x32xbf16>
    tpu.vector_store %arg5[%c0_12, %c0_13], %26 {strides = array<i32>} : memref<128x32xbf16, #tpu.memory_space<vmem>>, vector<128x32xbf16>,
    %28 = vector.extract_strided_slice %24 {offsets = [0, 32], sizes = [128, 32], strides = [1, 1]} : vector<128x64xf32> to vector<128x32xf32>
    %29 = arith.truncf %28 : vector<128x32xf32> to vector<128x32xbf16>
    %c0_14 = arith.constant 0 : index
    %c0_15 = arith.constant 0 : index
    %30 = vector.load %arg6[%c0_14, %c0_15] : memref<128x32xbf16, #tpu.memory_space<vmem>>, vector<128x32xbf16>
    tpu.vector_store %arg6[%c0_14, %c0_15], %29 {strides = array<i32>} : memref<128x32xbf16, #tpu.memory_space<vmem>>, vector<128x32xbf16>,
    return
  }
  func.func @transform_0(%arg0: i32) -> (i32, i32) {
    %c0_i32 = arith.constant 0 : i32
    %c0_i32_0 = arith.constant 0 : i32
    return %arg0, %c0_i32 : i32, i32
  }
  func.func @transform_1(%arg0: i32) -> (i32, i32) {
    %c0_i32 = arith.constant 0 : i32
    %c0_i32_0 = arith.constant 0 : i32
    %c0_i32_1 = arith.constant 0 : i32
    return %c0_i32, %c0_i32_0 : i32, i32
  }
  func.func @transform_2(%arg0: i32) -> (i32, i32) {
    %c0_i32 = arith.constant 0 : i32
    %c0_i32_0 = arith.constant 0 : i32
    %c0_i32_1 = arith.constant 0 : i32
    return %c0_i32, %c0_i32_0 : i32, i32
  }
  func.func @transform_3(%arg0: i32) -> (i32, i32) {
    %c0_i32 = arith.constant 0 : i32
    %c0_i32_0 = arith.constant 0 : i32
    %c0_i32_1 = arith.constant 0 : i32
    return %c0_i32, %c0_i32_0 : i32, i32
  }
  func.func @transform_4(%arg0: i32) -> (i32, i32) {
    %c0_i32 = arith.constant 0 : i32
    %c0_i32_0 = arith.constant 0 : i32
    return %arg0, %c0_i32 : i32, i32
  }
  func.func @transform_5(%arg0: i32) -> (i32, i32) {
    %c0_i32 = arith.constant 0 : i32
    %c0_i32_0 = arith.constant 0 : i32
    return %arg0, %c0_i32 : i32, i32
  }
}

module attributes {stable_mosaic.version = 11 : i64} {
  func.func @_dwconv_silu_kernel(%arg0: i32, %arg1: memref<1x8x8x32xbf16, #tpu.memory_space<vmem>>, %arg2: memref<9x32xf32, #tpu.memory_space<vmem>>, %arg3: memref<1x32xf32, #tpu.memory_space<vmem>>, %arg4: memref<1x8x8x32xbf16, #tpu.memory_space<vmem>>, %arg5: memref<10x10x32xf32, #tpu.memory_space<vmem>>) attributes {dimension_semantics = [#tpu.dimension_semantics<parallel>], iteration_bounds = array<i64: 2>, scalar_prefetch = 0 : i64, scratch_operands = 1 : i64, tpu.core_type = #tpu.core_type<tc>, window_params = [{transform_indices = @transform_0, window_bounds = array<i64: 1, 8, 8, 32>}, {pipeline_mode = #tpu.pipeline_mode<synchronous>, transform_indices = @transform_1, window_bounds = array<i64: 9, 32>}, {pipeline_mode = #tpu.pipeline_mode<synchronous>, transform_indices = @transform_2, window_bounds = array<i64: 1, 32>}, {transform_indices = @transform_3, window_bounds = array<i64: 1, 8, 8, 32>}]} {
    %cst = arith.constant 0.000000e+00 : f32
    %0 = vector.broadcast %cst : f32 to vector<1x10x32xf32>
    %c0 = arith.constant 0 : index
    %c0_0 = arith.constant 0 : index
    %c0_1 = arith.constant 0 : index
    %1 = vector.load %arg5[%c0, %c0_0, %c0_1] : memref<10x10x32xf32, #tpu.memory_space<vmem>>, vector<1x10x32xf32>
    tpu.vector_store %arg5[%c0, %c0_0, %c0_1], %0 {strides = array<i32>} : memref<10x10x32xf32, #tpu.memory_space<vmem>>, vector<1x10x32xf32>,
    %cst_2 = arith.constant 0.000000e+00 : f32
    %2 = vector.broadcast %cst_2 : f32 to vector<1x10x32xf32>
    %c9 = arith.constant 9 : index
    %c0_3 = arith.constant 0 : index
    %c0_4 = arith.constant 0 : index
    %3 = vector.load %arg5[%c9, %c0_3, %c0_4] : memref<10x10x32xf32, #tpu.memory_space<vmem>>, vector<1x10x32xf32>
    tpu.vector_store %arg5[%c9, %c0_3, %c0_4], %2 {strides = array<i32>} : memref<10x10x32xf32, #tpu.memory_space<vmem>>, vector<1x10x32xf32>,
    %cst_5 = arith.constant 0.000000e+00 : f32
    %4 = vector.broadcast %cst_5 : f32 to vector<8x1x32xf32>
    %c1 = arith.constant 1 : index
    %c0_6 = arith.constant 0 : index
    %c0_7 = arith.constant 0 : index
    %5 = vector.load %arg5[%c1, %c0_6, %c0_7] : memref<10x10x32xf32, #tpu.memory_space<vmem>>, vector<8x1x32xf32>
    tpu.vector_store %arg5[%c1, %c0_6, %c0_7], %4 {strides = array<i32>} : memref<10x10x32xf32, #tpu.memory_space<vmem>>, vector<8x1x32xf32>,
    %cst_8 = arith.constant 0.000000e+00 : f32
    %6 = vector.broadcast %cst_8 : f32 to vector<8x1x32xf32>
    %c1_9 = arith.constant 1 : index
    %c9_10 = arith.constant 9 : index
    %c0_11 = arith.constant 0 : index
    %7 = vector.load %arg5[%c1_9, %c9_10, %c0_11] : memref<10x10x32xf32, #tpu.memory_space<vmem>>, vector<8x1x32xf32>
    tpu.vector_store %arg5[%c1_9, %c9_10, %c0_11], %6 {strides = array<i32>} : memref<10x10x32xf32, #tpu.memory_space<vmem>>, vector<8x1x32xf32>,
    %c0_12 = arith.constant 0 : index
    %c0_13 = arith.constant 0 : index
    %c0_14 = arith.constant 0 : index
    %c0_15 = arith.constant 0 : index
    %8 = vector.load %arg1[%c0_12, %c0_13, %c0_14, %c0_15] : memref<1x8x8x32xbf16, #tpu.memory_space<vmem>>, vector<1x8x8x32xbf16>
    %9 = vector.shape_cast %8 : vector<1x8x8x32xbf16> to vector<8x8x32xbf16>
    %10 = arith.extf %9 : vector<8x8x32xbf16> to vector<8x8x32xf32>
    %c1_16 = arith.constant 1 : index
    %c1_17 = arith.constant 1 : index
    %c0_18 = arith.constant 0 : index
    %11 = vector.load %arg5[%c1_16, %c1_17, %c0_18] : memref<10x10x32xf32, #tpu.memory_space<vmem>>, vector<8x8x32xf32>
    tpu.vector_store %arg5[%c1_16, %c1_17, %c0_18], %10 {strides = array<i32>} : memref<10x10x32xf32, #tpu.memory_space<vmem>>, vector<8x8x32xf32>,
    %cst_19 = arith.constant 0.000000e+00 : f32
    %12 = vector.broadcast %cst_19 : f32 to vector<8x8x32xf32>
    %c0_20 = arith.constant 0 : index
    %c0_21 = arith.constant 0 : index
    %c0_22 = arith.constant 0 : index
    %13 = vector.load %arg5[%c0_20, %c0_21, %c0_22] : memref<10x10x32xf32, #tpu.memory_space<vmem>>, vector<8x8x32xf32>
    %c0_23 = arith.constant 0 : index
    %c0_24 = arith.constant 0 : index
    %14 = vector.load %arg2[%c0_23, %c0_24] : memref<9x32xf32, #tpu.memory_space<vmem>>, vector<1x32xf32>
    %15 = vector.shape_cast %14 : vector<1x32xf32> to vector<1x1x32xf32>
    %16 = vector.broadcast %15 : vector<1x1x32xf32> to vector<8x8x32xf32>
    %17 = arith.mulf %13, %16 : vector<8x8x32xf32>
    %18 = arith.addf %12, %17 : vector<8x8x32xf32>
    %c0_25 = arith.constant 0 : index
    %c1_26 = arith.constant 1 : index
    %c0_27 = arith.constant 0 : index
    %19 = vector.load %arg5[%c0_25, %c1_26, %c0_27] : memref<10x10x32xf32, #tpu.memory_space<vmem>>, vector<8x8x32xf32>
    %c1_28 = arith.constant 1 : index
    %c0_29 = arith.constant 0 : index
    %20 = vector.load %arg2[%c1_28, %c0_29] : memref<9x32xf32, #tpu.memory_space<vmem>>, vector<1x32xf32>
    %21 = vector.shape_cast %20 : vector<1x32xf32> to vector<1x1x32xf32>
    %22 = vector.broadcast %21 : vector<1x1x32xf32> to vector<8x8x32xf32>
    %23 = arith.mulf %19, %22 : vector<8x8x32xf32>
    %24 = arith.addf %18, %23 : vector<8x8x32xf32>
    %c0_30 = arith.constant 0 : index
    %c2 = arith.constant 2 : index
    %c0_31 = arith.constant 0 : index
    %25 = vector.load %arg5[%c0_30, %c2, %c0_31] : memref<10x10x32xf32, #tpu.memory_space<vmem>>, vector<8x8x32xf32>
    %c2_32 = arith.constant 2 : index
    %c0_33 = arith.constant 0 : index
    %26 = vector.load %arg2[%c2_32, %c0_33] : memref<9x32xf32, #tpu.memory_space<vmem>>, vector<1x32xf32>
    %27 = vector.shape_cast %26 : vector<1x32xf32> to vector<1x1x32xf32>
    %28 = vector.broadcast %27 : vector<1x1x32xf32> to vector<8x8x32xf32>
    %29 = arith.mulf %25, %28 : vector<8x8x32xf32>
    %30 = arith.addf %24, %29 : vector<8x8x32xf32>
    %c1_34 = arith.constant 1 : index
    %c0_35 = arith.constant 0 : index
    %c0_36 = arith.constant 0 : index
    %31 = vector.load %arg5[%c1_34, %c0_35, %c0_36] : memref<10x10x32xf32, #tpu.memory_space<vmem>>, vector<8x8x32xf32>
    %c3 = arith.constant 3 : index
    %c0_37 = arith.constant 0 : index
    %32 = vector.load %arg2[%c3, %c0_37] : memref<9x32xf32, #tpu.memory_space<vmem>>, vector<1x32xf32>
    %33 = vector.shape_cast %32 : vector<1x32xf32> to vector<1x1x32xf32>
    %34 = vector.broadcast %33 : vector<1x1x32xf32> to vector<8x8x32xf32>
    %35 = arith.mulf %31, %34 : vector<8x8x32xf32>
    %36 = arith.addf %30, %35 : vector<8x8x32xf32>
    %c1_38 = arith.constant 1 : index
    %c1_39 = arith.constant 1 : index
    %c0_40 = arith.constant 0 : index
    %37 = vector.load %arg5[%c1_38, %c1_39, %c0_40] : memref<10x10x32xf32, #tpu.memory_space<vmem>>, vector<8x8x32xf32>
    %c4 = arith.constant 4 : index
    %c0_41 = arith.constant 0 : index
    %38 = vector.load %arg2[%c4, %c0_41] : memref<9x32xf32, #tpu.memory_space<vmem>>, vector<1x32xf32>
    %39 = vector.shape_cast %38 : vector<1x32xf32> to vector<1x1x32xf32>
    %40 = vector.broadcast %39 : vector<1x1x32xf32> to vector<8x8x32xf32>
    %41 = arith.mulf %37, %40 : vector<8x8x32xf32>
    %42 = arith.addf %36, %41 : vector<8x8x32xf32>
    %c1_42 = arith.constant 1 : index
    %c2_43 = arith.constant 2 : index
    %c0_44 = arith.constant 0 : index
    %43 = vector.load %arg5[%c1_42, %c2_43, %c0_44] : memref<10x10x32xf32, #tpu.memory_space<vmem>>, vector<8x8x32xf32>
    %c5 = arith.constant 5 : index
    %c0_45 = arith.constant 0 : index
    %44 = vector.load %arg2[%c5, %c0_45] : memref<9x32xf32, #tpu.memory_space<vmem>>, vector<1x32xf32>
    %45 = vector.shape_cast %44 : vector<1x32xf32> to vector<1x1x32xf32>
    %46 = vector.broadcast %45 : vector<1x1x32xf32> to vector<8x8x32xf32>
    %47 = arith.mulf %43, %46 : vector<8x8x32xf32>
    %48 = arith.addf %42, %47 : vector<8x8x32xf32>
    %c2_46 = arith.constant 2 : index
    %c0_47 = arith.constant 0 : index
    %c0_48 = arith.constant 0 : index
    %49 = vector.load %arg5[%c2_46, %c0_47, %c0_48] : memref<10x10x32xf32, #tpu.memory_space<vmem>>, vector<8x8x32xf32>
    %c6 = arith.constant 6 : index
    %c0_49 = arith.constant 0 : index
    %50 = vector.load %arg2[%c6, %c0_49] : memref<9x32xf32, #tpu.memory_space<vmem>>, vector<1x32xf32>
    %51 = vector.shape_cast %50 : vector<1x32xf32> to vector<1x1x32xf32>
    %52 = vector.broadcast %51 : vector<1x1x32xf32> to vector<8x8x32xf32>
    %53 = arith.mulf %49, %52 : vector<8x8x32xf32>
    %54 = arith.addf %48, %53 : vector<8x8x32xf32>
    %c2_50 = arith.constant 2 : index
    %c1_51 = arith.constant 1 : index
    %c0_52 = arith.constant 0 : index
    %55 = vector.load %arg5[%c2_50, %c1_51, %c0_52] : memref<10x10x32xf32, #tpu.memory_space<vmem>>, vector<8x8x32xf32>
    %c7 = arith.constant 7 : index
    %c0_53 = arith.constant 0 : index
    %56 = vector.load %arg2[%c7, %c0_53] : memref<9x32xf32, #tpu.memory_space<vmem>>, vector<1x32xf32>
    %57 = vector.shape_cast %56 : vector<1x32xf32> to vector<1x1x32xf32>
    %58 = vector.broadcast %57 : vector<1x1x32xf32> to vector<8x8x32xf32>
    %59 = arith.mulf %55, %58 : vector<8x8x32xf32>
    %60 = arith.addf %54, %59 : vector<8x8x32xf32>
    %c2_54 = arith.constant 2 : index
    %c2_55 = arith.constant 2 : index
    %c0_56 = arith.constant 0 : index
    %61 = vector.load %arg5[%c2_54, %c2_55, %c0_56] : memref<10x10x32xf32, #tpu.memory_space<vmem>>, vector<8x8x32xf32>
    %c8 = arith.constant 8 : index
    %c0_57 = arith.constant 0 : index
    %62 = vector.load %arg2[%c8, %c0_57] : memref<9x32xf32, #tpu.memory_space<vmem>>, vector<1x32xf32>
    %63 = vector.shape_cast %62 : vector<1x32xf32> to vector<1x1x32xf32>
    %64 = vector.broadcast %63 : vector<1x1x32xf32> to vector<8x8x32xf32>
    %65 = arith.mulf %61, %64 : vector<8x8x32xf32>
    %66 = arith.addf %60, %65 : vector<8x8x32xf32>
    %c0_58 = arith.constant 0 : index
    %c0_59 = arith.constant 0 : index
    %67 = vector.load %arg3[%c0_58, %c0_59] : memref<1x32xf32, #tpu.memory_space<vmem>>, vector<1x32xf32>
    %68 = vector.shape_cast %67 : vector<1x32xf32> to vector<1x1x32xf32>
    %69 = vector.broadcast %68 : vector<1x1x32xf32> to vector<8x8x32xf32>
    %70 = arith.addf %66, %69 : vector<8x8x32xf32>
    %71 = math.absf %70 : vector<8x8x32xf32>
    %cst_60 = arith.constant 0.000000e+00 : f32
    %72 = vector.broadcast %cst_60 : f32 to vector<8x8x32xf32>
    %73 = arith.subf %72, %71 : vector<8x8x32xf32>
    %74 = math.exp %73 : vector<8x8x32xf32>
    %cst_61 = arith.constant 0.000000e+00 : f32
    %75 = vector.broadcast %cst_61 : f32 to vector<8x8x32xf32>
    %76 = arith.cmpf oge, %70, %75 : vector<8x8x32xf32>
    %cst_62 = arith.constant 1.000000e+00 : f32
    %77 = vector.broadcast %cst_62 : f32 to vector<8x8x32xf32>
    %78 = arith.select %76, %77, %74 : vector<8x8x32xi1>, vector<8x8x32xf32>
    %cst_63 = arith.constant 1.000000e+00 : f32
    %79 = vector.broadcast %cst_63 : f32 to vector<8x8x32xf32>
    %80 = arith.addf %79, %74 : vector<8x8x32xf32>
    %81 = arith.divf %78, %80 : vector<8x8x32xf32>
    %82 = arith.mulf %70, %81 : vector<8x8x32xf32>
    %83 = arith.truncf %82 : vector<8x8x32xf32> to vector<8x8x32xbf16>
    %c0_64 = arith.constant 0 : index
    %c0_65 = arith.constant 0 : index
    %c0_66 = arith.constant 0 : index
    %c0_67 = arith.constant 0 : index
    %84 = vector.load %arg4[%c0_64, %c0_65, %c0_66, %c0_67] : memref<1x8x8x32xbf16, #tpu.memory_space<vmem>>, vector<1x8x8x32xbf16>
    %85 = vector.shape_cast %84 : vector<1x8x8x32xbf16> to vector<8x8x32xbf16>
    %86 = vector.shape_cast %83 : vector<8x8x32xbf16> to vector<1x8x8x32xbf16>
    tpu.vector_store %arg4[%c0_64, %c0_65, %c0_66, %c0_67], %86 {strides = array<i32>} : memref<1x8x8x32xbf16, #tpu.memory_space<vmem>>, vector<1x8x8x32xbf16>,
    return
  }
  func.func @transform_0(%arg0: i32) -> (i32, i32, i32, i32) {
    %c0_i32 = arith.constant 0 : i32
    %c0_i32_0 = arith.constant 0 : i32
    %c0_i32_1 = arith.constant 0 : i32
    %c0_i32_2 = arith.constant 0 : i32
    return %arg0, %c0_i32, %c0_i32_0, %c0_i32_1 : i32, i32, i32, i32
  }
  func.func @transform_1(%arg0: i32) -> (i32, i32) {
    %c0_i32 = arith.constant 0 : i32
    %c0_i32_0 = arith.constant 0 : i32
    %c0_i32_1 = arith.constant 0 : i32
    return %c0_i32, %c0_i32_0 : i32, i32
  }
  func.func @transform_2(%arg0: i32) -> (i32, i32) {
    %c0_i32 = arith.constant 0 : i32
    %c0_i32_0 = arith.constant 0 : i32
    %c0_i32_1 = arith.constant 0 : i32
    return %c0_i32, %c0_i32_0 : i32, i32
  }
  func.func @transform_3(%arg0: i32) -> (i32, i32, i32, i32) {
    %c0_i32 = arith.constant 0 : i32
    %c0_i32_0 = arith.constant 0 : i32
    %c0_i32_1 = arith.constant 0 : i32
    %c0_i32_2 = arith.constant 0 : i32
    return %arg0, %c0_i32, %c0_i32_0, %c0_i32_1 : i32, i32, i32, i32
  }
}

module attributes {stable_mosaic.version = 11 : i64} {
  func.func @_ss2d_scan_kernel(%arg0: i32, %arg1: i32, %arg2: i32, %arg3: memref<1x1x64x32xbf16, #tpu.memory_space<vmem>>, %arg4: memref<1x32x64xf32, #tpu.memory_space<vmem>>, %arg5: memref<1x1x32xf32, #tpu.memory_space<vmem>>, %arg6: memref<1x16x32xf32, #tpu.memory_space<vmem>>, %arg7: memref<1x1x32xf32, #tpu.memory_space<vmem>>, %arg8: memref<1x1x64x32xbf16, #tpu.memory_space<vmem>>, %arg9: memref<16x32xf32, #tpu.memory_space<vmem>>, %arg10: memref<64x32xf32, #tpu.memory_space<vmem>>, %arg11: memref<64x16xf32, #tpu.memory_space<vmem>>, %arg12: memref<64x16xf32, #tpu.memory_space<vmem>>, %arg13: memref<8x16x32xf32, #tpu.memory_space<vmem>>) attributes {dimension_semantics = [#tpu.dimension_semantics<parallel>, #tpu.dimension_semantics<parallel>, #tpu.dimension_semantics<arbitrary>], iteration_bounds = array<i64: 2, 4, 1>, scalar_prefetch = 0 : i64, scratch_operands = 5 : i64, tpu.core_type = #tpu.core_type<tc>, window_params = [{transform_indices = @transform_0, window_bounds = array<i64: 1, 1, 64, 32>}, {transform_indices = @transform_1, window_bounds = array<i64: 1, 32, 64>}, {transform_indices = @transform_2, window_bounds = array<i64: 1, 1, 32>}, {transform_indices = @transform_3, window_bounds = array<i64: 1, 16, 32>}, {transform_indices = @transform_4, window_bounds = array<i64: 1, 1, 32>}, {transform_indices = @transform_5, window_bounds = array<i64: 1, 1, 64, 32>}]} {
    %c0_i32 = arith.constant 0 : i32
    %0 = arith.cmpi eq, %arg2, %c0_i32 : i32
    %1 = arith.extui %0 : i1 to i32
    %c0_i32_0 = arith.constant 0 : i32
    %2 = arith.cmpi ne, %1, %c0_i32_0 : i32
    scf.if %2 {
      %cst_31 = arith.constant 0.000000e+00 : f32
      %36 = vector.broadcast %cst_31 : f32 to vector<16x32xf32>
      %c0_32 = arith.constant 0 : index
      %c0_33 = arith.constant 0 : index
      %37 = vector.load %arg9[%c0_32, %c0_33] : memref<16x32xf32, #tpu.memory_space<vmem>>, vector<16x32xf32>
      tpu.vector_store %arg9[%c0_32, %c0_33], %36 {strides = array<i32>} : memref<16x32xf32, #tpu.memory_space<vmem>>, vector<16x32xf32>,
    } else {
    }
    %c0 = arith.constant 0 : index
    %c0_1 = arith.constant 0 : index
    %c0_2 = arith.constant 0 : index
    %c0_3 = arith.constant 0 : index
    %3 = vector.load %arg3[%c0, %c0_1, %c0_2, %c0_3] : memref<1x1x64x32xbf16, #tpu.memory_space<vmem>>, vector<1x1x64x32xbf16>
    %4 = vector.shape_cast %3 : vector<1x1x64x32xbf16> to vector<64x32xbf16>
    %5 = arith.extf %4 : vector<64x32xbf16> to vector<64x32xf32>
    %c0_4 = arith.constant 0 : index
    %c0_5 = arith.constant 0 : index
    %c0_6 = arith.constant 0 : index
    %6 = vector.load %arg4[%c0_4, %c0_5, %c0_6] : memref<1x32x64xf32, #tpu.memory_space<vmem>>, vector<1x32x64xf32>
    %7 = vector.shape_cast %6 : vector<1x32x64xf32> to vector<32x64xf32>
    %cst = arith.constant dense<0.000000e+00> : vector<64x64xf32>
    %8 = tpu.matmul %5, %7, %cst {dimension_numbers = #tpu.dot_dimension_numbers<[1], [0], [0], [1], [0, 0, 1, 1], [], []>} : vector<64x32xf32>, vector<32x64xf32>, vector<64x64xf32> -> vector<64x64xf32>
    %9 = vector.extract_strided_slice %8 {offsets = [0, 0], sizes = [64, 32], strides = [1, 1]} : vector<64x64xf32> to vector<64x32xf32>
    %c0_7 = arith.constant 0 : index
    %c0_8 = arith.constant 0 : index
    %c0_9 = arith.constant 0 : index
    %10 = vector.load %arg5[%c0_7, %c0_8, %c0_9] : memref<1x1x32xf32, #tpu.memory_space<vmem>>, vector<1x1x32xf32>
    %11 = vector.shape_cast %10 : vector<1x1x32xf32> to vector<1x32xf32>
    %12 = vector.broadcast %11 : vector<1x32xf32> to vector<64x32xf32>
    %13 = arith.addf %9, %12 : vector<64x32xf32>
    %cst_10 = arith.constant 2.000000e+01 : f32
    %14 = vector.broadcast %cst_10 : f32 to vector<64x32xf32>
    %15 = arith.cmpf ogt, %13, %14 : vector<64x32xf32>
    %cst_11 = arith.constant 2.000000e+01 : f32
    %16 = vector.broadcast %cst_11 : f32 to vector<64x32xf32>
    %17 = arith.minimumf %13, %16 : vector<64x32xf32>
    %18 = math.exp %17 : vector<64x32xf32>
    %cst_12 = arith.constant 1.000000e+00 : f32
    %19 = vector.broadcast %cst_12 : f32 to vector<64x32xf32>
    %20 = arith.addf %19, %18 : vector<64x32xf32>
    %21 = math.log %20 : vector<64x32xf32>
    %22 = arith.select %15, %13, %21 : vector<64x32xi1>, vector<64x32xf32>
    %c0_13 = arith.constant 0 : index
    %c0_14 = arith.constant 0 : index
    %23 = vector.load %arg10[%c0_13, %c0_14] : memref<64x32xf32, #tpu.memory_space<vmem>>, vector<64x32xf32>
    tpu.vector_store %arg10[%c0_13, %c0_14], %22 {strides = array<i32>} : memref<64x32xf32, #tpu.memory_space<vmem>>, vector<64x32xf32>,
    %24 = vector.extract_strided_slice %8 {offsets = [0, 32], sizes = [64, 16], strides = [1, 1]} : vector<64x64xf32> to vector<64x16xf32>
    %c0_15 = arith.constant 0 : index
    %c0_16 = arith.constant 0 : index
    %25 = vector.load %arg11[%c0_15, %c0_16] : memref<64x16xf32, #tpu.memory_space<vmem>>, vector<64x16xf32>
    tpu.vector_store %arg11[%c0_15, %c0_16], %24 {strides = array<i32>} : memref<64x16xf32, #tpu.memory_space<vmem>>, vector<64x16xf32>,
    %26 = vector.extract_strided_slice %8 {offsets = [0, 48], sizes = [64, 16], strides = [1, 1]} : vector<64x64xf32> to vector<64x16xf32>
    %c0_17 = arith.constant 0 : index
    %c0_18 = arith.constant 0 : index
    %27 = vector.load %arg12[%c0_17, %c0_18] : memref<64x16xf32, #tpu.memory_space<vmem>>, vector<64x16xf32>
    tpu.vector_store %arg12[%c0_17, %c0_18], %26 {strides = array<i32>} : memref<64x16xf32, #tpu.memory_space<vmem>>, vector<64x16xf32>,
    %c0_19 = arith.constant 0 : index
    %c0_20 = arith.constant 0 : index
    %c0_21 = arith.constant 0 : index
    %28 = vector.load %arg6[%c0_19, %c0_20, %c0_21] : memref<1x16x32xf32, #tpu.memory_space<vmem>>, vector<1x16x32xf32>
    %29 = vector.shape_cast %28 : vector<1x16x32xf32> to vector<16x32xf32>
    %c0_22 = arith.constant 0 : index
    %c0_23 = arith.constant 0 : index
    %c0_24 = arith.constant 0 : index
    %30 = vector.load %arg7[%c0_22, %c0_23, %c0_24] : memref<1x1x32xf32, #tpu.memory_space<vmem>>, vector<1x1x32xf32>
    %31 = vector.shape_cast %30 : vector<1x1x32xf32> to vector<1x32xf32>
    %c0_25 = arith.constant 0 : index
    %c0_26 = arith.constant 0 : index
    %32 = vector.load %arg9[%c0_25, %c0_26] : memref<16x32xf32, #tpu.memory_space<vmem>>, vector<16x32xf32>
    %c0_i32_27 = arith.constant 0 : i32
    %c8_i32 = arith.constant 8 : i32
    %33 = arith.addi %c0_i32_27, %c8_i32 : i32
    %c1_i32 = arith.constant 1 : i32
    %34 = scf.for %arg14 = %c0_i32_27 to %33 step %c1_i32 iter_args(%arg15 = %32) -> (vector<16x32xf32>)  : i32 {
      %c8_i32_31 = arith.constant 8 : i32
      %36 = arith.muli %arg14, %c8_i32_31 : i32
      %37 = tpu.assume_multiple %36, 8 : i32
      %c0_32 = arith.constant 0 : index
      %c0_33 = arith.constant 0 : index
      %38 = arith.index_cast %37 : i32 to index
      %c0_34 = arith.constant 0 : index
      %39 = vector.load %arg3[%c0_32, %c0_33, %38, %c0_34] : memref<1x1x64x32xbf16, #tpu.memory_space<vmem>>, vector<1x1x8x32xbf16>
      %40 = vector.shape_cast %39 : vector<1x1x8x32xbf16> to vector<8x32xbf16>
      %41 = arith.extf %40 : vector<8x32xbf16> to vector<8x32xf32>
      %42 = arith.index_cast %37 : i32 to index
      %c0_35 = arith.constant 0 : index
      %43 = vector.load %arg10[%42, %c0_35] : memref<64x32xf32, #tpu.memory_space<vmem>>, vector<8x32xf32>
      %44 = arith.index_cast %37 : i32 to index
      %c0_36 = arith.constant 0 : index
      %45 = vector.load %arg11[%44, %c0_36] : memref<64x16xf32, #tpu.memory_space<vmem>>, vector<8x16xf32>
      %46 = arith.index_cast %37 : i32 to index
      %c0_37 = arith.constant 0 : index
      %47 = vector.load %arg12[%46, %c0_37] : memref<64x16xf32, #tpu.memory_space<vmem>>, vector<8x16xf32>
      %48 = vector.shape_cast %43 : vector<8x32xf32> to vector<8x1x32xf32>
      %49 = vector.shape_cast %29 : vector<16x32xf32> to vector<1x16x32xf32>
      %50 = vector.broadcast %48 : vector<8x1x32xf32> to vector<8x16x32xf32>
      %51 = vector.broadcast %49 : vector<1x16x32xf32> to vector<8x16x32xf32>
      %52 = arith.mulf %50, %51 : vector<8x16x32xf32>
      %53 = math.exp %52 : vector<8x16x32xf32>
      %54 = vector.shape_cast %45 : vector<8x16xf32> to vector<8x16x1xf32>
      %55 = arith.mulf %43, %41 : vector<8x32xf32>
      %56 = vector.shape_cast %55 : vector<8x32xf32> to vector<8x1x32xf32>
      %57 = vector.broadcast %54 : vector<8x16x1xf32> to vector<8x16x32xf32>
      %58 = vector.broadcast %56 : vector<8x1x32xf32> to vector<8x16x32xf32>
      %59 = arith.mulf %57, %58 : vector<8x16x32xf32>
      %60 = vector.extract_strided_slice %53 {offsets = [0, 0, 0], sizes = [1, 16, 32], strides = [1, 1, 1]} : vector<8x16x32xf32> to vector<1x16x32xf32>
      %61 = vector.shape_cast %60 : vector<1x16x32xf32> to vector<16x32xf32>
      %62 = arith.mulf %61, %arg15 : vector<16x32xf32>
      %63 = vector.extract_strided_slice %59 {offsets = [0, 0, 0], sizes = [1, 16, 32], strides = [1, 1, 1]} : vector<8x16x32xf32> to vector<1x16x32xf32>
      %64 = vector.shape_cast %63 : vector<1x16x32xf32> to vector<16x32xf32>
      %65 = arith.addf %62, %64 : vector<16x32xf32>
      %c0_38 = arith.constant 0 : index
      %c0_39 = arith.constant 0 : index
      %c0_40 = arith.constant 0 : index
      %66 = vector.load %arg13[%c0_38, %c0_39, %c0_40] : memref<8x16x32xf32, #tpu.memory_space<vmem>>, vector<1x16x32xf32>
      %67 = vector.shape_cast %66 : vector<1x16x32xf32> to vector<16x32xf32>
      %68 = vector.shape_cast %65 : vector<16x32xf32> to vector<1x16x32xf32>
      tpu.vector_store %arg13[%c0_38, %c0_39, %c0_40], %68 {strides = array<i32>} : memref<8x16x32xf32, #tpu.memory_space<vmem>>, vector<1x16x32xf32>,
      %69 = vector.extract_strided_slice %53 {offsets = [1, 0, 0], sizes = [1, 16, 32], strides = [1, 1, 1]} : vector<8x16x32xf32> to vector<1x16x32xf32>
      %70 = vector.shape_cast %69 : vector<1x16x32xf32> to vector<16x32xf32>
      %71 = arith.mulf %70, %65 : vector<16x32xf32>
      %72 = vector.extract_strided_slice %59 {offsets = [1, 0, 0], sizes = [1, 16, 32], strides = [1, 1, 1]} : vector<8x16x32xf32> to vector<1x16x32xf32>
      %73 = vector.shape_cast %72 : vector<1x16x32xf32> to vector<16x32xf32>
      %74 = arith.addf %71, %73 : vector<16x32xf32>
      %c1 = arith.constant 1 : index
      %c0_41 = arith.constant 0 : index
      %c0_42 = arith.constant 0 : index
      %75 = vector.load %arg13[%c1, %c0_41, %c0_42] : memref<8x16x32xf32, #tpu.memory_space<vmem>>, vector<1x16x32xf32>
      %76 = vector.shape_cast %75 : vector<1x16x32xf32> to vector<16x32xf32>
      %77 = vector.shape_cast %74 : vector<16x32xf32> to vector<1x16x32xf32>
      tpu.vector_store %arg13[%c1, %c0_41, %c0_42], %77 {strides = array<i32>} : memref<8x16x32xf32, #tpu.memory_space<vmem>>, vector<1x16x32xf32>,
      %78 = vector.extract_strided_slice %53 {offsets = [2, 0, 0], sizes = [1, 16, 32], strides = [1, 1, 1]} : vector<8x16x32xf32> to vector<1x16x32xf32>
      %79 = vector.shape_cast %78 : vector<1x16x32xf32> to vector<16x32xf32>
      %80 = arith.mulf %79, %74 : vector<16x32xf32>
      %81 = vector.extract_strided_slice %59 {offsets = [2, 0, 0], sizes = [1, 16, 32], strides = [1, 1, 1]} : vector<8x16x32xf32> to vector<1x16x32xf32>
      %82 = vector.shape_cast %81 : vector<1x16x32xf32> to vector<16x32xf32>
      %83 = arith.addf %80, %82 : vector<16x32xf32>
      %c2 = arith.constant 2 : index
      %c0_43 = arith.constant 0 : index
      %c0_44 = arith.constant 0 : index
      %84 = vector.load %arg13[%c2, %c0_43, %c0_44] : memref<8x16x32xf32, #tpu.memory_space<vmem>>, vector<1x16x32xf32>
      %85 = vector.shape_cast %84 : vector<1x16x32xf32> to vector<16x32xf32>
      %86 = vector.shape_cast %83 : vector<16x32xf32> to vector<1x16x32xf32>
      tpu.vector_store %arg13[%c2, %c0_43, %c0_44], %86 {strides = array<i32>} : memref<8x16x32xf32, #tpu.memory_space<vmem>>, vector<1x16x32xf32>,
      %87 = vector.extract_strided_slice %53 {offsets = [3, 0, 0], sizes = [1, 16, 32], strides = [1, 1, 1]} : vector<8x16x32xf32> to vector<1x16x32xf32>
      %88 = vector.shape_cast %87 : vector<1x16x32xf32> to vector<16x32xf32>
      %89 = arith.mulf %88, %83 : vector<16x32xf32>
      %90 = vector.extract_strided_slice %59 {offsets = [3, 0, 0], sizes = [1, 16, 32], strides = [1, 1, 1]} : vector<8x16x32xf32> to vector<1x16x32xf32>
      %91 = vector.shape_cast %90 : vector<1x16x32xf32> to vector<16x32xf32>
      %92 = arith.addf %89, %91 : vector<16x32xf32>
      %c3 = arith.constant 3 : index
      %c0_45 = arith.constant 0 : index
      %c0_46 = arith.constant 0 : index
      %93 = vector.load %arg13[%c3, %c0_45, %c0_46] : memref<8x16x32xf32, #tpu.memory_space<vmem>>, vector<1x16x32xf32>
      %94 = vector.shape_cast %93 : vector<1x16x32xf32> to vector<16x32xf32>
      %95 = vector.shape_cast %92 : vector<16x32xf32> to vector<1x16x32xf32>
      tpu.vector_store %arg13[%c3, %c0_45, %c0_46], %95 {strides = array<i32>} : memref<8x16x32xf32, #tpu.memory_space<vmem>>, vector<1x16x32xf32>,
      %96 = vector.extract_strided_slice %53 {offsets = [4, 0, 0], sizes = [1, 16, 32], strides = [1, 1, 1]} : vector<8x16x32xf32> to vector<1x16x32xf32>
      %97 = vector.shape_cast %96 : vector<1x16x32xf32> to vector<16x32xf32>
      %98 = arith.mulf %97, %92 : vector<16x32xf32>
      %99 = vector.extract_strided_slice %59 {offsets = [4, 0, 0], sizes = [1, 16, 32], strides = [1, 1, 1]} : vector<8x16x32xf32> to vector<1x16x32xf32>
      %100 = vector.shape_cast %99 : vector<1x16x32xf32> to vector<16x32xf32>
      %101 = arith.addf %98, %100 : vector<16x32xf32>
      %c4 = arith.constant 4 : index
      %c0_47 = arith.constant 0 : index
      %c0_48 = arith.constant 0 : index
      %102 = vector.load %arg13[%c4, %c0_47, %c0_48] : memref<8x16x32xf32, #tpu.memory_space<vmem>>, vector<1x16x32xf32>
      %103 = vector.shape_cast %102 : vector<1x16x32xf32> to vector<16x32xf32>
      %104 = vector.shape_cast %101 : vector<16x32xf32> to vector<1x16x32xf32>
      tpu.vector_store %arg13[%c4, %c0_47, %c0_48], %104 {strides = array<i32>} : memref<8x16x32xf32, #tpu.memory_space<vmem>>, vector<1x16x32xf32>,
      %105 = vector.extract_strided_slice %53 {offsets = [5, 0, 0], sizes = [1, 16, 32], strides = [1, 1, 1]} : vector<8x16x32xf32> to vector<1x16x32xf32>
      %106 = vector.shape_cast %105 : vector<1x16x32xf32> to vector<16x32xf32>
      %107 = arith.mulf %106, %101 : vector<16x32xf32>
      %108 = vector.extract_strided_slice %59 {offsets = [5, 0, 0], sizes = [1, 16, 32], strides = [1, 1, 1]} : vector<8x16x32xf32> to vector<1x16x32xf32>
      %109 = vector.shape_cast %108 : vector<1x16x32xf32> to vector<16x32xf32>
      %110 = arith.addf %107, %109 : vector<16x32xf32>
      %c5 = arith.constant 5 : index
      %c0_49 = arith.constant 0 : index
      %c0_50 = arith.constant 0 : index
      %111 = vector.load %arg13[%c5, %c0_49, %c0_50] : memref<8x16x32xf32, #tpu.memory_space<vmem>>, vector<1x16x32xf32>
      %112 = vector.shape_cast %111 : vector<1x16x32xf32> to vector<16x32xf32>
      %113 = vector.shape_cast %110 : vector<16x32xf32> to vector<1x16x32xf32>
      tpu.vector_store %arg13[%c5, %c0_49, %c0_50], %113 {strides = array<i32>} : memref<8x16x32xf32, #tpu.memory_space<vmem>>, vector<1x16x32xf32>,
      %114 = vector.extract_strided_slice %53 {offsets = [6, 0, 0], sizes = [1, 16, 32], strides = [1, 1, 1]} : vector<8x16x32xf32> to vector<1x16x32xf32>
      %115 = vector.shape_cast %114 : vector<1x16x32xf32> to vector<16x32xf32>
      %116 = arith.mulf %115, %110 : vector<16x32xf32>
      %117 = vector.extract_strided_slice %59 {offsets = [6, 0, 0], sizes = [1, 16, 32], strides = [1, 1, 1]} : vector<8x16x32xf32> to vector<1x16x32xf32>
      %118 = vector.shape_cast %117 : vector<1x16x32xf32> to vector<16x32xf32>
      %119 = arith.addf %116, %118 : vector<16x32xf32>
      %c6 = arith.constant 6 : index
      %c0_51 = arith.constant 0 : index
      %c0_52 = arith.constant 0 : index
      %120 = vector.load %arg13[%c6, %c0_51, %c0_52] : memref<8x16x32xf32, #tpu.memory_space<vmem>>, vector<1x16x32xf32>
      %121 = vector.shape_cast %120 : vector<1x16x32xf32> to vector<16x32xf32>
      %122 = vector.shape_cast %119 : vector<16x32xf32> to vector<1x16x32xf32>
      tpu.vector_store %arg13[%c6, %c0_51, %c0_52], %122 {strides = array<i32>} : memref<8x16x32xf32, #tpu.memory_space<vmem>>, vector<1x16x32xf32>,
      %123 = vector.extract_strided_slice %53 {offsets = [7, 0, 0], sizes = [1, 16, 32], strides = [1, 1, 1]} : vector<8x16x32xf32> to vector<1x16x32xf32>
      %124 = vector.shape_cast %123 : vector<1x16x32xf32> to vector<16x32xf32>
      %125 = arith.mulf %124, %119 : vector<16x32xf32>
      %126 = vector.extract_strided_slice %59 {offsets = [7, 0, 0], sizes = [1, 16, 32], strides = [1, 1, 1]} : vector<8x16x32xf32> to vector<1x16x32xf32>
      %127 = vector.shape_cast %126 : vector<1x16x32xf32> to vector<16x32xf32>
      %128 = arith.addf %125, %127 : vector<16x32xf32>
      %c7 = arith.constant 7 : index
      %c0_53 = arith.constant 0 : index
      %c0_54 = arith.constant 0 : index
      %129 = vector.load %arg13[%c7, %c0_53, %c0_54] : memref<8x16x32xf32, #tpu.memory_space<vmem>>, vector<1x16x32xf32>
      %130 = vector.shape_cast %129 : vector<1x16x32xf32> to vector<16x32xf32>
      %131 = vector.shape_cast %128 : vector<16x32xf32> to vector<1x16x32xf32>
      tpu.vector_store %arg13[%c7, %c0_53, %c0_54], %131 {strides = array<i32>} : memref<8x16x32xf32, #tpu.memory_space<vmem>>, vector<1x16x32xf32>,
      %132 = vector.shape_cast %47 : vector<8x16xf32> to vector<8x16x1xf32>
      %c0_55 = arith.constant 0 : index
      %c0_56 = arith.constant 0 : index
      %c0_57 = arith.constant 0 : index
      %133 = vector.load %arg13[%c0_55, %c0_56, %c0_57] : memref<8x16x32xf32, #tpu.memory_space<vmem>>, vector<8x16x32xf32>
      %134 = vector.broadcast %132 : vector<8x16x1xf32> to vector<8x16x32xf32>
      %135 = arith.mulf %134, %133 : vector<8x16x32xf32>
      %cst_58 = arith.constant dense<0.000000e+00> : vector<8x32xf32>
      %136 = vector.multi_reduction <add>, %135, %cst_58 [1] : vector<8x16x32xf32> to vector<8x32xf32>
      %137 = vector.broadcast %31 : vector<1x32xf32> to vector<8x32xf32>
      %138 = arith.mulf %137, %41 : vector<8x32xf32>
      %139 = arith.addf %136, %138 : vector<8x32xf32>
      %140 = arith.truncf %139 : vector<8x32xf32> to vector<8x32xbf16>
      %c0_59 = arith.constant 0 : index
      %c0_60 = arith.constant 0 : index
      %141 = arith.index_cast %37 : i32 to index
      %c0_61 = arith.constant 0 : index
      %142 = vector.load %arg8[%c0_59, %c0_60, %141, %c0_61] : memref<1x1x64x32xbf16, #tpu.memory_space<vmem>>, vector<1x1x8x32xbf16>
      %143 = vector.shape_cast %142 : vector<1x1x8x32xbf16> to vector<8x32xbf16>
      %144 = vector.shape_cast %140 : vector<8x32xbf16> to vector<1x1x8x32xbf16>
      tpu.vector_store %arg8[%c0_59, %c0_60, %141, %c0_61], %144 {strides = array<i32>} : memref<1x1x64x32xbf16, #tpu.memory_space<vmem>>, vector<1x1x8x32xbf16>,
      scf.yield %128 : vector<16x32xf32>
    }
    %c8_i32_28 = arith.constant 8 : i32
    %c0_29 = arith.constant 0 : index
    %c0_30 = arith.constant 0 : index
    %35 = vector.load %arg9[%c0_29, %c0_30] : memref<16x32xf32, #tpu.memory_space<vmem>>, vector<16x32xf32>
    tpu.vector_store %arg9[%c0_29, %c0_30], %34 {strides = array<i32>} : memref<16x32xf32, #tpu.memory_space<vmem>>, vector<16x32xf32>,
    return
  }
  func.func @transform_0(%arg0: i32, %arg1: i32, %arg2: i32) -> (i32, i32, i32, i32) {
    %c0_i32 = arith.constant 0 : i32
    %c0_i32_0 = arith.constant 0 : i32
    return %arg0, %arg1, %arg2, %c0_i32 : i32, i32, i32, i32
  }
  func.func @transform_1(%arg0: i32, %arg1: i32, %arg2: i32) -> (i32, i32, i32) {
    %c0_i32 = arith.constant 0 : i32
    %c0_i32_0 = arith.constant 0 : i32
    %c0_i32_1 = arith.constant 0 : i32
    return %arg1, %c0_i32, %c0_i32_0 : i32, i32, i32
  }
  func.func @transform_2(%arg0: i32, %arg1: i32, %arg2: i32) -> (i32, i32, i32) {
    %c0_i32 = arith.constant 0 : i32
    %c0_i32_0 = arith.constant 0 : i32
    %c0_i32_1 = arith.constant 0 : i32
    return %arg1, %c0_i32, %c0_i32_0 : i32, i32, i32
  }
  func.func @transform_3(%arg0: i32, %arg1: i32, %arg2: i32) -> (i32, i32, i32) {
    %c0_i32 = arith.constant 0 : i32
    %c0_i32_0 = arith.constant 0 : i32
    %c0_i32_1 = arith.constant 0 : i32
    return %arg1, %c0_i32, %c0_i32_0 : i32, i32, i32
  }
  func.func @transform_4(%arg0: i32, %arg1: i32, %arg2: i32) -> (i32, i32, i32) {
    %c0_i32 = arith.constant 0 : i32
    %c0_i32_0 = arith.constant 0 : i32
    %c0_i32_1 = arith.constant 0 : i32
    return %arg1, %c0_i32, %c0_i32_0 : i32, i32, i32
  }
  func.func @transform_5(%arg0: i32, %arg1: i32, %arg2: i32) -> (i32, i32, i32, i32) {
    %c0_i32 = arith.constant 0 : i32
    %c0_i32_0 = arith.constant 0 : i32
    return %arg0, %arg1, %arg2, %c0_i32 : i32, i32, i32, i32
  }
}

module attributes {stable_mosaic.version = 11 : i64} {
  func.func @_gated_ln_out_proj_kernel(%arg0: i32, %arg1: memref<128x32xbf16, #tpu.memory_space<vmem>>, %arg2: memref<128x32xbf16, #tpu.memory_space<vmem>>, %arg3: memref<1x32xf32, #tpu.memory_space<vmem>>, %arg4: memref<1x32xf32, #tpu.memory_space<vmem>>, %arg5: memref<32x16xf32, #tpu.memory_space<vmem>>, %arg6: memref<128x16xf32, #tpu.memory_space<vmem>>, %arg7: memref<128x16xf32, #tpu.memory_space<vmem>>) attributes {dimension_semantics = [#tpu.dimension_semantics<parallel>], iteration_bounds = array<i64: 1>, scalar_prefetch = 0 : i64, scratch_operands = 0 : i64, tpu.core_type = #tpu.core_type<tc>, window_params = [{transform_indices = @transform_0, window_bounds = array<i64: 128, 32>}, {transform_indices = @transform_1, window_bounds = array<i64: 128, 32>}, {pipeline_mode = #tpu.pipeline_mode<synchronous>, transform_indices = @transform_2, window_bounds = array<i64: 1, 32>}, {pipeline_mode = #tpu.pipeline_mode<synchronous>, transform_indices = @transform_3, window_bounds = array<i64: 1, 32>}, {pipeline_mode = #tpu.pipeline_mode<synchronous>, transform_indices = @transform_4, window_bounds = array<i64: 32, 16>}, {transform_indices = @transform_5, window_bounds = array<i64: 128, 16>}, {transform_indices = @transform_6, window_bounds = array<i64: 128, 16>}]} {
    %c0 = arith.constant 0 : index
    %c0_0 = arith.constant 0 : index
    %0 = vector.load %arg1[%c0, %c0_0] : memref<128x32xbf16, #tpu.memory_space<vmem>>, vector<128x32xbf16>
    %1 = arith.extf %0 : vector<128x32xbf16> to vector<128x32xf32>
    %cst = arith.constant dense<0.000000e+00> : vector<128xf32>
    %2 = vector.multi_reduction <add>, %1, %cst [1] : vector<128x32xf32> to vector<128xf32>
    %3 = vector.shape_cast %2 : vector<128xf32> to vector<128x1xf32>
    %cst_1 = arith.constant 3.200000e+01 : f32
    %4 = vector.broadcast %cst_1 : f32 to vector<128x1xf32>
    %5 = arith.divf %3, %4 : vector<128x1xf32>
    %6 = vector.broadcast %5 : vector<128x1xf32> to vector<128x32xf32>
    %7 = arith.subf %1, %6 : vector<128x32xf32>
    %8 = arith.mulf %7, %7 : vector<128x32xf32>
    %cst_2 = arith.constant dense<0.000000e+00> : vector<128xf32>
    %9 = vector.multi_reduction <add>, %8, %cst_2 [1] : vector<128x32xf32> to vector<128xf32>
    %10 = vector.shape_cast %9 : vector<128xf32> to vector<128x1xf32>
    %cst_3 = arith.constant 3.200000e+01 : f32
    %11 = vector.broadcast %cst_3 : f32 to vector<128x1xf32>
    %12 = arith.divf %10, %11 : vector<128x1xf32>
    %cst_4 = arith.constant 9.99999974E-6 : f32
    %13 = vector.broadcast %cst_4 : f32 to vector<128x1xf32>
    %14 = arith.addf %12, %13 : vector<128x1xf32>
    %15 = math.rsqrt %14 : vector<128x1xf32>
    %16 = vector.broadcast %15 : vector<128x1xf32> to vector<128x32xf32>
    %17 = arith.mulf %7, %16 : vector<128x32xf32>
    %c0_5 = arith.constant 0 : index
    %c0_6 = arith.constant 0 : index
    %18 = vector.load %arg3[%c0_5, %c0_6] : memref<1x32xf32, #tpu.memory_space<vmem>>, vector<1x32xf32>
    %19 = vector.broadcast %18 : vector<1x32xf32> to vector<128x32xf32>
    %20 = arith.mulf %17, %19 : vector<128x32xf32>
    %c0_7 = arith.constant 0 : index
    %c0_8 = arith.constant 0 : index
    %21 = vector.load %arg4[%c0_7, %c0_8] : memref<1x32xf32, #tpu.memory_space<vmem>>, vector<1x32xf32>
    %22 = vector.broadcast %21 : vector<1x32xf32> to vector<128x32xf32>
    %23 = arith.addf %20, %22 : vector<128x32xf32>
    %c0_9 = arith.constant 0 : index
    %c0_10 = arith.constant 0 : index
    %24 = vector.load %arg2[%c0_9, %c0_10] : memref<128x32xbf16, #tpu.memory_space<vmem>>, vector<128x32xbf16>
    %25 = arith.extf %24 : vector<128x32xbf16> to vector<128x32xf32>
    %26 = math.absf %25 : vector<128x32xf32>
    %cst_11 = arith.constant 0.000000e+00 : f32
    %27 = vector.broadcast %cst_11 : f32 to vector<128x32xf32>
    %28 = arith.subf %27, %26 : vector<128x32xf32>
    %29 = math.exp %28 : vector<128x32xf32>
    %cst_12 = arith.constant 0.000000e+00 : f32
    %30 = vector.broadcast %cst_12 : f32 to vector<128x32xf32>
    %31 = arith.cmpf oge, %25, %30 : vector<128x32xf32>
    %cst_13 = arith.constant 1.000000e+00 : f32
    %32 = vector.broadcast %cst_13 : f32 to vector<128x32xf32>
    %33 = arith.select %31, %32, %29 : vector<128x32xi1>, vector<128x32xf32>
    %cst_14 = arith.constant 1.000000e+00 : f32
    %34 = vector.broadcast %cst_14 : f32 to vector<128x32xf32>
    %35 = arith.addf %34, %29 : vector<128x32xf32>
    %36 = arith.divf %33, %35 : vector<128x32xf32>
    %37 = arith.mulf %25, %36 : vector<128x32xf32>
    %38 = arith.mulf %23, %37 : vector<128x32xf32>
    %c0_15 = arith.constant 0 : index
    %c0_16 = arith.constant 0 : index
    %39 = vector.load %arg5[%c0_15, %c0_16] : memref<32x16xf32, #tpu.memory_space<vmem>>, vector<32x16xf32>
    %cst_17 = arith.constant dense<0.000000e+00> : vector<128x16xf32>
    %40 = tpu.matmul %38, %39, %cst_17 {dimension_numbers = #tpu.dot_dimension_numbers<[1], [0], [0], [1], [0, 0, 1, 1], [], []>} : vector<128x32xf32>, vector<32x16xf32>, vector<128x16xf32> -> vector<128x16xf32>
    %c0_18 = arith.constant 0 : index
    %c0_19 = arith.constant 0 : index
    %41 = vector.load %arg6[%c0_18, %c0_19] : memref<128x16xf32, #tpu.memory_space<vmem>>, vector<128x16xf32>
    %42 = arith.addf %41, %40 : vector<128x16xf32>
    %c0_20 = arith.constant 0 : index
    %c0_21 = arith.constant 0 : index
    %43 = vector.load %arg7[%c0_20, %c0_21] : memref<128x16xf32, #tpu.memory_space<vmem>>, vector<128x16xf32>
    tpu.vector_store %arg7[%c0_20, %c0_21], %42 {strides = array<i32>} : memref<128x16xf32, #tpu.memory_space<vmem>>, vector<128x16xf32>,
    return
  }
  func.func @transform_0(%arg0: i32) -> (i32, i32) {
    %c0_i32 = arith.constant 0 : i32
    %c0_i32_0 = arith.constant 0 : i32
    return %arg0, %c0_i32 : i32, i32
  }
  func.func @transform_1(%arg0: i32) -> (i32, i32) {
    %c0_i32 = arith.constant 0 : i32
    %c0_i32_0 = arith.constant 0 : i32
    return %arg0, %c0_i32 : i32, i32
  }
  func.func @transform_2(%arg0: i32) -> (i32, i32) {
    %c0_i32 = arith.constant 0 : i32
    %c0_i32_0 = arith.constant 0 : i32
    %c0_i32_1 = arith.constant 0 : i32
    return %c0_i32, %c0_i32_0 : i32, i32
  }
  func.func @transform_3(%arg0: i32) -> (i32, i32) {
    %c0_i32 = arith.constant 0 : i32
    %c0_i32_0 = arith.constant 0 : i32
    %c0_i32_1 = arith.constant 0 : i32
    return %c0_i32, %c0_i32_0 : i32, i32
  }
  func.func @transform_4(%arg0: i32) -> (i32, i32) {
    %c0_i32 = arith.constant 0 : i32
    %c0_i32_0 = arith.constant 0 : i32
    %c0_i32_1 = arith.constant 0 : i32
    return %c0_i32, %c0_i32_0 : i32, i32
  }
  func.func @transform_5(%arg0: i32) -> (i32, i32) {
    %c0_i32 = arith.constant 0 : i32
    %c0_i32_0 = arith.constant 0 : i32
    return %arg0, %c0_i32 : i32, i32
  }
  func.func @transform_6(%arg0: i32) -> (i32, i32) {
    %c0_i32 = arith.constant 0 : i32
    %c0_i32_0 = arith.constant 0 : i32
    return %arg0, %c0_i32 : i32, i32
  }
}

module attributes {stable_mosaic.version = 11 : i64} {
  func.func @_gated_ln_out_proj_kernel(%arg0: i32, %arg1: memref<128x32xbf16, #tpu.memory_space<vmem>>, %arg2: memref<128x32xbf16, #tpu.memory_space<vmem>>, %arg3: memref<1x32xf32, #tpu.memory_space<vmem>>, %arg4: memref<1x32xf32, #tpu.memory_space<vmem>>, %arg5: memref<32x16xf32, #tpu.memory_space<vmem>>, %arg6: memref<128x16xf32, #tpu.memory_space<vmem>>, %arg7: memref<128x16xf32, #tpu.memory_space<vmem>>) attributes {dimension_semantics = [#tpu.dimension_semantics<parallel>], iteration_bounds = array<i64: 1>, scalar_prefetch = 0 : i64, scratch_operands = 0 : i64, tpu.core_type = #tpu.core_type<tc>, window_params = [{transform_indices = @transform_0, window_bounds = array<i64: 128, 32>}, {transform_indices = @transform_1, window_bounds = array<i64: 128, 32>}, {pipeline_mode = #tpu.pipeline_mode<synchronous>, transform_indices = @transform_2, window_bounds = array<i64: 1, 32>}, {pipeline_mode = #tpu.pipeline_mode<synchronous>, transform_indices = @transform_3, window_bounds = array<i64: 1, 32>}, {pipeline_mode = #tpu.pipeline_mode<synchronous>, transform_indices = @transform_4, window_bounds = array<i64: 32, 16>}, {transform_indices = @transform_5, window_bounds = array<i64: 128, 16>}, {transform_indices = @transform_6, window_bounds = array<i64: 128, 16>}]} {
    %c0 = arith.constant 0 : index
    %c0_0 = arith.constant 0 : index
    %0 = vector.load %arg1[%c0, %c0_0] : memref<128x32xbf16, #tpu.memory_space<vmem>>, vector<128x32xbf16>
    %1 = arith.extf %0 : vector<128x32xbf16> to vector<128x32xf32>
    %cst = arith.constant dense<0.000000e+00> : vector<128xf32>
    %2 = vector.multi_reduction <add>, %1, %cst [1] : vector<128x32xf32> to vector<128xf32>
    %3 = vector.shape_cast %2 : vector<128xf32> to vector<128x1xf32>
    %cst_1 = arith.constant 3.200000e+01 : f32
    %4 = vector.broadcast %cst_1 : f32 to vector<128x1xf32>
    %5 = arith.divf %3, %4 : vector<128x1xf32>
    %6 = vector.broadcast %5 : vector<128x1xf32> to vector<128x32xf32>
    %7 = arith.subf %1, %6 : vector<128x32xf32>
    %8 = arith.mulf %7, %7 : vector<128x32xf32>
    %cst_2 = arith.constant dense<0.000000e+00> : vector<128xf32>
    %9 = vector.multi_reduction <add>, %8, %cst_2 [1] : vector<128x32xf32> to vector<128xf32>
    %10 = vector.shape_cast %9 : vector<128xf32> to vector<128x1xf32>
    %cst_3 = arith.constant 3.200000e+01 : f32
    %11 = vector.broadcast %cst_3 : f32 to vector<128x1xf32>
    %12 = arith.divf %10, %11 : vector<128x1xf32>
    %cst_4 = arith.constant 9.99999974E-6 : f32
    %13 = vector.broadcast %cst_4 : f32 to vector<128x1xf32>
    %14 = arith.addf %12, %13 : vector<128x1xf32>
    %15 = math.rsqrt %14 : vector<128x1xf32>
    %16 = vector.broadcast %15 : vector<128x1xf32> to vector<128x32xf32>
    %17 = arith.mulf %7, %16 : vector<128x32xf32>
    %c0_5 = arith.constant 0 : index
    %c0_6 = arith.constant 0 : index
    %18 = vector.load %arg3[%c0_5, %c0_6] : memref<1x32xf32, #tpu.memory_space<vmem>>, vector<1x32xf32>
    %19 = vector.broadcast %18 : vector<1x32xf32> to vector<128x32xf32>
    %20 = arith.mulf %17, %19 : vector<128x32xf32>
    %c0_7 = arith.constant 0 : index
    %c0_8 = arith.constant 0 : index
    %21 = vector.load %arg4[%c0_7, %c0_8] : memref<1x32xf32, #tpu.memory_space<vmem>>, vector<1x32xf32>
    %22 = vector.broadcast %21 : vector<1x32xf32> to vector<128x32xf32>
    %23 = arith.addf %20, %22 : vector<128x32xf32>
    %c0_9 = arith.constant 0 : index
    %c0_10 = arith.constant 0 : index
    %24 = vector.load %arg2[%c0_9, %c0_10] : memref<128x32xbf16, #tpu.memory_space<vmem>>, vector<128x32xbf16>
    %25 = arith.extf %24 : vector<128x32xbf16> to vector<128x32xf32>
    %26 = math.absf %25 : vector<128x32xf32>
    %cst_11 = arith.constant 0.000000e+00 : f32
    %27 = vector.broadcast %cst_11 : f32 to vector<128x32xf32>
    %28 = arith.subf %27, %26 : vector<128x32xf32>
    %29 = math.exp %28 : vector<128x32xf32>
    %cst_12 = arith.constant 0.000000e+00 : f32
    %30 = vector.broadcast %cst_12 : f32 to vector<128x32xf32>
    %31 = arith.cmpf oge, %25, %30 : vector<128x32xf32>
    %cst_13 = arith.constant 1.000000e+00 : f32
    %32 = vector.broadcast %cst_13 : f32 to vector<128x32xf32>
    %33 = arith.select %31, %32, %29 : vector<128x32xi1>, vector<128x32xf32>
    %cst_14 = arith.constant 1.000000e+00 : f32
    %34 = vector.broadcast %cst_14 : f32 to vector<128x32xf32>
    %35 = arith.addf %34, %29 : vector<128x32xf32>
    %36 = arith.divf %33, %35 : vector<128x32xf32>
    %37 = arith.mulf %25, %36 : vector<128x32xf32>
    %38 = arith.mulf %23, %37 : vector<128x32xf32>
    %c0_15 = arith.constant 0 : index
    %c0_16 = arith.constant 0 : index
    %39 = vector.load %arg5[%c0_15, %c0_16] : memref<32x16xf32, #tpu.memory_space<vmem>>, vector<32x16xf32>
    %cst_17 = arith.constant dense<0.000000e+00> : vector<128x16xf32>
    %40 = tpu.matmul %38, %39, %cst_17 {dimension_numbers = #tpu.dot_dimension_numbers<[1], [0], [0], [1], [0, 0, 1, 1], [], []>} : vector<128x32xf32>, vector<32x16xf32>, vector<128x16xf32> -> vector<128x16xf32>
    %c0_18 = arith.constant 0 : index
    %c0_19 = arith.constant 0 : index
    %41 = vector.load %arg6[%c0_18, %c0_19] : memref<128x16xf32, #tpu.memory_space<vmem>>, vector<128x16xf32>
    %42 = arith.addf %41, %40 : vector<128x16xf32>
    %c0_20 = arith.constant 0 : index
    %c0_21 = arith.constant 0 : index
    %43 = vector.load %arg7[%c0_20, %c0_21] : memref<128x16xf32, #tpu.memory_space<vmem>>, vector<128x16xf32>
    tpu.vector_store %arg7[%c0_20, %c0_21], %42 {strides = array<i32>} : memref<128x16xf32, #tpu.memory_space<vmem>>, vector<128x16xf32>,
    return
  }
  func.func @transform_0(%arg0: i32) -> (i32, i32) {
    %c0_i32 = arith.constant 0 : i32
    %c0_i32_0 = arith.constant 0 : i32
    return %arg0, %c0_i32 : i32, i32
  }
  func.func @transform_1(%arg0: i32) -> (i32, i32) {
    %c0_i32 = arith.constant 0 : i32
    %c0_i32_0 = arith.constant 0 : i32
    return %arg0, %c0_i32 : i32, i32
  }
  func.func @transform_2(%arg0: i32) -> (i32, i32) {
    %c0_i32 = arith.constant 0 : i32
    %c0_i32_0 = arith.constant 0 : i32
    %c0_i32_1 = arith.constant 0 : i32
    return %c0_i32, %c0_i32_0 : i32, i32
  }
  func.func @transform_3(%arg0: i32) -> (i32, i32) {
    %c0_i32 = arith.constant 0 : i32
    %c0_i32_0 = arith.constant 0 : i32
    %c0_i32_1 = arith.constant 0 : i32
    return %c0_i32, %c0_i32_0 : i32, i32
  }
  func.func @transform_4(%arg0: i32) -> (i32, i32) {
    %c0_i32 = arith.constant 0 : i32
    %c0_i32_0 = arith.constant 0 : i32
    %c0_i32_1 = arith.constant 0 : i32
    return %c0_i32, %c0_i32_0 : i32, i32
  }
  func.func @transform_5(%arg0: i32) -> (i32, i32) {
    %c0_i32 = arith.constant 0 : i32
    %c0_i32_0 = arith.constant 0 : i32
    return %arg0, %c0_i32 : i32, i32
  }
  func.func @transform_6(%arg0: i32) -> (i32, i32) {
    %c0_i32 = arith.constant 0 : i32
    %c0_i32_0 = arith.constant 0 : i32
    return %arg0, %c0_i32 : i32, i32
  }
}

module attributes {stable_mosaic.version = 11 : i64} {
  func.func @_ln_in_proj_kernel(%arg0: i32, %arg1: memref<128x16xf32, #tpu.memory_space<vmem>>, %arg2: memref<1x16xf32, #tpu.memory_space<vmem>>, %arg3: memref<1x16xf32, #tpu.memory_space<vmem>>, %arg4: memref<16x64xf32, #tpu.memory_space<vmem>>, %arg5: memref<128x32xbf16, #tpu.memory_space<vmem>>, %arg6: memref<128x32xbf16, #tpu.memory_space<vmem>>) attributes {dimension_semantics = [#tpu.dimension_semantics<parallel>], iteration_bounds = array<i64: 1>, scalar_prefetch = 0 : i64, scratch_operands = 0 : i64, tpu.core_type = #tpu.core_type<tc>, window_params = [{transform_indices = @transform_0, window_bounds = array<i64: 128, 16>}, {pipeline_mode = #tpu.pipeline_mode<synchronous>, transform_indices = @transform_1, window_bounds = array<i64: 1, 16>}, {pipeline_mode = #tpu.pipeline_mode<synchronous>, transform_indices = @transform_2, window_bounds = array<i64: 1, 16>}, {pipeline_mode = #tpu.pipeline_mode<synchronous>, transform_indices = @transform_3, window_bounds = array<i64: 16, 64>}, {transform_indices = @transform_4, window_bounds = array<i64: 128, 32>}, {transform_indices = @transform_5, window_bounds = array<i64: 128, 32>}]} {
    %c0 = arith.constant 0 : index
    %c0_0 = arith.constant 0 : index
    %0 = vector.load %arg1[%c0, %c0_0] : memref<128x16xf32, #tpu.memory_space<vmem>>, vector<128x16xf32>
    %cst = arith.constant dense<0.000000e+00> : vector<128xf32>
    %1 = vector.multi_reduction <add>, %0, %cst [1] : vector<128x16xf32> to vector<128xf32>
    %2 = vector.shape_cast %1 : vector<128xf32> to vector<128x1xf32>
    %cst_1 = arith.constant 1.600000e+01 : f32
    %3 = vector.broadcast %cst_1 : f32 to vector<128x1xf32>
    %4 = arith.divf %2, %3 : vector<128x1xf32>
    %5 = vector.broadcast %4 : vector<128x1xf32> to vector<128x16xf32>
    %6 = arith.subf %0, %5 : vector<128x16xf32>
    %7 = arith.mulf %6, %6 : vector<128x16xf32>
    %cst_2 = arith.constant dense<0.000000e+00> : vector<128xf32>
    %8 = vector.multi_reduction <add>, %7, %cst_2 [1] : vector<128x16xf32> to vector<128xf32>
    %9 = vector.shape_cast %8 : vector<128xf32> to vector<128x1xf32>
    %cst_3 = arith.constant 1.600000e+01 : f32
    %10 = vector.broadcast %cst_3 : f32 to vector<128x1xf32>
    %11 = arith.divf %9, %10 : vector<128x1xf32>
    %cst_4 = arith.constant 9.99999974E-6 : f32
    %12 = vector.broadcast %cst_4 : f32 to vector<128x1xf32>
    %13 = arith.addf %11, %12 : vector<128x1xf32>
    %14 = math.rsqrt %13 : vector<128x1xf32>
    %15 = vector.broadcast %14 : vector<128x1xf32> to vector<128x16xf32>
    %16 = arith.mulf %6, %15 : vector<128x16xf32>
    %c0_5 = arith.constant 0 : index
    %c0_6 = arith.constant 0 : index
    %17 = vector.load %arg2[%c0_5, %c0_6] : memref<1x16xf32, #tpu.memory_space<vmem>>, vector<1x16xf32>
    %18 = vector.broadcast %17 : vector<1x16xf32> to vector<128x16xf32>
    %19 = arith.mulf %16, %18 : vector<128x16xf32>
    %c0_7 = arith.constant 0 : index
    %c0_8 = arith.constant 0 : index
    %20 = vector.load %arg3[%c0_7, %c0_8] : memref<1x16xf32, #tpu.memory_space<vmem>>, vector<1x16xf32>
    %21 = vector.broadcast %20 : vector<1x16xf32> to vector<128x16xf32>
    %22 = arith.addf %19, %21 : vector<128x16xf32>
    %c0_9 = arith.constant 0 : index
    %c0_10 = arith.constant 0 : index
    %23 = vector.load %arg4[%c0_9, %c0_10] : memref<16x64xf32, #tpu.memory_space<vmem>>, vector<16x64xf32>
    %cst_11 = arith.constant dense<0.000000e+00> : vector<128x64xf32>
    %24 = tpu.matmul %22, %23, %cst_11 {dimension_numbers = #tpu.dot_dimension_numbers<[1], [0], [0], [1], [0, 0, 1, 1], [], []>} : vector<128x16xf32>, vector<16x64xf32>, vector<128x64xf32> -> vector<128x64xf32>
    %25 = vector.extract_strided_slice %24 {offsets = [0, 0], sizes = [128, 32], strides = [1, 1]} : vector<128x64xf32> to vector<128x32xf32>
    %26 = arith.truncf %25 : vector<128x32xf32> to vector<128x32xbf16>
    %c0_12 = arith.constant 0 : index
    %c0_13 = arith.constant 0 : index
    %27 = vector.load %arg5[%c0_12, %c0_13] : memref<128x32xbf16, #tpu.memory_space<vmem>>, vector<128x32xbf16>
    tpu.vector_store %arg5[%c0_12, %c0_13], %26 {strides = array<i32>} : memref<128x32xbf16, #tpu.memory_space<vmem>>, vector<128x32xbf16>,
    %28 = vector.extract_strided_slice %24 {offsets = [0, 32], sizes = [128, 32], strides = [1, 1]} : vector<128x64xf32> to vector<128x32xf32>
    %29 = arith.truncf %28 : vector<128x32xf32> to vector<128x32xbf16>
    %c0_14 = arith.constant 0 : index
    %c0_15 = arith.constant 0 : index
    %30 = vector.load %arg6[%c0_14, %c0_15] : memref<128x32xbf16, #tpu.memory_space<vmem>>, vector<128x32xbf16>
    tpu.vector_store %arg6[%c0_14, %c0_15], %29 {strides = array<i32>} : memref<128x32xbf16, #tpu.memory_space<vmem>>, vector<128x32xbf16>,
    return
  }
  func.func @transform_0(%arg0: i32) -> (i32, i32) {
    %c0_i32 = arith.constant 0 : i32
    %c0_i32_0 = arith.constant 0 : i32
    return %arg0, %c0_i32 : i32, i32
  }
  func.func @transform_1(%arg0: i32) -> (i32, i32) {
    %c0_i32 = arith.constant 0 : i32
    %c0_i32_0 = arith.constant 0 : i32
    %c0_i32_1 = arith.constant 0 : i32
    return %c0_i32, %c0_i32_0 : i32, i32
  }
  func.func @transform_2(%arg0: i32) -> (i32, i32) {
    %c0_i32 = arith.constant 0 : i32
    %c0_i32_0 = arith.constant 0 : i32
    %c0_i32_1 = arith.constant 0 : i32
    return %c0_i32, %c0_i32_0 : i32, i32
  }
  func.func @transform_3(%arg0: i32) -> (i32, i32) {
    %c0_i32 = arith.constant 0 : i32
    %c0_i32_0 = arith.constant 0 : i32
    %c0_i32_1 = arith.constant 0 : i32
    return %c0_i32, %c0_i32_0 : i32, i32
  }
  func.func @transform_4(%arg0: i32) -> (i32, i32) {
    %c0_i32 = arith.constant 0 : i32
    %c0_i32_0 = arith.constant 0 : i32
    return %arg0, %c0_i32 : i32, i32
  }
  func.func @transform_5(%arg0: i32) -> (i32, i32) {
    %c0_i32 = arith.constant 0 : i32
    %c0_i32_0 = arith.constant 0 : i32
    return %arg0, %c0_i32 : i32, i32
  }
}

</mosaic_0001>

<bundles_post_ra>
// kernel: _lambda_.8
= control target key start
LH: loop header
LB: loop body
LE: loop exit
PB: predicated region body
PF: predicated region fallthrough
CT: control target
= control target key end

     0   :  { %11 = vsyncpa [#allocation3], 0  ;;  %s812_s18 = smov [#allocation2]   ;;  %s1209_s0 = inlined_call_operand.hbm [shape: f32[128,16], index: 0, kind: input, shape index: {}]   ;;  %s1210_s1 = inlined_call_operand.vmem [shape: f32[1,16], index: 1, kind: input, shape index: {}]   ;;  %s1211_s2 = inlined_call_operand.vmem [shape: f32[1,16], index: 2, kind: input, shape index: {}]   ;;  %s1212_s3 = inlined_call_operand.vmem [shape: f32[16,64], index: 3, kind: input, shape index: {}]   ;;  %s1213_s4 = inlined_call_operand.vmem [shape: bf16[128,32], index: 4, kind: output, shape index: {0}]   ;;  %s1214_s5 = inlined_call_operand.vmem [shape: bf16[128,32], index: 5, kind: output, shape index: {1}]  }
   0x1   :  { %s17_s19 = sshll.u32 %s812_s18, 4  ;;  %s18_s19 = int_to_ptr.vmem [resolvable:$true] %s17_s19 }
   0x2   :  { %s798_s20 = scalar_lea.vmem %s18_s19, 2048  ;;  %p803_p1 = scmp.lt.s32.totalorder %s18_s19, %s18_s19 }
   0x3   :  { %p799_p0 = scmp.ne.s32.totalorder %s18_s19, %s798_s20  ;;  %p804_p2 = scmp.lt.s32.totalorder %s798_s20, %s798_s20 }
   0x5   :  { %p805_p3 = por %p804_p2, %p803_p1 }
   0x7   :  { %p806_p4 = pnand %p805_p3, %p799_p0 }
   0x9   :  { %809 = shalt.err (!%p806_p4)
}
   0xa   :  { %s813_s21 = smov 128   ;;  %s814_s22 = smov 8  }
   0xb   :  { %23 = dma.hbm_to_vmem [thread:$0]  %s1209_s0, 2048, %s18_s19, [#allocation3], %s813_s21, %s813_s21, %s814_s22  }
   0xc   :  { %810 = dma.done.wait [#allocation3], 2048  }
   0xd   :  { %811 = vsyncadd [#allocation3], 4294965248  ;;  %vm49_vm0 = vcmask 130048   ;;  %v33_v0 = vld [vmem:[#allocation2] sm:$0xff]  ;;  %v34_v1 = vld [vmem:[#allocation2 + $0x8] sm:$0xff]  ;;  %vm564_vm1 = vcmask 257024  }
   0xe   :  { %v41_v2 = vld [vmem:[#allocation2 + $0x40] sm:$0xff]  ;;  %v50_v3 = vsel %vm49_vm0, %v33_v0, 0.0  ;;  %v53_v4 = vsel %vm49_vm0, %v34_v1, 0.0  ;;  %v42_v5 = vld [vmem:[#allocation2 + $0x48] sm:$0xff]  ;;  %v35_v8 = vld [vmem:[#allocation2 + $0x10] sm:$0xff]  ;;  %s815_s6 = smov 96  }
   0xf   :  { %51 = vadd.xlane.f32.xlu0 %v50_v3  ;;  %54 = vadd.xlane.f32.xlu1 %v53_v4  ;;  %v74_v6 = vsel %vm49_vm0, %v41_v2, 0.0  ;;  %v77_v7 = vsel %vm49_vm0, %v42_v5, 0.0  ;;  %v43_v9 = vld [vmem:[#allocation2 + $0x50] sm:$0xff]  ;;  %v56_v10 = vsel %vm49_vm0, %v35_v8, 0.0  ;;  %v855_v12 = vld [vmem:[#allocation2 + $0x18] sm:$0xff]  ;;  %v863_v16 = vld [vmem:[#allocation2 + $0x20] sm:$0xff] }
  0x10   :  { %v80_v11 = vsel %vm49_vm0, %v43_v9, 0.0  ;;  %v857_v13 = vld [vmem:[#allocation2 + $0x58] sm:$0xff]  ;;  %v59_v14 = vsel %vm49_vm0, %v855_v12, 0.0  ;;  %v865_v17 = vld [vmem:[#allocation2 + $0x60] sm:$0xff]  ;;  %v62_v18 = vsel %vm49_vm0, %v863_v16, 0.0  ;;  %v871_v20 = vld [vmem:[#allocation2 + $0x28] sm:$0xff] }
  0x11   :  { %v83_v15 = vsel %vm49_vm0, %v857_v13, 0.0  ;;  %v86_v19 = vsel %vm49_vm0, %v865_v17, 0.0  ;;  %v873_v21 = vld [vmem:[#allocation2 + $0x68] sm:$0xff]  ;;  %v65_v22 = vsel %vm49_vm0, %v871_v20, 0.0  ;;  %v879_v24 = vld [vmem:[#allocation2 + $0x30] sm:$0xff]  ;;  %v887_v28 = vld [vmem:[#allocation2 + $0x38] sm:$0xff] }
  0x12   :  { %v89_v23 = vsel %vm49_vm0, %v873_v21, 0.0  ;;  %v881_v25 = vld [vmem:[#allocation2 + $0x70] sm:$0xff]  ;;  %v68_v26 = vsel %vm49_vm0, %v879_v24, 0.0  ;;  %v889_v29 = vld [vmem:[#allocation2 + $0x78] sm:$0xff]  ;;  %v71_v30 = vsel %vm49_vm0, %v887_v28, 0.0 }
  0x13   :  { %75 = vadd.xlane.f32.xlu0 %v74_v6  ;;  %78 = vadd.xlane.f32.xlu1 %v77_v7  ;;  %v92_v27 = vsel %vm49_vm0, %v881_v25, 0.0  ;;  %v95_v31 = vsel %vm49_vm0, %v889_v29, 0.0 }
  0x17   :  { %57 = vadd.xlane.f32.xlu0 %v56_v10  ;;  %81 = vadd.xlane.f32.xlu1 %v80_v11 }
  0x1b   :  { %60 = vadd.xlane.f32.xlu0 %v59_v14  ;;  %84 = vadd.xlane.f32.xlu1 %v83_v15 }
  0x1f   :  { %63 = vadd.xlane.f32.xlu0 %v62_v18  ;;  %87 = vadd.xlane.f32.xlu1 %v86_v19 }
  0x23   :  { %66 = vadd.xlane.f32.xlu0 %v65_v22  ;;  %90 = vadd.xlane.f32.xlu1 %v89_v23 }
  0x27   :  { %69 = vadd.xlane.f32.xlu0 %v68_v26  ;;  %93 = vadd.xlane.f32.xlu1 %v92_v27 }
  0x2b   :  { %72 = vadd.xlane.f32.xlu0 %v71_v30  ;;  %96 = vadd.xlane.f32.xlu1 %v95_v31 }
  0x98   :  { %v52_v32 = vpop.xlane.xlu0 %51  ;;  %v55_v33 = vpop.xlane.xlu1 %54 }
  0x99   :  { %v99_v34 = vmul.f32 0.0625, %v52_v32  ;;  %v100_v35 = vmul.f32 0.0625, %v55_v33 }
  0x9b   :  { %v895_v36 = vsub.f32 %v33_v0, %v99_v34  ;;  %v897_v37 = vsub.f32 %v34_v1, %v100_v35 }
  0x9c   :  { %v76_v38 = vpop.xlane.xlu0 %75  ;;  %v79_v39 = vpop.xlane.xlu1 %78 }
  0x9d   :  { %v107_v40 = vmul.f32 0.0625, %v76_v38  ;;  %v108_v41 = vmul.f32 0.0625, %v79_v39  ;;  %v131_v42 = vmul.f32 %v895_v36, %v895_v36  ;;  %v132_v43 = vmul.f32 %v897_v37, %v897_v37 }
  0x9f   :  { %v903_v44 = vsub.f32 %v41_v2, %v107_v40  ;;  %v905_v45 = vsub.f32 %v42_v5, %v108_v41  ;;  %v147_v46 = vsel %vm49_vm0, %v131_v42, 0.0  ;;  %v150_v49 = vsel %vm49_vm0, %v132_v43, 0.0 }
  0xa0   :  { %148 = vadd.xlane.f32.xlu0 %v147_v46  ;;  %v58_v47 = vpop.xlane.xlu0 %57  ;;  %v82_v48 = vpop.xlane.xlu1 %81 }
  0xa1   :  { %v101_v50 = vmul.f32 0.0625, %v58_v47  ;;  %v109_v51 = vmul.f32 0.0625, %v82_v48  ;;  %v139_v52 = vmul.f32 %v903_v44, %v903_v44  ;;  %v140_v53 = vmul.f32 %v905_v45, %v905_v45 }
  0xa3   :  { %v913_v54 = vsub.f32 %v35_v8, %v101_v50  ;;  %v915_v55 = vsub.f32 %v43_v9, %v109_v51  ;;  %v171_v56 = vsel %vm49_vm0, %v139_v52, 0.0  ;;  %v174_v59 = vsel %vm49_vm0, %v140_v53, 0.0  ;;  %v305_v53 = vld [vmem:[%s1212_s3] sm:$0xff] }
  0xa4   :  { %151 = vadd.xlane.f32.xlu0 %v150_v49  ;;  %172 = vadd.xlane.f32.xlu1 %v171_v56  ;;  %v61_v57 = vpop.xlane.xlu0 %60  ;;  %v85_v58 = vpop.xlane.xlu1 %84 }
  0xa5   :  { %v102_v60 = vmul.f32 0.0625, %v61_v57  ;;  %v110_v61 = vmul.f32 0.0625, %v85_v58  ;;  %v133_v62 = vmul.f32 %v913_v54, %v913_v54  ;;  %v141_v63 = vmul.f32 %v915_v55, %v915_v55 }
  0xa7   :  { %v924_v0 = vsub.f32 %v855_v12, %v102_v60  ;;  %v927_v1 = vsub.f32 %v857_v13, %v110_v61  ;;  %v153_v2 = vsel %vm49_vm0, %v133_v62, 0.0  ;;  %v177_v5 = vsel %vm49_vm0, %v141_v63, 0.0 }
  0xa8   :  { %175 = vadd.xlane.f32.xlu1 %v174_v59  ;;  %154 = vadd.xlane.f32.xlu0 %v153_v2  ;;  %v64_v3 = vpop.xlane.xlu0 %63  ;;  %v88_v4 = vpop.xlane.xlu1 %87 }
  0xa9   :  { %v103_v6 = vmul.f32 0.0625, %v64_v3  ;;  %v111_v7 = vmul.f32 0.0625, %v88_v4  ;;  %v134_v8 = vmul.f32 %v924_v0, %v924_v0  ;;  %v142_v9 = vmul.f32 %v927_v1, %v927_v1 }
  0xab   :  { %v936_v10 = vsub.f32 %v863_v16, %v103_v6  ;;  %v939_v11 = vsub.f32 %v865_v17, %v111_v7  ;;  %v156_v12 = vsel %vm49_vm0, %v134_v8, 0.0  ;;  %v180_v15 = vsel %vm49_vm0, %v142_v9, 0.0 }
  0xac   :  { %178 = vadd.xlane.f32.xlu1 %v177_v5  ;;  %157 = vadd.xlane.f32.xlu0 %v156_v12  ;;  %v67_v13 = vpop.xlane.xlu0 %66  ;;  %v91_v14 = vpop.xlane.xlu1 %90 }
  0xad   :  { %v104_v18 = vmul.f32 0.0625, %v67_v13  ;;  %v112_v19 = vmul.f32 0.0625, %v91_v14  ;;  %v135_v22 = vmul.f32 %v936_v10, %v936_v10  ;;  %v143_v16 = vmul.f32 %v939_v11, %v939_v11 }
  0xaf   :  { %v948_v23 = vsub.f32 %v871_v20, %v104_v18  ;;  %v951_v17 = vsub.f32 %v873_v21, %v112_v19  ;;  %v159_v26 = vsel %vm49_vm0, %v135_v22, 0.0  ;;  %v183_v31 = vsel %vm49_vm0, %v143_v16, 0.0 }
  0xb0   :  { %181 = vadd.xlane.f32.xlu1 %v180_v15  ;;  %160 = vadd.xlane.f32.xlu0 %v159_v26  ;;  %v70_v27 = vpop.xlane.xlu0 %69  ;;  %v94_v30 = vpop.xlane.xlu1 %93 }
  0xb1   :  { %v105_v32 = vmul.f32 0.0625, %v70_v27  ;;  %v113_v33 = vmul.f32 0.0625, %v94_v30  ;;  %v136_v34 = vmul.f32 %v948_v23, %v948_v23  ;;  %v144_v20 = vmul.f32 %v951_v17, %v951_v17  ;;  %v994_v30 = vld [vmem:[%s1210_s1] ss:$0 sm:$0xff] }
  0xb3   :  { %v960_v35 = vsub.f32 %v879_v24, %v105_v32  ;;  %v963_v21 = vsub.f32 %v881_v25, %v113_v33  ;;  %v162_v38 = vsel %vm49_vm0, %v136_v34, 0.0  ;;  %v186_v41 = vsel %vm49_vm0, %v144_v20, 0.0 }
  0xb4   :  { %184 = vadd.xlane.f32.xlu1 %v183_v31  ;;  %163 = vadd.xlane.f32.xlu0 %v162_v38  ;;  %v73_v39 = vpop.xlane.xlu0 %72  ;;  %v97_v40 = vpop.xlane.xlu1 %96  ;;  %v1000_v38 = vld [vmem:[%s1211_s2] ss:$0 sm:$0xff] }
  0xb5   :  { %v106_v42 = vmul.f32 0.0625, %v73_v39  ;;  %v114_v43 = vmul.f32 0.0625, %v97_v40  ;;  %v137_v46 = vmul.f32 %v960_v35, %v960_v35  ;;  %v145_v24 = vmul.f32 %v963_v21, %v963_v21 }
  0xb7   :  { %v972_v47 = vsub.f32 %v887_v28, %v106_v42  ;;  %v975_v25 = vsub.f32 %v889_v29, %v114_v43  ;;  %v165_v48 = vsel %vm49_vm0, %v137_v46, 0.0  ;;  %v189_v49 = vsel %vm49_vm0, %v145_v24, 0.0  ;;  %v306_v29 = vld [vmem:[%s1212_s3 + $0x8] sm:$0xff] }
  0xb8   :  { %187 = vadd.xlane.f32.xlu1 %v186_v41  ;;  %166 = vadd.xlane.f32.xlu0 %v165_v48 }
  0xb9   :  { %v138_v50 = vmul.f32 %v972_v47, %v972_v47  ;;  %v146_v51 = vmul.f32 %v975_v25, %v975_v25  ;;  %722 = vmatprep.subr.mxu0 %v306_v29  ;;  %750 = vmatprep.subr.mxu1 %v306_v29 }
  0xba   :  { %723 = vmatpush3.msra.mxu0 %v306_v29  ;;  %752 = vmatpush3.msra.mxu1 %v306_v29 }
  0xbb   :  { %v168_v52 = vsel %vm49_vm0, %v138_v50, 0.0  ;;  %v192_v28 = vsel %vm49_vm0, %v146_v51, 0.0  ;;  %724 = vmatprep.subr.mxu0 %v305_v53  ;;  %751 = vmatprep.subr.mxu1 %v305_v53 }
  0xbc   :  { %190 = vadd.xlane.f32.xlu1 %v189_v49  ;;  %169 = vadd.xlane.f32.xlu0 %v168_v52 }
  0xbd   :  { %725 = vmatpush3.msra.mxu0 %v305_v53  ;;  %753 = vmatpush3.msra.mxu1 %v305_v53 }
  0xc0   :  { %193 = vadd.xlane.f32.xlu1 %v192_v28 }
 0x129   :  { %v149_v56 = vpop.xlane.xlu0 %148 }
 0x12a   :  { %v195_v57 = vmul.f32 0.0625, %v149_v56 }
 0x12c   :  { %v211_v58 = vadd.f32 1e-05, %v195_v57 }
 0x12d   :  { %v173_v59 = vpop.xlane.xlu1 %172  ;;  %v152_v60 = vpop.xlane.xlu0 %151 }
 0x12e   :  { %758 = vrsqrt.f32 %v211_v58  ;;  %v203_v61 = vmul.f32 0.0625, %v173_v59  ;;  %v196_v62 = vmul.f32 0.0625, %v152_v60 }
 0x130   :  { %v219_v63 = vadd.f32 1e-05, %v203_v61  ;;  %v212_v2 = vadd.f32 1e-05, %v196_v62 }
 0x131   :  { %v176_v3 = vpop.xlane.xlu1 %175  ;;  %v155_v4 = vpop.xlane.xlu0 %154 }
 0x132   :  { %760 = vrsqrt.f32 %v219_v63  ;;  %v204_v5 = vmul.f32 0.0625, %v176_v3  ;;  %v197_v6 = vmul.f32 0.0625, %v155_v4 }
 0x133   :  { %762 = vrsqrt.f32 %v212_v2 }
 0x134   :  { %v220_v7 = vadd.f32 1e-05, %v204_v5  ;;  %v213_v8 = vadd.f32 1e-05, %v197_v6 }
 0x135   :  { %v179_v9 = vpop.xlane.xlu1 %178  ;;  %v158_v12 = vpop.xlane.xlu0 %157 }
 0x136   :  { %764 = vrsqrt.f32 %v220_v7  ;;  %v205_v13 = vmul.f32 0.0625, %v179_v9  ;;  %v198_v14 = vmul.f32 0.0625, %v158_v12 }
 0x137   :  { %766 = vrsqrt.f32 %v213_v8 }
 0x138   :  { %v221_v15 = vadd.f32 1e-05, %v205_v13  ;;  %v214_v18 = vadd.f32 1e-05, %v198_v14 }
 0x139   :  { %v182_v19 = vpop.xlane.xlu1 %181  ;;  %v161_v22 = vpop.xlane.xlu0 %160 }
 0x13a   :  { %768 = vrsqrt.f32 %v221_v15  ;;  %v206_v16 = vmul.f32 0.0625, %v182_v19  ;;  %v199_v26 = vmul.f32 0.0625, %v161_v22 }
 0x13b   :  { %v759_v27 = vpop.eup %758  ;;  %770 = vrsqrt.f32 %v214_v18 }
 0x13c   :  { %v222_v31 = vadd.f32 1e-05, %v206_v16  ;;  %v215_v32 = vadd.f32 1e-05, %v199_v26  ;;  %v243_v33 = vmul.f32 %v759_v27, %v895_v36 }
 0x13d   :  { %v185_v34 = vpop.xlane.xlu1 %184  ;;  %v164_v20 = vpop.xlane.xlu0 %163 }
 0x13e   :  { %772 = vrsqrt.f32 %v222_v31  ;;  %v207_v39 = vmul.f32 0.0625, %v185_v34  ;;  %v200_v40 = vmul.f32 0.0625, %v164_v20  ;;  %v266_v41 = vmul.f32 %v994_v30, %v243_v33 }
 0x13f   :  { %v761_v42 = vpop.eup %760  ;;  %774 = vrsqrt.f32 %v215_v32 }
 0x140   :  { %v763_v43 = vpop.eup %762  ;;  %v223_v46 = vadd.f32 1e-05, %v207_v39  ;;  %v216_v24 = vadd.f32 1e-05, %v200_v40  ;;  %v289_v48 = vadd.f32 %v1000_v38, %v266_v41  ;;  %v251_v36 = vmul.f32 %v761_v42, %v903_v44 }
 0x141   :  { %v188_v49 = vpop.xlane.xlu1 %187  ;;  %v167_v50 = vpop.xlane.xlu0 %166  ;;  %v244_v51 = vmul.f32 %v763_v43, %v897_v37 }
 0x142   :  { %776 = vrsqrt.f32 %v223_v46  ;;  %v208_v52 = vmul.f32 0.0625, %v188_v49  ;;  %v201_v28 = vmul.f32 0.0625, %v167_v50  ;;  %726 = vmatprep.mubr.msk.f32.mxu0 %vm49_vm0, %v289_v48  ;;  %v274_v29 = vmul.f32 %v994_v30, %v251_v36 }
 0x143   :  { %v765_v53 = vpop.eup %764  ;;  %778 = vrsqrt.f32 %v216_v24  ;;  %v267_v56 = vmul.f32 %v994_v30, %v244_v51 }
 0x144   :  { %v767_v57 = vpop.eup %766  ;;  %v224_v58 = vadd.f32 1e-05, %v208_v52  ;;  %v217_v59 = vadd.f32 1e-05, %v201_v28  ;;  %v297_v44 = vadd.f32 %v1000_v38, %v274_v29  ;;  %v252_v60 = vmul.f32 %v765_v53, %v905_v45 }
 0x145   :  { %v191_v61 = vpop.xlane.xlu1 %190  ;;  %v170_v37 = vpop.xlane.xlu0 %169  ;;  %v290_v62 = vadd.f32 %v1000_v38, %v267_v56  ;;  %v245_v63 = vmul.f32 %v767_v57, %v913_v54 }
 0x146   :  { %780 = vrsqrt.f32 %v224_v58  ;;  %v209_v2 = vmul.f32 0.0625, %v191_v61  ;;  %v202_v3 = vmul.f32 0.0625, %v170_v37  ;;  %738 = vmatprep.mubr.msk.f32.mxu1 %vm49_vm0, %v297_v44  ;;  %v275_v4 = vmul.f32 %v994_v30, %v252_v60 }
 0x147   :  { %v769_v5 = vpop.eup %768  ;;  %782 = vrsqrt.f32 %v217_v59  ;;  %727 = vmatmul.mubr.msk.f32.vlgmr.msra.gmra.mxu0 %vm49_vm0, %v290_v62  ;;  %v268_v6 = vmul.f32 %v994_v30, %v245_v63 }
 0x148   :  { %v771_v45 = vpop.eup %770  ;;  %v225_v7 = vadd.f32 1e-05, %v209_v2  ;;  %v218_v8 = vadd.f32 1e-05, %v202_v3  ;;  %v298_v9 = vadd.f32 %v1000_v38, %v275_v4  ;;  %v253_v54 = vmul.f32 %v769_v5, %v915_v55 }
 0x149   :  { %v194_v12 = vpop.xlane.xlu1 %193  ;;  %v291_v13 = vadd.f32 %v1000_v38, %v268_v6  ;;  %v246_v14 = vmul.f32 %v771_v45, %v924_v0 }
 0x14a   :  { %784 = vrsqrt.f32 %v225_v7  ;;  %v210_v15 = vmul.f32 0.0625, %v194_v12  ;;  %739 = vmatmul.mubr.msk.f32.vlgmr.msra.gmra.mxu1 %vm49_vm0, %v298_v9  ;;  %v276_v18 = vmul.f32 %v994_v30, %v253_v54 }
 0x14b   :  { %v773_v19 = vpop.eup %772  ;;  %786 = vrsqrt.f32 %v218_v8  ;;  %729 = vmatprep.mubr.msk.f32.mxu0 %vm49_vm0, %v291_v13  ;;  %v269_v22 = vmul.f32 %v994_v30, %v246_v14 }
 0x14c   :  { %v775_v16 = vpop.eup %774  ;;  %v226_v26 = vadd.f32 1e-05, %v210_v15  ;;  %v299_v55 = vadd.f32 %v1000_v38, %v276_v18  ;;  %v254_v27 = vmul.f32 %v773_v19, %v927_v1 }
 0x14d   :  { %v292_v0 = vadd.f32 %v1000_v38, %v269_v22  ;;  %v247_v31 = vmul.f32 %v775_v16, %v936_v10 }
 0x14e   :  { %788 = vrsqrt.f32 %v226_v26  ;;  %741 = vmatprep.mubr.msk.f32.mxu1 %vm49_vm0, %v299_v55  ;;  %v277_v32 = vmul.f32 %v994_v30, %v254_v27 }
 0x14f   :  { %v777_v33 = vpop.eup %776  ;;  %730 = vmatmul.mubr.msk.f32.gmra.mxu0 %vm49_vm0, %v292_v0  ;;  %v270_v34 = vmul.f32 %v994_v30, %v247_v31 }
 0x150   :  { %v779_v20 = vpop.eup %778  ;;  %v300_v39 = vadd.f32 %v1000_v38, %v277_v32  ;;  %v255_v40 = vmul.f32 %v777_v33, %v939_v11 }
 0x151   :  { %v293_v1 = vadd.f32 %v1000_v38, %v270_v34  ;;  %v248_v41 = vmul.f32 %v779_v20, %v948_v23 }
 0x152   :  { %742 = vmatmul.mubr.msk.f32.gmra.mxu1 %vm49_vm0, %v300_v39  ;;  %v278_v10 = vmul.f32 %v994_v30, %v255_v40 }
 0x153   :  { %v781_v42 = vpop.eup %780  ;;  %732 = vmatprep.mubr.msk.f32.mxu0 %vm49_vm0, %v293_v1  ;;  %v271_v43 = vmul.f32 %v994_v30, %v248_v41 }
 0x154   :  { %v783_v46 = vpop.eup %782  ;;  %v301_v24 = vadd.f32 %v1000_v38, %v278_v10  ;;  %v256_v48 = vmul.f32 %v781_v42, %v951_v17 }
 0x155   :  { %v294_v11 = vadd.f32 %v1000_v38, %v271_v43  ;;  %v249_v36 = vmul.f32 %v783_v46, %v960_v35 }
 0x156   :  { %744 = vmatprep.mubr.msk.f32.mxu1 %vm49_vm0, %v301_v24  ;;  %v279_v23 = vmul.f32 %v994_v30, %v256_v48 }
 0x157   :  { %v785_v49 = vpop.eup %784  ;;  %733 = vmatmul.mubr.msk.f32.gmra.mxu0 %vm49_vm0, %v294_v11  ;;  %v272_v50 = vmul.f32 %v994_v30, %v249_v36 }
 0x158   :  { %v787_v51 = vpop.eup %786  ;;  %v302_v52 = vadd.f32 %v1000_v38, %v279_v23  ;;  %v257_v28 = vmul.f32 %v785_v49, %v963_v21 }
 0x159   :  { %v295_v17 = vadd.f32 %v1000_v38, %v272_v50  ;;  %v250_v29 = vmul.f32 %v787_v51, %v972_v47 }
 0x15a   :  { %745 = vmatmul.mubr.msk.f32.gmra.mxu1 %vm49_vm0, %v302_v52  ;;  %v280_v35 = vmul.f32 %v994_v30, %v257_v28 }
 0x15b   :  { %v789_v53 = vpop.eup %788  ;;  %735 = vmatprep.mubr.msk.f32.mxu0 %vm49_vm0, %v295_v17  ;;  %v273_v56 = vmul.f32 %v994_v30, %v250_v29 }
 0x15c   :  { %v303_v57 = vadd.f32 %v1000_v38, %v280_v35  ;;  %v258_v58 = vmul.f32 %v789_v53, %v975_v25 }
 0x15d   :  { %v296_v59 = vadd.f32 %v1000_v38, %v273_v56 }
 0x15e   :  { %747 = vmatprep.mubr.msk.f32.mxu1 %vm49_vm0, %v303_v57  ;;  %v281_v21 = vmul.f32 %v994_v30, %v258_v58 }
 0x15f   :  { %736 = vmatmul.mubr.msk.f32.gmra.mxu0 %vm49_vm0, %v296_v59 }
 0x160   :  { %v304_v47 = vadd.f32 %v1000_v38, %v281_v21 }
 0x162   :  { %748 = vmatmul.mubr.msk.f32.gmra.mxu1 %vm49_vm0, %v304_v47 }
 0x207   :  { %v728_v44 = vpop.f32.mrf.mxu0 }
 0x208   :  { %v689_v60 = vpack.c.bf16 %v728_v44, %v728_v44 }
 0x209   :  { %v421_v61 = vpop.f32.mrf.mxu0 }
 0x20a   :  { %566 = vst.msk [vmem:[%s1213_s4 + $0x4] sm:$0xf] %vm564_vm1, %v689_v60  ;;  %v688_v25 = vpack.c.bf16 %v421_v61, %v421_v61  ;;  %583 = vrot.lane.b32.xlu1 %v689_v60, %s815_s6  ;;  %v740_v30 = vpop.f32.mrf.mxu1 }
 0x20b   :  { %v697_v37 = vpack.c.bf16 %v740_v30, %v740_v30 }
 0x20c   :  { %565 = vst.msk [vmem:[%s1213_s4] sm:$0xf] %vm564_vm1, %v688_v25  ;;  %581 = vrot.lane.b32.xlu0 %v688_v25, %s815_s6  ;;  %v461_v38 = vpop.f32.mrf.mxu1 }
 0x20d   :  { %574 = vst.msk [vmem:[%s1213_s4 + $0x24] sm:$0xf] %vm564_vm1, %v697_v37  ;;  %v696_v62 = vpack.c.bf16 %v461_v38, %v461_v38 }
 0x20e   :  { %599 = vrot.lane.b32.xlu1 %v697_v37, %s815_s6 }
 0x20f   :  { %573 = vst.msk [vmem:[%s1213_s4 + $0x20] sm:$0xf] %vm564_vm1, %v696_v62  ;;  %v731_v63 = vpop.f32.mrf.mxu0 }
 0x210   :  { %v691_v2 = vpack.c.bf16 %v731_v63, %v731_v63  ;;  %597 = vrot.lane.b32.xlu0 %v696_v62, %s815_s6 }
 0x211   :  { %v431_v3 = vpop.f32.mrf.mxu0 }
 0x212   :  { %568 = vst.msk [vmem:[%s1213_s4 + $0xc] sm:$0xf] %vm564_vm1, %v691_v2  ;;  %v690_v4 = vpack.c.bf16 %v431_v3, %v431_v3  ;;  %587 = vrot.lane.b32.xlu1 %v691_v2, %s815_s6  ;;  %v743_v5 = vpop.f32.mrf.mxu1 }
 0x213   :  { %v699_v6 = vpack.c.bf16 %v743_v5, %v743_v5 }
 0x214   :  { %567 = vst.msk [vmem:[%s1213_s4 + $0x8] sm:$0xf] %vm564_vm1, %v690_v4  ;;  %v471_v45 = vpop.f32.mrf.mxu1 }
 0x215   :  { %576 = vst.msk [vmem:[%s1213_s4 + $0x2c] sm:$0xf] %vm564_vm1, %v699_v6  ;;  %v698_v7 = vpack.c.bf16 %v471_v45, %v471_v45 }
 0x216   :  { %603 = vrot.lane.b32.xlu1 %v699_v6, %s815_s6 }
 0x217   :  { %575 = vst.msk [vmem:[%s1213_s4 + $0x28] sm:$0xf] %vm564_vm1, %v698_v7  ;;  %v734_v8 = vpop.f32.mrf.mxu0  ;;  %601 = vrot.lane.b32.xlu0 %v698_v7, %s815_s6 }
 0x218   :  { %v693_v9 = vpack.c.bf16 %v734_v8, %v734_v8 }
 0x219   :  { %v441_v54 = vpop.f32.mrf.mxu0 }
 0x21a   :  { %570 = vst.msk [vmem:[%s1213_s4 + $0x14] sm:$0xf] %vm564_vm1, %v693_v9  ;;  %v692_v12 = vpack.c.bf16 %v441_v54, %v441_v54  ;;  %585 = vrot.lane.b32.xlu1 %v690_v4, %s815_s6  ;;  %v746_v13 = vpop.f32.mrf.mxu1 }
 0x21b   :  { %v701_v14 = vpack.c.bf16 %v746_v13, %v746_v13 }
 0x21c   :  { %569 = vst.msk [vmem:[%s1213_s4 + $0x10] sm:$0xf] %vm564_vm1, %v692_v12  ;;  %589 = vrot.lane.b32.xlu0 %v692_v12, %s815_s6  ;;  %v481_v15 = vpop.f32.mrf.mxu1 }
 0x21d   :  { %578 = vst.msk [vmem:[%s1213_s4 + $0x34] sm:$0xf] %vm564_vm1, %v701_v14  ;;  %v700_v18 = vpack.c.bf16 %v481_v15, %v481_v15 }
 0x21e   :  { %591 = vrot.lane.b32.xlu1 %v693_v9, %s815_s6 }
 0x21f   :  { %577 = vst.msk [vmem:[%s1213_s4 + $0x30] sm:$0xf] %vm564_vm1, %v700_v18  ;;  %v737_v19 = vpop.f32.mrf.mxu0 }
 0x220   :  { %v695_v22 = vpack.c.bf16 %v737_v19, %v737_v19  ;;  %605 = vrot.lane.b32.xlu0 %v700_v18, %s815_s6 }
 0x221   :  { %v451_v16 = vpop.f32.mrf.mxu0 }
 0x222   :  { %572 = vst.msk [vmem:[%s1213_s4 + $0x1c] sm:$0xf] %vm564_vm1, %v695_v22  ;;  %v694_v26 = vpack.c.bf16 %v451_v16, %v451_v16  ;;  %607 = vrot.lane.b32.xlu1 %v701_v14, %s815_s6  ;;  %v749_v55 = vpop.f32.mrf.mxu1 }
 0x223   :  { %v703_v27 = vpack.c.bf16 %v749_v55, %v749_v55 }
 0x224   :  { %571 = vst.msk [vmem:[%s1213_s4 + $0x18] sm:$0xf] %vm564_vm1, %v694_v26  ;;  %593 = vrot.lane.b32.xlu0 %v694_v26, %s815_s6  ;;  %v491_v0 = vpop.f32.mrf.mxu1 }
 0x225   :  { %580 = vst.msk [vmem:[%s1213_s4 + $0x3c] sm:$0xf] %vm564_vm1, %v703_v27  ;;  %v702_v31 = vpack.c.bf16 %v491_v0, %v491_v0 }
 0x226   :  { %595 = vrot.lane.b32.xlu1 %v695_v22, %s815_s6 }
 0x227   :  { %579 = vst.msk [vmem:[%s1213_s4 + $0x38] sm:$0xf] %vm564_vm1, %v702_v31 }
 0x228   :  { %609 = vrot.lane.b32.xlu0 %v702_v31, %s815_s6 }
 0x22a   :  { %611 = vrot.lane.b32.xlu1 %v703_v27, %s815_s6 }
 0x27c   :  { %v584_v32 = vpop.permute.xlu1 %583 }
 0x27d   :  { %630 = vst.msk [vmem:[%s1214_s5 + $0x4] sm:$0xf] %vm564_vm1, %v584_v32 }
 0x27e   :  { %v582_v33 = vpop.permute.xlu0 %581 }
 0x27f   :  { %629 = vst.msk [vmem:[%s1214_s5] sm:$0xf] %vm564_vm1, %v582_v33 }
 0x280   :  { %v600_v34 = vpop.permute.xlu1 %599 }
 0x281   :  { %638 = vst.msk [vmem:[%s1214_s5 + $0x24] sm:$0xf] %vm564_vm1, %v600_v34 }
 0x282   :  { %v598_v20 = vpop.permute.xlu0 %597 }
 0x283   :  { %637 = vst.msk [vmem:[%s1214_s5 + $0x20] sm:$0xf] %vm564_vm1, %v598_v20 }
 0x284   :  { %v588_v39 = vpop.permute.xlu1 %587 }
 0x285   :  { %632 = vst.msk [vmem:[%s1214_s5 + $0xc] sm:$0xf] %vm564_vm1, %v588_v39 }
 0x288   :  { %v604_v40 = vpop.permute.xlu1 %603 }
 0x289   :  { %640 = vst.msk [vmem:[%s1214_s5 + $0x2c] sm:$0xf] %vm564_vm1, %v604_v40  ;;  %v602_v1 = vpop.permute.xlu0 %601 }
 0x28a   :  { %639 = vst.msk [vmem:[%s1214_s5 + $0x28] sm:$0xf] %vm564_vm1, %v602_v1 }
 0x28c   :  { %v586_v41 = vpop.permute.xlu1 %585 }
 0x28d   :  { %631 = vst.msk [vmem:[%s1214_s5 + $0x8] sm:$0xf] %vm564_vm1, %v586_v41 }
 0x28e   :  { %v590_v10 = vpop.permute.xlu0 %589 }
 0x28f   :  { %633 = vst.msk [vmem:[%s1214_s5 + $0x10] sm:$0xf] %vm564_vm1, %v590_v10 }
 0x290   :  { %v592_v42 = vpop.permute.xlu1 %591 }
 0x291   :  { %634 = vst.msk [vmem:[%s1214_s5 + $0x14] sm:$0xf] %vm564_vm1, %v592_v42 }
 0x292   :  { %v606_v43 = vpop.permute.xlu0 %605 }
 0x293   :  { %641 = vst.msk [vmem:[%s1214_s5 + $0x30] sm:$0xf] %vm564_vm1, %v606_v43 }
 0x294   :  { %v608_v46 = vpop.permute.xlu1 %607 }
 0x295   :  { %642 = vst.msk [vmem:[%s1214_s5 + $0x34] sm:$0xf] %vm564_vm1, %v608_v46 }
 0x296   :  { %v594_v24 = vpop.permute.xlu0 %593 }
 0x297   :  { %635 = vst.msk [vmem:[%s1214_s5 + $0x18] sm:$0xf] %vm564_vm1, %v594_v24 }
 0x298   :  { %v596_v48 = vpop.permute.xlu1 %595 }
 0x299   :  { %636 = vst.msk [vmem:[%s1214_s5 + $0x1c] sm:$0xf] %vm564_vm1, %v596_v48 }
 0x29a   :  { %v610_v11 = vpop.permute.xlu0 %609 }
 0x29b   :  { %643 = vst.msk [vmem:[%s1214_s5 + $0x38] sm:$0xf] %vm564_vm1, %v610_v11 }
 0x29c   :  { %v612_v36 = vpop.permute.xlu1 %611 }
 0x29d   :  { %644 = vst.msk [vmem:[%s1214_s5 + $0x3c] sm:$0xf] %vm564_vm1, %v612_v36 }
 0x29e   :  { %653 = vsyncpa [#allocation3], 1 }

// kernel: _lambda_.9
= control target key start
LH: loop header
LB: loop body
LE: loop exit
PB: predicated region body
PF: predicated region fallthrough
CT: control target
= control target key end

     0   :  { %s761_s12 = smov 0   ;;  %s1009_s0 = inlined_call_operand.vmem [shape: bf16[2,8,8,32], index: 0, kind: input, shape index: {}]   ;;  %s1010_s1 = inlined_call_operand.vmem [shape: f32[9,32], index: 1, kind: input, shape index: {}]   ;;  %s1011_s2 = inlined_call_operand.vmem [shape: f32[1,32], index: 2, kind: input, shape index: {}]   ;;  %s1012_s3 = inlined_call_operand.vmem [shape: bf16[2,8,8,32], index: 3, kind: output, shape index: {}]  }
   0x1 LB: > { %s649_s13 = sadd.s32 4294967295, %s738_s12   ;;  %p653_p0 = scmp.ge.s32.totalorder %s738_s12, 1  ;;  %s738_s12 = sphi %s761_s12, %s13_s12  }
   0x2   : > { %p137_p1 = scmp.lt.s32.totalorder %s738_s12, 3 }
   0x4   : > { %p138_p2 = pnand %p653_p0, %p137_p1 }
   0x5   : > { %p771_p3 = scmp.lt.s32.totalorder (!%p138_p2), %s649_s13, 1 }
   0x6   : > { %141 = sbr.rel (%p138_p2) target bundleno = 124 (0x7c), region = 32 }
   0xb   : > { %vm171_vm0 = vcmask 261120   ;;  %vm173_vm1 = vcmask 254976   ;;  %vm179_vm2 = vcmask 253952   ;;  %v740_v0 = vmov 0.0   ;;  %s1015_s13 = smov (!%p771_p3, %s649_s13), 1 }
   0xc   : > { %172 = vst.msk [vmem:[#allocation2] sm:$0xff] %vm171_vm0, %v740_v0  ;;  %176 = vst.msk [vmem:[#allocation2 + $0x90] sm:$0xff] %vm171_vm0, %v740_v0  ;;  %s670_s15 = sshll.u32 %s1015_s13, 5  ;;  %v808_v1 = vld [vmem:[%s1010_s1] ss:$0 sm:$0xff]  ;;  %vm585_vm4 = vcmask 257024  }
   0xd   : > { %174 = vst.msk [vmem:[#allocation2 + $0x8] sm:$0x3] %vm173_vm1, %v740_v0  ;;  %177 = vst.msk [vmem:[#allocation2 + $0x98] sm:$0x3] %vm173_vm1, %v740_v0  ;;  %s165_s18 = scalar_lea.vmem %s1009_s0, %s670_s15  ;;  %v813_v2 = vld [vmem:[%s1010_s1 + $0x1] ss:$0 sm:$0xff]  ;;  %s974_s17 = scalar_lea.vmem %s1012_s3, %s670_s15 }
   0xe   : > { %180 = vst.msk [vmem:[#allocation2 + $0x10] sm:$0x1] %vm179_vm2, %v740_v0  ;;  %181 = vst.msk [vmem:[#allocation2 + $0x20] sm:$0x1] %vm179_vm2, %v740_v0  ;;  %v673_v3 = vld [vmem:[%s165_s18] sm:$0xff]   ;;  %v688_v4 = vld [vmem:[%s165_s18 + $0x8] sm:$0xff]  }
   0xf   : > { %182 = vst.msk [vmem:[#allocation2 + $0x30] sm:$0x1] %vm179_vm2, %v740_v0  ;;  %183 = vst.msk [vmem:[#allocation2 + $0x40] sm:$0x1] %vm179_vm2, %v740_v0  ;;  %v689_v5 = vld [vmem:[%s165_s18 + $0x10] sm:$0xff]   ;;  %v674_v6 = vunpack.c.l.bf16 %v673_v3  ;;  %v675_v7 = vunpack.c.h.bf16 %v673_v3  ;;  %v678_v8 = vunpack.c.l.bf16 %v688_v4  ;;  %v679_v9 = vunpack.c.h.bf16 %v688_v4  ;;  %v690_v10 = vld [vmem:[%s165_s18 + $0x18] sm:$0xff]  }
  0x10   : > { %184 = vst.msk [vmem:[#allocation2 + $0x50] sm:$0x1] %vm179_vm2, %v740_v0  ;;  %185 = vst.msk [vmem:[#allocation2 + $0x60] sm:$0x1] %vm179_vm2, %v740_v0  ;;  %v818_v11 = vld [vmem:[%s1010_s1 + $0x2] ss:$0 sm:$0xff]  ;;  %v682_v12 = vunpack.c.l.bf16 %v689_v5  ;;  %v683_v13 = vunpack.c.h.bf16 %v689_v5  ;;  %v686_v14 = vunpack.c.l.bf16 %v690_v10  ;;  %v687_v15 = vunpack.c.h.bf16 %v690_v10 }
  0x11   : > { %186 = vst.msk [vmem:[#allocation2 + $0x70] sm:$0x1] %vm179_vm2, %v740_v0  ;;  %187 = vst.msk [vmem:[#allocation2 + $0x80] sm:$0x1] %vm179_vm2, %v740_v0  ;;  %v834_v23 = vld [vmem:[%s1010_s1 + $0x3] ss:$0 sm:$0xff] }
  0x12   : > { %188 = vst.msk [vmem:[#allocation2 + $0x19] sm:$0x1] %vm179_vm2, %v740_v0  ;;  %189 = vst.msk [vmem:[#allocation2 + $0x29] sm:$0x1] %vm179_vm2, %v740_v0  ;;  %v839_v25 = vld [vmem:[%s1010_s1 + $0x4] ss:$0 sm:$0xff] }
  0x13   : > { %190 = vst.msk [vmem:[#allocation2 + $0x39] sm:$0x1] %vm179_vm2, %v740_v0  ;;  %191 = vst.msk [vmem:[#allocation2 + $0x49] sm:$0x1] %vm179_vm2, %v740_v0  ;;  %v220_v16 = vld [vmem:[#allocation2] sm:$0xff] }
  0x14   : > { %192 = vst.msk [vmem:[#allocation2 + $0x59] sm:$0x1] %vm179_vm2, %v740_v0  ;;  %193 = vst.msk [vmem:[#allocation2 + $0x69] sm:$0x1] %vm179_vm2, %v740_v0  ;;  %v249_v17 = vld [vmem:[#allocation2 + $0x1] sm:$0xff]  ;;  %v233_v19 = vmul.f32 %v808_v1, %v220_v16 }
  0x15   : > { %194 = vst.msk [vmem:[#allocation2 + $0x79] sm:$0x1] %vm179_vm2, %v740_v0  ;;  %195 = vst.msk [vmem:[#allocation2 + $0x89] sm:$0x1] %vm179_vm2, %v740_v0  ;;  %v278_v18 = vld [vmem:[#allocation2 + $0x2] sm:$0xff]  ;;  %v262_v20 = vmul.f32 %v813_v2, %v249_v17 }
  0x16   : > { %212 = vst.msk [vmem:[#allocation2 + $0x11] sm:$0xff] %vm171_vm0, %v674_v6  ;;  %213 = vst.msk [vmem:[#allocation2 + $0x21] sm:$0xff] %vm171_vm0, %v675_v7  ;;  %v291_v22 = vmul.f32 %v818_v11, %v278_v18  ;;  %v844_v26 = vld [vmem:[%s1010_s1 + $0x5] ss:$0 sm:$0xff]  ;;  %v849_v27 = vld [vmem:[%s1010_s1 + $0x6] ss:$0 sm:$0xff] }
  0x17   : > { %214 = vst.msk [vmem:[#allocation2 + $0x31] sm:$0xff] %vm171_vm0, %v678_v8  ;;  %215 = vst.msk [vmem:[#allocation2 + $0x41] sm:$0xff] %vm171_vm0, %v679_v9  ;;  %v270_v21 = vadd.f32 %v262_v20, %v233_v19  ;;  %v855_v34 = vld [vmem:[%s1010_s1 + $0x7] ss:$0 sm:$0xff]  ;;  %v861_v37 = vld [vmem:[%s1010_s1 + $0x8] ss:$0 sm:$0xff] }
  0x18   : > { %216 = vst.msk [vmem:[#allocation2 + $0x51] sm:$0xff] %vm171_vm0, %v682_v12  ;;  %217 = vst.msk [vmem:[#allocation2 + $0x61] sm:$0xff] %vm171_vm0, %v683_v13  ;;  %v889_v19 = vld [vmem:[%s1011_s2] ss:$0 sm:$0xff] }
  0x19   : > { %218 = vst.msk [vmem:[#allocation2 + $0x71] sm:$0xff] %vm171_vm0, %v686_v14  ;;  %219 = vst.msk [vmem:[#allocation2 + $0x81] sm:$0xff] %vm171_vm0, %v687_v15  ;;  %v299_v24 = vadd.f32 %v291_v22, %v270_v21 }
  0x1d   : > { %v307_v28 = vld [vmem:[#allocation2 + $0x10] sm:$0xff]  ;;  %v395_v32 = vld [vmem:[#allocation2 + $0x20] sm:$0xff] }
  0x1e   : > { %v336_v29 = vld [vmem:[#allocation2 + $0x11] sm:$0xff]  ;;  %v320_v31 = vmul.f32 %v834_v23, %v307_v28  ;;  %v424_v33 = vld [vmem:[#allocation2 + $0x21] sm:$0xff]  ;;  %v234_v35 = vmul.f32 %v808_v1, %v307_v28  ;;  %v408_v42 = vmul.f32 %v849_v27, %v395_v32  ;;  %v235_v51 = vmul.f32 %v808_v1, %v395_v32 }
  0x1f   : > { %v365_v30 = vld [vmem:[#allocation2 + $0x12] sm:$0xff]  ;;  %v453_v36 = vld [vmem:[#allocation2 + $0x22] sm:$0xff]  ;;  %v263_v38 = vmul.f32 %v813_v2, %v336_v29  ;;  %v349_v40 = vmul.f32 %v839_v25, %v336_v29  ;;  %v437_v43 = vmul.f32 %v855_v34, %v424_v33  ;;  %v264_v52 = vmul.f32 %v813_v2, %v424_v33 }
  0x20   : > { %v328_v39 = vadd.f32 %v320_v31, %v299_v24  ;;  %v378_v41 = vmul.f32 %v844_v26, %v365_v30  ;;  %v292_v45 = vmul.f32 %v818_v11, %v365_v30  ;;  %v396_v46 = vld [vmem:[#allocation2 + $0x30] sm:$0xff]  ;;  %v466_v48 = vmul.f32 %v861_v37, %v453_v36  ;;  %v397_v61 = vld [vmem:[#allocation2 + $0x40] sm:$0xff] }
  0x21   : > { %v271_v44 = vadd.f32 %v263_v38, %v234_v35  ;;  %v425_v49 = vld [vmem:[#allocation2 + $0x31] sm:$0xff]  ;;  %v321_v54 = vmul.f32 %v834_v23, %v395_v32  ;;  %v350_v55 = vmul.f32 %v839_v25, %v424_v33  ;;  %v379_v56 = vmul.f32 %v844_v26, %v453_v36  ;;  %v426_v7 = vld [vmem:[#allocation2 + $0x41] sm:$0xff] }
  0x22   : > { %v357_v47 = vadd.f32 %v349_v40, %v328_v39  ;;  %v454_v50 = vld [vmem:[#allocation2 + $0x32] sm:$0xff]  ;;  %v409_v58 = vmul.f32 %v849_v27, %v396_v46  ;;  %v272_v59 = vadd.f32 %v264_v52, %v235_v51  ;;  %v293_v60 = vmul.f32 %v818_v11, %v453_v36  ;;  %v455_v16 = vld [vmem:[#allocation2 + $0x42] sm:$0xff] }
  0x23   : > { %v300_v53 = vadd.f32 %v292_v45, %v271_v44  ;;  %v438_v63 = vmul.f32 %v855_v34, %v425_v49  ;;  %v467_v0 = vmul.f32 %v861_v37, %v454_v50  ;;  %v236_v3 = vmul.f32 %v808_v1, %v396_v46  ;;  %v398_v31 = vld [vmem:[#allocation2 + $0x50] sm:$0xff] }
  0x24   : > { %v386_v57 = vadd.f32 %v378_v41, %v357_v47  ;;  %v301_v5 = vadd.f32 %v293_v60, %v272_v59  ;;  %v322_v6 = vmul.f32 %v834_v23, %v396_v46  ;;  %v265_v8 = vmul.f32 %v813_v2, %v425_v49  ;;  %v427_v32 = vld [vmem:[#allocation2 + $0x51] sm:$0xff]  ;;  %v399_v60 = vld [vmem:[#allocation2 + $0x60] sm:$0xff] }
  0x25   : > { %v329_v62 = vadd.f32 %v321_v54, %v300_v53  ;;  %v351_v10 = vmul.f32 %v839_v25, %v425_v49  ;;  %v380_v12 = vmul.f32 %v844_v26, %v454_v50  ;;  %v410_v13 = vmul.f32 %v849_v27, %v397_v61  ;;  %v456_v40 = vld [vmem:[#allocation2 + $0x52] sm:$0xff] }
  0x26   : > { %v416_v4 = vadd.f32 %v408_v42, %v386_v57  ;;  %v330_v15 = vadd.f32 %v322_v6, %v301_v5  ;;  %v273_v17 = vadd.f32 %v265_v8, %v236_v3  ;;  %v294_v18 = vmul.f32 %v818_v11, %v454_v50 }
  0x27   : > { %v358_v9 = vadd.f32 %v350_v55, %v329_v62  ;;  %v439_v21 = vmul.f32 %v855_v34, %v426_v7  ;;  %v323_v22 = vmul.f32 %v834_v23, %v397_v61  ;;  %v237_v24 = vmul.f32 %v808_v1, %v397_v61 }
  0x28   : > { %v445_v14 = vadd.f32 %v437_v43, %v416_v4  ;;  %v359_v29 = vadd.f32 %v351_v10, %v330_v15  ;;  %v302_v30 = vadd.f32 %v294_v18, %v273_v17  ;;  %v266_v33 = vmul.f32 %v813_v2, %v426_v7 }
  0x29   : > { %v387_v20 = vadd.f32 %v379_v56, %v358_v9  ;;  %v468_v36 = vmul.f32 %v861_v37, %v455_v16  ;;  %v352_v38 = vmul.f32 %v839_v25, %v426_v7  ;;  %v381_v39 = vmul.f32 %v844_v26, %v455_v16 }
  0x2a   : > { %v474_v28 = vadd.f32 %v466_v48, %v445_v14  ;;  %v388_v42 = vadd.f32 %v380_v12, %v359_v29  ;;  %v331_v43 = vadd.f32 %v323_v22, %v302_v30  ;;  %v274_v44 = vadd.f32 %v266_v33, %v237_v24  ;;  %v428_v12 = vld [vmem:[#allocation2 + $0x61] sm:$0xff] }
  0x2b   : > { %v417_v35 = vadd.f32 %v409_v58, %v387_v20  ;;  %v411_v46 = vmul.f32 %v849_v27, %v398_v31  ;;  %v440_v47 = vmul.f32 %v855_v34, %v427_v32  ;;  %v295_v48 = vmul.f32 %v818_v11, %v455_v16  ;;  %v457_v16 = vld [vmem:[#allocation2 + $0x62] sm:$0xff] }
  0x2c   : > { %v899_v41 = vadd.f32 %v889_v19, %v474_v28  ;;  %v418_v50 = vadd.f32 %v410_v13, %v388_v42  ;;  %v360_v51 = vadd.f32 %v352_v38, %v331_v43  ;;  %v469_v52 = vmul.f32 %v861_v37, %v456_v40 }
  0x2d   : > { %v446_v45 = vadd.f32 %v438_v63, %v417_v35  ;;  %v303_v54 = vadd.f32 %v295_v48, %v274_v44  ;;  %v324_v55 = vmul.f32 %v834_v23, %v398_v31  ;;  %v238_v56 = vmul.f32 %v808_v1, %v398_v31  ;;  %v400_v35 = vld [vmem:[#allocation2 + $0x70] sm:$0xff] }
  0x2e   : > { %v497_v49 = vand.u32 2147483647, %v899_v41  ;;  %v447_v58 = vadd.f32 %v439_v21, %v418_v50  ;;  %v389_v59 = vadd.f32 %v381_v39, %v360_v51  ;;  %v267_v61 = vmul.f32 %v813_v2, %v427_v32  ;;  %v429_v44 = vld [vmem:[#allocation2 + $0x71] sm:$0xff] }
  0x2f   : > { %v475_v53 = vadd.f32 %v467_v0, %v446_v45  ;;  %v332_v63 = vadd.f32 %v324_v55, %v303_v54  ;;  %v353_v3 = vmul.f32 %v839_v25, %v427_v32  ;;  %v296_v4 = vmul.f32 %v818_v11, %v456_v40  ;;  %v458_v51 = vld [vmem:[#allocation2 + $0x72] sm:$0xff] }
  0x30   : > { %v505_v57 = vsub.f32 0.0, %v497_v49  ;;  %v476_v5 = vadd.f32 %v468_v36, %v447_v58  ;;  %v419_v6 = vadd.f32 %v411_v46, %v389_v59  ;;  %v275_v7 = vadd.f32 %v267_v61, %v238_v56 }
  0x31   : > { %v910_v62 = vadd.f32 %v889_v19, %v475_v53  ;;  %v361_v9 = vadd.f32 %v353_v3, %v332_v63  ;;  %v382_v10 = vmul.f32 %v844_v26, %v456_v40  ;;  %v325_v13 = vmul.f32 %v834_v23, %v399_v60  ;;  %v401_v3 = vld [vmem:[#allocation2 + $0x80] sm:$0xff] }
  0x32   : > { %v513_v0 = vmul.f32 1.442695, %v505_v57  ;;  %v918_v14 = vadd.f32 %v889_v19, %v476_v5  ;;  %v448_v15 = vadd.f32 %v440_v47, %v419_v6  ;;  %v304_v17 = vadd.f32 %v296_v4, %v275_v7 }
  0x33   : > { %v498_v8 = vand.u32 2147483647, %v910_v62  ;;  %v390_v20 = vadd.f32 %v382_v10, %v361_v9  ;;  %v412_v21 = vmul.f32 %v849_v27, %v399_v60  ;;  %v354_v29 = vmul.f32 %v839_v25, %v428_v12 }
  0x34   : > { %700 = vpow2.f32 %v513_v0  ;;  %v499_v22 = vand.u32 2147483647, %v918_v14  ;;  %v477_v24 = vadd.f32 %v469_v52, %v448_v15  ;;  %v333_v28 = vadd.f32 %v325_v13, %v304_v17 }
  0x35   : > { %v506_v18 = vsub.f32 0.0, %v498_v8  ;;  %v420_v31 = vadd.f32 %v412_v21, %v390_v20  ;;  %v441_v32 = vmul.f32 %v855_v34, %v428_v12  ;;  %v383_v33 = vmul.f32 %v844_v26, %v457_v16 }
  0x36   : > { %v507_v36 = vsub.f32 0.0, %v499_v22  ;;  %v926_v38 = vadd.f32 %v889_v19, %v477_v24  ;;  %v362_v39 = vadd.f32 %v354_v29, %v333_v28  ;;  %v239_v40 = vmul.f32 %v808_v1, %v399_v60  ;;  %v459_v24 = vld [vmem:[#allocation2 + $0x82] sm:$0xff]  ;;  %v402_v29 = vld [vmem:[#allocation2 + $0x90] sm:$0xff] }
  0x37   : > { %v515_v30 = vmul.f32 1.442695, %v506_v18  ;;  %v449_v42 = vadd.f32 %v441_v32, %v420_v31  ;;  %v470_v43 = vmul.f32 %v861_v37, %v457_v16  ;;  %v268_v45 = vmul.f32 %v813_v2, %v428_v12 }
  0x38   : > { %v517_v46 = vmul.f32 1.442695, %v507_v36  ;;  %v500_v47 = vand.u32 2147483647, %v926_v38  ;;  %v391_v48 = vadd.f32 %v383_v33, %v362_v39  ;;  %v413_v49 = vmul.f32 %v849_v27, %v400_v35 }
  0x39   : > { %702 = vpow2.f32 %v515_v30  ;;  %v478_v50 = vadd.f32 %v470_v43, %v449_v42  ;;  %v276_v52 = vadd.f32 %v268_v45, %v239_v40  ;;  %v297_v53 = vmul.f32 %v818_v11, %v457_v16  ;;  %v430_v16 = vld [vmem:[#allocation2 + $0x81] sm:$0xff] }
  0x3a   : > { %704 = vpow2.f32 %v517_v46  ;;  %v508_v54 = vsub.f32 0.0, %v500_v47  ;;  %v421_v55 = vadd.f32 %v413_v49, %v391_v48  ;;  %v442_v56 = vmul.f32 %v855_v34, %v429_v44  ;;  %v431_v46 = vld [vmem:[#allocation2 + $0x91] sm:$0xff] }
  0x3b   : > { %v936_v57 = vadd.f32 %v889_v19, %v478_v50  ;;  %v305_v58 = vadd.f32 %v297_v53, %v276_v52  ;;  %v326_v59 = vmul.f32 %v834_v23, %v400_v35  ;;  %v471_v63 = vmul.f32 %v861_v37, %v458_v51 }
  0x3c   : > { %v519_v60 = vmul.f32 1.442695, %v508_v54  ;;  %v450_v61 = vadd.f32 %v442_v56, %v421_v55  ;;  %v240_v4 = vmul.f32 %v808_v1, %v400_v35  ;;  %v355_v6 = vmul.f32 %v839_v25, %v429_v44 }
  0x3d   : > { %v501_v0 = vand.u32 2147483647, %v936_v57  ;;  %v334_v5 = vadd.f32 %v326_v59, %v305_v58  ;;  %v269_v7 = vmul.f32 %v813_v2, %v429_v44  ;;  %v384_v9 = vmul.f32 %v844_v26, %v458_v51 }
  0x3e   : > { %706 = vpow2.f32 %v519_v60  ;;  %v479_v8 = vadd.f32 %v471_v63, %v450_v61  ;;  %v298_v10 = vmul.f32 %v818_v11, %v458_v51  ;;  %v327_v1 = vmul.f32 %v834_v23, %v401_v3 }
  0x3f   : > { %v509_v13 = vsub.f32 0.0, %v501_v0  ;;  %v363_v15 = vadd.f32 %v355_v6, %v334_v5  ;;  %v277_v17 = vadd.f32 %v269_v7, %v240_v4  ;;  %v414_v2 = vmul.f32 %v849_v27, %v401_v3 }
  0x40   : > { %v948_v20 = vadd.f32 %v889_v19, %v479_v8  ;;  %v443_v30 = vmul.f32 %v855_v34, %v430_v16  ;;  %v356_v23 = vmul.f32 %v839_v25, %v430_v16  ;;  %v472_v36 = vmul.f32 %v861_v37, %v459_v24  ;;  %v460_v25 = vld [vmem:[#allocation2 + $0x92] sm:$0xff] }
  0x41   : > { %v701_v12 = vpop.eup %700  ;;  %v521_v21 = vmul.f32 1.442695, %v509_v13  ;;  %v392_v22 = vadd.f32 %v384_v9, %v363_v15  ;;  %v306_v28 = vadd.f32 %v298_v10, %v277_v17  ;;  %v415_v39 = vmul.f32 %v849_v27, %v402_v29 }
  0x42   : > { %v545_v18 = vadd.f32 1.0, %v701_v12  ;;  %v502_v11 = vand.u32 2147483647, %v948_v20  ;;  %v385_v44 = vmul.f32 %v844_v26, %v459_v24  ;;  %v444_v27 = vmul.f32 %v855_v34, %v431_v46 }
  0x43   : > { %v422_v31 = vadd.f32 %v414_v2, %v392_v22  ;;  %v335_v32 = vadd.f32 %v327_v1, %v306_v28  ;;  %v473_v55 = vmul.f32 %v861_v37, %v460_v25  ;;  %vm529_vm3 = vcmp.ge.f32.partialorder %v899_v41, 0.0 }
  0x44   : > { %708 = vrcp.f32 %v545_v18  ;;  %v510_v35 = vsub.f32 0.0, %v502_v11  ;;  %v537_v61 = vsel %vm529_vm3, 1.0, %v701_v12  ;;  %vm530_vm5 = vcmp.ge.f32.partialorder %v910_v62, 0.0 }
  0x45   : > { %710 = vpow2.f32 %v521_v21  ;;  %v451_v42 = vadd.f32 %v443_v30, %v422_v31  ;;  %v364_v43 = vadd.f32 %v356_v23, %v335_v32  ;;  %vm531_vm6 = vcmp.ge.f32.partialorder %v918_v14, 0.0 }
  0x46   : > { %v703_v33 = vpop.eup %702  ;;  %v523_v45 = vmul.f32 1.442695, %v510_v35  ;;  %vm532_vm7 = vcmp.ge.f32.partialorder %v926_v38, 0.0  ;;  %vm533_vm8 = vcmp.ge.f32.partialorder %v936_v57, 0.0  ;;  %vm534_vm9 = vcmp.ge.f32.partialorder %v948_v20, 0.0 }
  0x47   : > { %v546_v40 = vadd.f32 1.0, %v703_v33  ;;  %v705_v47 = vpop.eup %704  ;;  %v480_v48 = vadd.f32 %v472_v36, %v451_v42  ;;  %v393_v49 = vadd.f32 %v385_v44, %v364_v43  ;;  %v538_v8 = vsel %vm530_vm5, 1.0, %v703_v33 }
  0x48   : > { %v547_v50 = vadd.f32 1.0, %v705_v47  ;;  %v539_v16 = vsel %vm531_vm6, 1.0, %v705_v47 }
  0x49   : > { %712 = vrcp.f32 %v546_v40  ;;  %v958_v51 = vadd.f32 %v889_v19, %v480_v48  ;;  %v423_v52 = vadd.f32 %v415_v39, %v393_v49 }
  0x4a   : > { %714 = vpow2.f32 %v523_v45 }
  0x4b   : > { %716 = vrcp.f32 %v547_v50  ;;  %v707_v53 = vpop.eup %706  ;;  %v503_v54 = vand.u32 2147483647, %v958_v51  ;;  %v452_v26 = vadd.f32 %v444_v27, %v423_v52  ;;  %vm535_vm10 = vcmp.ge.f32.partialorder %v958_v51, 0.0 }
  0x4c   : > { %v548_v56 = vadd.f32 1.0, %v707_v53  ;;  %v540_v22 = vsel %vm532_vm7, 1.0, %v707_v53 }
  0x4d   : > { %v511_v58 = vsub.f32 0.0, %v503_v54  ;;  %v481_v59 = vadd.f32 %v473_v55, %v452_v26 }
  0x4e   : > { %718 = vrcp.f32 %v548_v56 }
  0x4f   : > { %v525_v63 = vmul.f32 1.442695, %v511_v58  ;;  %v965_v3 = vadd.f32 %v889_v19, %v481_v59 }
  0x51   : > { %v709_v60 = vpop.eup %708  ;;  %720 = vpow2.f32 %v525_v63  ;;  %v504_v5 = vand.u32 2147483647, %v965_v3  ;;  %vm536_vm11 = vcmp.ge.f32.partialorder %v965_v3, 0.0 }
  0x52   : > { %v711_v34 = vpop.eup %710  ;;  %v554_v4 = vmul.f32 %v709_v60, %v537_v61 }
  0x53   : > { %v549_v0 = vadd.f32 1.0, %v711_v34  ;;  %v512_v19 = vsub.f32 0.0, %v504_v5  ;;  %v541_v30 = vsel %vm533_vm8, 1.0, %v711_v34 }
  0x54   : > { %v569_v37 = vmul.f32 %v554_v4, %v899_v41 }
  0x55   : > { %722 = vrcp.f32 %v549_v0  ;;  %v527_v12 = vmul.f32 1.442695, %v512_v19 }
  0x56   : > { %v713_v6 = vpop.eup %712  ;;  %v577_v7 = vpack.c.bf16 %v569_v37, %v569_v37 }
  0x57   : > { %v715_v9 = vpop.eup %714  ;;  %v556_v10 = vmul.f32 %v713_v6, %v538_v8  ;;  %724 = vpow2.f32 %v527_v12 }
  0x58   : > { %586 = vst.msk [vmem:[%s974_s17] sm:$0xf] %vm585_vm4, %v577_v7  ;;  %v550_v41 = vadd.f32 1.0, %v715_v9  ;;  %v717_v13 = vpop.eup %716 }
  0x59   : > { %v570_v15 = vmul.f32 %v556_v10, %v910_v62  ;;  %v558_v17 = vmul.f32 %v717_v13, %v539_v16 }
  0x5a   : > { %726 = vrcp.f32 %v550_v41 }
  0x5b   : > { %v578_v1 = vpack.c.bf16 %v570_v15, %v570_v15  ;;  %v571_v18 = vmul.f32 %v558_v17, %v918_v14  ;;  %v719_v21 = vpop.eup %718 }
  0x5c   : > { %v560_v24 = vmul.f32 %v719_v21, %v540_v22 }
  0x5d   : > { %587 = vst.msk [vmem:[%s974_s17 + $0x4] sm:$0xf] %vm585_vm4, %v578_v1  ;;  %v579_v2 = vpack.c.bf16 %v571_v18, %v571_v18 }
  0x5e   : > { %v721_v28 = vpop.eup %720  ;;  %v572_v62 = vmul.f32 %v560_v24, %v926_v38  ;;  %v542_v38 = vsel %vm534_vm9, 1.0, %v715_v9 }
  0x5f   : > { %588 = vst.msk [vmem:[%s974_s17 + $0x8] sm:$0xf] %vm585_vm4, %v579_v2  ;;  %v551_v29 = vadd.f32 1.0, %v721_v28  ;;  %v543_v43 = vsel %vm535_vm10, 1.0, %v721_v28 }
  0x60   : > { %v580_v14 = vpack.c.bf16 %v572_v62, %v572_v62 }
  0x61   : > { %728 = vrcp.f32 %v551_v29 }
  0x62   : > { %v723_v11 = vpop.eup %722  ;;  %589 = vst.msk [vmem:[%s974_s17 + $0xc] sm:$0xf] %vm585_vm4, %v580_v14 }
  0x63   : > { %v562_v31 = vmul.f32 %v723_v11, %v541_v30 }
  0x64   : > { %v725_v23 = vpop.eup %724 }
  0x65   : > { %v573_v32 = vmul.f32 %v562_v31, %v936_v57  ;;  %v552_v36 = vadd.f32 1.0, %v725_v23  ;;  %v544_v48 = vsel %vm536_vm11, 1.0, %v725_v23 }
  0x67   : > { %v727_v33 = vpop.eup %726  ;;  %v581_v35 = vpack.c.bf16 %v573_v32, %v573_v32  ;;  %730 = vrcp.f32 %v552_v36 }
  0x68   : > { %v564_v39 = vmul.f32 %v727_v33, %v542_v38 }
  0x69   : > { %590 = vst.msk [vmem:[%s974_s17 + $0x10] sm:$0xf] %vm585_vm4, %v581_v35 }
  0x6a   : > { %v574_v40 = vmul.f32 %v564_v39, %v948_v20 }
  0x6c   : > { %v582_v42 = vpack.c.bf16 %v574_v40, %v574_v40 }
  0x6e   : > { %591 = vst.msk [vmem:[%s974_s17 + $0x14] sm:$0xf] %vm585_vm4, %v582_v42  ;;  %v729_v57 = vpop.eup %728 }
  0x6f   : > { %v566_v44 = vmul.f32 %v729_v57, %v543_v43 }
  0x71   : > { %v575_v45 = vmul.f32 %v566_v44, %v958_v51 }
  0x73   : > { %v583_v46 = vpack.c.bf16 %v575_v45, %v575_v45 }
  0x74   : > { %v731_v47 = vpop.eup %730 }
  0x75   : > { %592 = vst.msk [vmem:[%s974_s17 + $0x18] sm:$0xf] %vm585_vm4, %v583_v46  ;;  %v568_v49 = vmul.f32 %v731_v47, %v544_v48 }
  0x77   : > { %v576_v20 = vmul.f32 %v568_v49, %v965_v3 }
  0x79   : > { %v584_v50 = vpack.c.bf16 %v576_v20, %v576_v20 }
  0x7b   : > { %593 = vst.msk [vmem:[%s974_s17 + $0x1c] sm:$0xf] %vm585_vm4, %v584_v50 }
  0x7c PF: > { %s13_s12 = sadd.s32 1, %s738_s12  }
  0x7d   : > { %p10_p4 = scmp.ge.s32.totalorder %s13_s12, 4  }
  0x7f   :  { %12 = sbr.rel (!%p10_p4) target bundleno = 1 (0x1), region = 65 }

// kernel: _lambda_.10
= control target key start
LH: loop header
LB: loop body
LE: loop exit
PB: predicated region body
PF: predicated region fallthrough
CT: control target
= control target key end

     0   :  { %s1901_s18 = smov 0   ;;  %s1903_s19 = smov 0   ;;  %s2322_s0 = inlined_call_operand.vmem [shape: bf16[2,4,64,32], index: 0, kind: input, shape index: {}]   ;;  %s2323_s1 = inlined_call_operand.vmem [shape: f32[4,32,64], index: 1, kind: input, shape index: {}]   ;;  %s2324_s2 = inlined_call_operand.vmem [shape: f32[4,1,32], index: 2, kind: input, shape index: {}]   ;;  %s2325_s3 = inlined_call_operand.vmem [shape: f32[4,16,32], index: 3, kind: input, shape index: {}]   ;;  %s2326_s4 = inlined_call_operand.vmem [shape: f32[4,1,32], index: 4, kind: input, shape index: {}]   ;;  %s2327_s5 = inlined_call_operand.vmem [shape: bf16[2,4,64,32], index: 5, kind: output, shape index: {}]  }
   0x1   :  { %s1905_s20 = smov 0   ;;  %s1907_s21 = smov 0  }
   0x2   :  { %s1909_s22 = smov 0  }
   0x3 LB: > { %s30_s23 = sadd.s32 1, %s1845_s20  ;;  %s34_s24 = sadd.s32 1, %s1849_s21  ;;  %s1853_s22 = sphi %s1909_s22, %s15_s22   ;;  %s1849_s21 = sphi %s1907_s21, %s2335_s21   ;;  %s1845_s20 = sphi %s1905_s20, %s2334_s20   ;;  %s1841_s19 = sphi %s1903_s19, %s2333_s19   ;;  %s1837_s18 = sphi %s1901_s18, %s2332_s18  }
   0x4   : > { %p32_p0 = scmp.ge.s32.totalorder %s30_s23, 4  ;;  %p1568_p1 = scmp.ge.s32.totalorder %s1853_s22, 1 }
   0x5   : > { %p259_p2 = scmp.lt.s32.totalorder %s1853_s22, 9 }
   0x6   : > { %s2337_s23 = smov (%p32_p0, %s30_s23), 0  ;;  %s2339_s24 = smov (!%p32_p0, %s34_s24), %s1849_s21 }
   0x7   : > { %p260_p3 = pnand %p1568_p1, %p259_p2  ;;  %p36_p4 = scmp.ge.s32.totalorder %s2339_s24, 2 }
   0x8   : > { %p322_p5 = scmp.lt.s32.totalorder (!%p260_p3), %s1837_s18, 3  ;;  %p320_p6 = scmp.lt.s32.totalorder (!%p260_p3), %s1841_s19, 1 }
   0x9   : > { %s2341_s24 = smov (%p36_p4, %s2339_s24), 0  ;;  %263 = sbr.rel (%p260_p3) target bundleno = 576 (0x240), region = 40 }
   0xa   : > { %s1868_s30 = smov (!%p260_p3), 96   ;;  %s2075_s6 = smov (!%p260_p3), 0  }
   0xe   : > { %vm367_vm0 = vcmask 261120   ;;  %v1867_v0 = vmov 0.0   ;;  %s2343_s18 = smov (!%p322_p5, %s1837_s18), 3  ;;  %s2345_s19 = smov (!%p320_p6, %s1841_s19), 1  ;;  %vm639_vm9 = vcmask 130048  }
   0xf   : > { %368 = vst.msk [vmem:[#allocation2] sm:$0xff] %vm367_vm0, %v1867_v0  ;;  %369 = vst.msk [vmem:[#allocation2 + $0x8] sm:$0xff] %vm367_vm0, %v1867_v0  ;;  %s1602_s25 = sshll.u32 %s2343_s18, 5  ;;  %s1603_s26 = sshll.u32 %s2343_s18, 4 }
  0x10   : > { %s337_s29 = scalar_lea.vmem %s2323_s1, %s1602_s25  ;;  %s345_s7 = scalar_lea.vmem %s2325_s3, %s1603_s26 }
  0x11   : > { %s348_s10 = scalar_lea.vmem %s2326_s4, %s2343_s18  ;;  %v389_v1 = vld [vmem:[%s337_s29 + $0x18] sm:$0xff]  ;;  %v1947_v2 = vld [vmem:[%s345_s7] sm:$0xff]  ;;  %v1949_v3 = vld [vmem:[%s345_s7 + $0x8] sm:$0xff]  ;;  %s1569_s11 = sshll.u32 %s2343_s18, 3 }
  0x12   : > { %1643 = vmatprep.subr.mxu0 %v389_v1  ;;  %v1952_v4 = vld [vmem:[%s348_s10] ss:$0 sm:$0xff]  ;;  %1663 = vmatprep.subr.mxu1 %v389_v1  ;;  %v388_v5 = vld [vmem:[%s337_s29 + $0x10] sm:$0xff]  ;;  %s1570_s12 = sshll.u32 %s2345_s19, 5  ;;  %v387_v6 = vld [vmem:[%s337_s29 + $0x8] sm:$0xff] }
  0x13   : > { %1644 = vmatpush3.msra.mxu0 %v389_v1  ;;  %1667 = vmatpush3.msra.mxu1 %v389_v1  ;;  %s329_s13 = sadd.s32 %s1570_s12, %s1569_s11  ;;  %v386_v9 = vld [vmem:[%s337_s29] sm:$0xff]  ;;  %s340_s29 = scalar_lea.vmem %s2324_s2, %s2343_s18 }
  0x14   : > { %1645 = vmatprep.subr.mxu0 %v388_v5  ;;  %1664 = vmatprep.subr.mxu1 %v388_v5  ;;  %s1571_s14 = sshll.u32 %s329_s13, 2  ;;  %v1587_v22 = vld [vmem:[%s340_s29] ss:$0 sm:$0xff]  ;;  %s1869_s18 = smov 80  }
  0x15   : > { %1646 = vmatpush3.msra.mxu0 %v388_v5  ;;  %1668 = vmatpush3.msra.mxu1 %v388_v5  ;;  %s1961_s17 = scalar_lea.vmem %s2322_s0, %s1571_s14  ;;  %s1966_s26 = scalar_lea.vmem %s2327_s5, %s1571_s14 }
  0x16   : > { %v1954_v7 = vld [vmem:[#allocation2] sm:$0xff]   ;;  %v1956_v8 = vld [vmem:[#allocation2 + $0x8] sm:$0xff]   ;;  %1647 = vmatprep.subr.mxu0 %v387_v6  ;;  %1665 = vmatprep.subr.mxu1 %v387_v6  ;;  %v1629_v11 = vld [vmem:[%s1961_s17 + $0x10] sm:$0xff]  }
  0x17   : > { %v1613_v10 = vld [vmem:[%s1961_s17] sm:$0xff]   ;;  %v1628_v12 = vld [vmem:[%s1961_s17 + $0x8] sm:$0xff]   ;;  %1648 = vmatpush3.msra.mxu0 %v387_v6  ;;  %1669 = vmatpush3.msra.mxu1 %v387_v6  ;;  %v1622_v15 = vunpack.c.l.bf16 %v1629_v11  ;;  %v1623_v16 = vunpack.c.h.bf16 %v1629_v11  ;;  %v1630_v17 = vld [vmem:[%s1961_s17 + $0x18] sm:$0xff]  }
  0x18   : > { %v1614_v13 = vunpack.c.l.bf16 %v1613_v10  ;;  %v1615_v14 = vunpack.c.h.bf16 %v1613_v10  ;;  %1649 = vmatprep.subr.mxu0 %v386_v9  ;;  %1666 = vmatprep.subr.mxu1 %v386_v9  ;;  %v1618_v18 = vunpack.c.l.bf16 %v1628_v12  ;;  %v1626_v19 = vunpack.c.l.bf16 %v1630_v17 }
  0x19   : > { %1650 = vmatpush3.msra.mxu0 %v386_v9  ;;  %1670 = vmatpush3.msra.mxu1 %v386_v9  ;;  %v1619_v20 = vunpack.c.h.bf16 %v1628_v12  ;;  %v1627_v21 = vunpack.c.h.bf16 %v1630_v17 }
  0x1a   : > { %1651 = vmatprep.mubr.msk.f32.mxu0 %vm367_vm0, %v1614_v13  ;;  %1657 = vmatprep.mubr.msk.f32.mxu1 %vm367_vm0, %v1622_v15 }
  0x1b   : > { %1652 = vmatmul.mubr.msk.f32.vlgmr.msra.gmra.mxu0 %vm367_vm0, %v1615_v14  ;;  %1658 = vmatmul.mubr.msk.f32.vlgmr.msra.gmra.mxu1 %vm367_vm0, %v1623_v16 }
  0x1c   : > { %1654 = vmatprep.mubr.msk.f32.mxu0 %vm367_vm0, %v1618_v18  ;;  %1660 = vmatprep.mubr.msk.f32.mxu1 %vm367_vm0, %v1626_v19 }
  0x1f   : > { %1655 = vmatmul.mubr.msk.f32.gmra.mxu0 %vm367_vm0, %v1619_v20  ;;  %1661 = vmatmul.mubr.msk.f32.gmra.mxu1 %vm367_vm0, %v1627_v21 }
  0xdb   : > { %v1653_v23 = vpop.f32.mrf.mxu0  ;;  %v1659_v24 = vpop.f32.mrf.mxu1 }
  0xdc   : > { %v1984_v25 = vadd.f32 %v1653_v23, %v1587_v22  ;;  %v1986_v26 = vadd.f32 %v1659_v24, %v1587_v22  ;;  %625 = vrot.lane.b32.xlu1 %v1659_v24, %s1868_s30  ;;  %617 = vrot.lane.b32.xlu0 %v1653_v23, %s1868_s30 }
  0xdd   : > { %v481_v27 = vpop.f32.mrf.mxu0  ;;  %v501_v28 = vpop.f32.mrf.mxu1 }
  0xde   : > { %v544_v29 = vmin.f32 %v1984_v25, 20.0  ;;  %v548_v30 = vmin.f32 %v1986_v26, 20.0  ;;  %v1992_v31 = vadd.f32 %v1587_v22, %v481_v27  ;;  %v1994_v32 = vadd.f32 %v1587_v22, %v501_v28 }
  0xdf   : > { %v1656_v33 = vpop.f32.mrf.mxu0  ;;  %v1996_v34 = vpop.f32.mrf.mxu1  ;;  %vm536_vm1 = vcmp.gt.f32.partialorder %v1984_v25, 20.0  ;;  %vm540_vm2 = vcmp.gt.f32.partialorder %v1986_v26, 20.0 }
  0xe0   : > { %v553_v35 = vmul.f32 1.442695, %v544_v29  ;;  %v561_v36 = vmul.f32 1.442695, %v548_v30  ;;  %v1998_v37 = vadd.f32 %v1656_v33, %v1587_v22  ;;  %v2001_v38 = vadd.f32 %v1996_v34, %v1587_v22  ;;  %650 = vrot.lane.b32.xlu1 %v1653_v23, %s1869_s18  ;;  %615 = vrot.lane.b32.xlu0 %v481_v27, %s1868_s30 }
  0xe1   : > { %v543_v39 = vmin.f32 %v1992_v31, 20.0  ;;  %v547_v40 = vmin.f32 %v1994_v32, 20.0  ;;  %v491_v41 = vpop.f32.mrf.mxu0  ;;  %v511_v42 = vpop.f32.mrf.mxu1  ;;  %vm535_vm3 = vcmp.gt.f32.partialorder %v1992_v31, 20.0  ;;  %vm539_vm4 = vcmp.gt.f32.partialorder %v1994_v32, 20.0 }
  0xe2   : > { %1739 = vpow2.f32 %v553_v35  ;;  %v546_v43 = vmin.f32 %v1998_v37, 20.0  ;;  %v550_v46 = vmin.f32 %v2001_v38, 20.0  ;;  %v2009_v48 = vadd.f32 %v1587_v22, %v491_v41 }
  0xe3   : > { %1741 = vpow2.f32 %v561_v36  ;;  %v551_v44 = vmul.f32 1.442695, %v543_v39  ;;  %v559_v45 = vmul.f32 1.442695, %v547_v40  ;;  %v2011_v49 = vadd.f32 %v1587_v22, %v511_v42 }
  0xe4   : > { %v557_v47 = vmul.f32 1.442695, %v546_v43  ;;  %658 = vrot.lane.b32.xlu1 %v1659_v24, %s1869_s18  ;;  %623 = vrot.lane.b32.xlu0 %v501_v28, %s1868_s30  ;;  %v565_v50 = vmul.f32 1.442695, %v550_v46  ;;  %v545_v51 = vmin.f32 %v2009_v48, 20.0  ;;  %vm538_vm5 = vcmp.gt.f32.partialorder %v1998_v37, 20.0 }
  0xe5   : > { %1743 = vpow2.f32 %v551_v44  ;;  %v549_v52 = vmin.f32 %v2011_v49, 20.0  ;;  %vm542_vm6 = vcmp.gt.f32.partialorder %v2001_v38, 20.0  ;;  %vm537_vm7 = vcmp.gt.f32.partialorder %v2009_v48, 20.0 }
  0xe6   : > { %1745 = vpow2.f32 %v559_v45  ;;  %v555_v53 = vmul.f32 1.442695, %v545_v51  ;;  %vm541_vm8 = vcmp.gt.f32.partialorder %v2011_v49, 20.0 }
  0xe7   : > { %1747 = vpow2.f32 %v557_v47  ;;  %v563_v54 = vmul.f32 1.442695, %v549_v52 }
  0xe8   : > { %1749 = vpow2.f32 %v565_v50  ;;  %648 = vrot.lane.b32.xlu0 %v481_v27, %s1869_s18  ;;  %621 = vrot.lane.b32.xlu1 %v1656_v33, %s1868_s30 }
  0xe9   : > { %1751 = vpow2.f32 %v555_v53 }
  0xea   : > { %1753 = vpow2.f32 %v563_v54 }
  0xec   : > { %656 = vrot.lane.b32.xlu0 %v501_v28, %s1869_s18  ;;  %629 = vrot.lane.b32.xlu1 %v1996_v34, %s1868_s30 }
  0xef   : > { %v1740_v55 = vpop.eup %1739 }
  0xf0   : > { %v1742_v56 = vpop.eup %1741  ;;  %v568_v57 = vadd.f32 1.0, %v1740_v55  ;;  %627 = vrot.lane.b32.xlu0 %v511_v42, %s1868_s30  ;;  %654 = vrot.lane.b32.xlu1 %v1656_v33, %s1869_s18 }
  0xf1   : > { %v572_v58 = vadd.f32 1.0, %v1742_v56 }
  0xf2   : > { %v1744_v59 = vpop.eup %1743  ;;  %1755 = vlog2.f32 %v568_v57 }
  0xf3   : > { %v1746_v60 = vpop.eup %1745  ;;  %1757 = vlog2.f32 %v572_v58  ;;  %v567_v61 = vadd.f32 1.0, %v1744_v59 }
  0xf4   : > { %v1748_v62 = vpop.eup %1747  ;;  %v571_v63 = vadd.f32 1.0, %v1746_v60  ;;  %652 = vrot.lane.b32.xlu0 %v491_v41, %s1869_s18  ;;  %619 = vrot.lane.b32.xlu1 %v491_v41, %s1868_s30 }
  0xf5   : > { %v1750_v0 = vpop.eup %1749  ;;  %1759 = vlog2.f32 %v567_v61  ;;  %v570_v1 = vadd.f32 1.0, %v1748_v62 }
  0xf6   : > { %1761 = vlog2.f32 %v571_v63  ;;  %v574_v5 = vadd.f32 1.0, %v1750_v0  ;;  %v1752_v6 = vpop.eup %1751 }
  0xf7   : > { %1763 = vlog2.f32 %v570_v1  ;;  %v1754_v9 = vpop.eup %1753  ;;  %v569_v10 = vadd.f32 1.0, %v1752_v6 }
  0xf8   : > { %1765 = vlog2.f32 %v574_v5  ;;  %660 = vrot.lane.b32.xlu0 %v511_v42, %s1869_s18  ;;  %662 = vrot.lane.b32.xlu1 %v1996_v34, %s1869_s18  ;;  %v573_v11 = vadd.f32 1.0, %v1754_v9 }
  0xf9   : > { %1767 = vlog2.f32 %v569_v10 }
  0xfa   : > { %1769 = vlog2.f32 %v573_v11 }
  0xff   : > { %v1756_v12 = vpop.eup %1755 }
 0x100   : > { %v1758_v13 = vpop.eup %1757  ;;  %v578_v14 = vmul.f32 0.6931472, %v1756_v12 }
 0x101   : > { %v586_v15 = vmul.f32 0.6931472, %v1758_v13 }
 0x102   : > { %v1760_v16 = vpop.eup %1759  ;;  %v592_v17 = vsel %vm536_vm1, %v1984_v25, %v578_v14 }
 0x103   : > { %v1762_v18 = vpop.eup %1761  ;;  %600 = vst.msk [vmem:[#allocation3 + $0x8] sm:$0xff] %vm367_vm0, %v592_v17  ;;  %v596_v19 = vsel %vm540_vm2, %v1986_v26, %v586_v15  ;;  %v576_v20 = vmul.f32 0.6931472, %v1760_v16 }
 0x104   : > { %v1764_v21 = vpop.eup %1763  ;;  %604 = vst.msk [vmem:[#allocation3 + $0x28] sm:$0xff] %vm367_vm0, %v596_v19  ;;  %v584_v22 = vmul.f32 0.6931472, %v1762_v18 }
 0x105   : > { %v1766_v23 = vpop.eup %1765  ;;  %v591_v24 = vsel %vm535_vm3, %v1992_v31, %v576_v20  ;;  %v582_v25 = vmul.f32 0.6931472, %v1764_v21 }
 0x106   : > { %599 = vst.msk [vmem:[#allocation3] sm:$0xff] %vm367_vm0, %v591_v24  ;;  %v595_v27 = vsel %vm539_vm4, %v1994_v32, %v584_v22  ;;  %v590_v26 = vmul.f32 0.6931472, %v1766_v23  ;;  %v1768_v28 = vpop.eup %1767 }
 0x107   : > { %603 = vst.msk [vmem:[#allocation3 + $0x20] sm:$0xff] %vm367_vm0, %v595_v27  ;;  %v594_v29 = vsel %vm538_vm5, %v1998_v37, %v582_v25  ;;  %v1770_v30 = vpop.eup %1769  ;;  %v580_v33 = vmul.f32 0.6931472, %v1768_v28 }
 0x108   : > { %602 = vst.msk [vmem:[#allocation3 + $0x18] sm:$0xff] %vm367_vm0, %v594_v29  ;;  %v598_v31 = vsel %vm542_vm6, %v2001_v38, %v590_v26  ;;  %v588_v32 = vmul.f32 0.6931472, %v1770_v30 }
 0x109   : > { %606 = vst.msk [vmem:[#allocation3 + $0x38] sm:$0xff] %vm367_vm0, %v598_v31  ;;  %v593_v34 = vsel %vm537_vm7, %v2009_v48, %v580_v33 }
 0x10a   : > { %601 = vst.msk [vmem:[#allocation3 + $0x10] sm:$0xff] %vm367_vm0, %v593_v34  ;;  %v597_v35 = vsel %vm541_vm8, %v2011_v49, %v588_v32 }
 0x10b   : > { %605 = vst.msk [vmem:[#allocation3 + $0x30] sm:$0xff] %vm367_vm0, %v597_v35 }
 0x14e   : > { %v626_v36 = vpop.permute.xlu1 %625  ;;  %v618_v37 = vpop.permute.xlu0 %617 }
 0x14f   : > { %645 = vst.msk [vmem:[#allocation4 + $0x28] sm:$0xff] %vm639_vm9, %v626_v36  ;;  %641 = vst.msk [vmem:[#allocation4 + $0x8] sm:$0xff] %vm639_vm9, %v618_v37 }
 0x152   : > { %v651_v38 = vpop.permute.xlu1 %650  ;;  %v616_v39 = vpop.permute.xlu0 %615 }
 0x153   : > { %673 = vst.msk [vmem:[#allocation5 + $0x8] sm:$0xff] %vm639_vm9, %v651_v38  ;;  %640 = vst.msk [vmem:[#allocation4] sm:$0xff] %vm639_vm9, %v616_v39 }
 0x156   : > { %v659_v40 = vpop.permute.xlu1 %658  ;;  %v624_v41 = vpop.permute.xlu0 %623 }
 0x157   : > { %677 = vst.msk [vmem:[#allocation5 + $0x28] sm:$0xff] %vm639_vm9, %v659_v40  ;;  %644 = vst.msk [vmem:[#allocation4 + $0x20] sm:$0xff] %vm639_vm9, %v624_v41 }
 0x15a   : > { %v649_v42 = vpop.permute.xlu0 %648  ;;  %v622_v43 = vpop.permute.xlu1 %621 }
 0x15b   : > { %672 = vst.msk [vmem:[#allocation5] sm:$0xff] %vm639_vm9, %v649_v42  ;;  %643 = vst.msk [vmem:[#allocation4 + $0x18] sm:$0xff] %vm639_vm9, %v622_v43 }
 0x15e   : > { %v657_v44 = vpop.permute.xlu0 %656  ;;  %v630_v45 = vpop.permute.xlu1 %629 }
 0x15f   : > { %676 = vst.msk [vmem:[#allocation5 + $0x20] sm:$0xff] %vm639_vm9, %v657_v44  ;;  %647 = vst.msk [vmem:[#allocation4 + $0x38] sm:$0xff] %vm639_vm9, %v630_v45 }
 0x162   : > { %v628_v46 = vpop.permute.xlu0 %627  ;;  %v655_v47 = vpop.permute.xlu1 %654 }
 0x163   : > { %646 = vst.msk [vmem:[#allocation4 + $0x30] sm:$0xff] %vm639_vm9, %v628_v46  ;;  %675 = vst.msk [vmem:[#allocation5 + $0x18] sm:$0xff] %vm639_vm9, %v655_v47 }
 0x166   : > { %v653_v48 = vpop.permute.xlu0 %652  ;;  %v620_v49 = vpop.permute.xlu1 %619 }
 0x167   : > { %674 = vst.msk [vmem:[#allocation5 + $0x10] sm:$0xff] %vm639_vm9, %v653_v48  ;;  %642 = vst.msk [vmem:[#allocation4 + $0x10] sm:$0xff] %vm639_vm9, %v620_v49 }
 0x16a   : > { %v661_v50 = vpop.permute.xlu0 %660  ;;  %v663_v51 = vpop.permute.xlu1 %662 }
 0x16b   : > { %678 = vst.msk [vmem:[#allocation5 + $0x30] sm:$0xff] %vm639_vm9, %v661_v50  ;;  %679 = vst.msk [vmem:[#allocation5 + $0x38] sm:$0xff] %vm639_vm9, %v663_v51 }
 0x16c LB: >> { %v711_v52 = vlaneseq  ;;  %s2087_s7 = sshll.u32 %s1865_s6, 3  ;;  %v1870_v54 = vmov 1966171168   ;;  %vm1358_vm10 = vcmask 1041409   ;;  %vm1361_vm11 = vcmask 1042434   ;;  %s690_s6 = sadd.s32 1, %s1865_s6   ;;  %s1865_s6 = sphi %s2075_s6, %s690_s6   ;;  %v1861_v7 = vphi %v1954_v7, %v2331_v7   ;;  %v1857_v8 = vphi %v1956_v8, %v2330_v8  }
 0x16d   : >> { %v709_v55 = vunpack.c.l.s4 %v1870_v54  ;;  %s702_s8 = scalar_lea.vmem [#allocation4], %s2087_s7  ;;  %s694_s9 = sshra.s32 %s2087_s7, 3  ;;  %vm1364_vm12 = vcmask 1043459   ;;  %vm1367_vm13 = vcmask 1044484   ;;  %vm1370_vm14 = vcmask 1045509  }
 0x16e   : >> { %v2089_v53 = vshrl.u32 %v711_v52, 7  ;;  %v2092_v56 = vld [vmem:[%s702_s8] sm:$0xff]  ;;  %s2104_s10 = sshll.u32 %s694_s9, 2  ;;  %s700_s12 = scalar_lea.vmem [#allocation3], %s2087_s7  ;;  %vm1373_vm15 = vcmask 1046534   ;;  %vm1376_vm1 = vcmask 1047559  }
 0x16f   : >> { %v710_v61 = vunpack.c.0.s8 %v709_v55  ;;  %s697_s11 = scalar_lea.vmem %s1961_s17, %s2104_s10  ;;  %v701_v0 = vld [vmem:[%s700_s12] sm:$0xff]  ;;  %s704_s13 = scalar_lea.vmem [#allocation5], %s2087_s7  ;;  %vm1382_vm2 = vcmask 257024  }
 0x170   : >> { %v2095_v57 = vsub.s32 0, %v2089_v53  ;;  %v857_v58 = vsub.s32 1, %v2089_v53  ;;  %v868_v62 = vsub.s32 2, %v2089_v53  ;;  %v2109_v63 = vld [vmem:[%s697_s11] sm:$0xf]  ;;  %v707_v6 = vcombine.high %v701_v0, %v701_v0  ;;  %s1381_s14 = scalar_lea.vmem %s1966_s26, %s2104_s10  ;;  %p687_p7 = scmp.ge.s32.totalorder %s690_s6, 8  }
 0x171   : >> { %v713_v1 = vsub.s32 %v710_v61, %v2089_v53  ;;  %v699_v5 = vunpack.c.l.bf16 %v2109_v63  ;;  %v879_v9 = vsub.s32 3, %v2089_v53  ;;  %v890_v20 = vsub.s32 4, %v2089_v53 }
 0x172   : >> { %v858_v59 = vrot.slane %v2092_v56, %v857_v58  ;;  %v847_v60 = vrot.slane %v2092_v56, %v2095_v57  ;;  %v869_v10 = vrot.slane %v2092_v56, %v868_v62  ;;  %v901_v35 = vsub.s32 5, %v2089_v53 }
 0x173   : >> { %v932_v11 = vmul.f32 %v701_v0, %v699_v5  ;;  %v714_v12 = vrot.slane %v701_v0, %v713_v1  ;;  %v721_v13 = vrot.slane %v707_v6, %v713_v1  ;;  %v880_v18 = vrot.slane %v2092_v56, %v879_v9 }
 0x174   : >> { %860 = vbcast.lane.b32.xlu1 %v858_v59, 256  ;;  %849 = vbcast.lane.b32.xlu0 %v847_v60, 256  ;;  %v891_v34 = vrot.slane %v2092_v56, %v890_v20  ;;  %v912_v39 = vsub.s32 6, %v2089_v53  ;;  %v902_v42 = vrot.slane %v2092_v56, %v901_v35  ;;  %v923_v48 = vsub.s32 7, %v2089_v53 }
 0x175   : >> { %v941_v14 = vrot.slane %v932_v11, %v713_v1  ;;  %v722_v15 = vcombine.high %v714_v12, %v714_v12  ;;  %v730_v16 = vrot.slane %v714_v12, %v713_v1  ;;  %v934_v17 = vcombine.high %v932_v11, %v932_v11 }
 0x176   : >> { %v737_v19 = vrot.slane %v721_v13, %v713_v1  ;;  %v723_v41 = vcombine.high %v721_v13, %v721_v13  ;;  %v913_v45 = vrot.slane %v2092_v56, %v912_v39  ;;  %v924_v0 = vrot.slane %v2092_v56, %v923_v48 }
 0x177   : >> { %v949_v21 = vcombine.high %v941_v14, %v941_v14  ;;  %v744_v22 = vrot.slane %v722_v15, %v713_v1  ;;  %v2125_v23 = vrot.slane %v730_v16, %v2095_v57  ;;  %v957_v24 = vrot.slane %v941_v14, %v713_v1 }
 0x178   : >> { %864 = vbcast.lane.b32.xlu1 %v858_v59, 264  ;;  %853 = vbcast.lane.b32.xlu0 %v847_v60, 264  ;;  %v752_v25 = vcombine.high %v730_v16, %v730_v16  ;;  %v2128_v27 = vrot.slane %v737_v19, %v2095_v57  ;;  %v948_v26 = vrot.slane %v934_v17, %v713_v1 }
 0x179   : >> { %v971_v28 = vrot.slane %v949_v21, %v713_v1  ;;  %v2131_v29 = vrot.slane %v744_v22, %v2095_v57  ;;  %v2134_v30 = vrot.slane %v957_v24, %v2095_v57  ;;  %v979_v33 = vcombine.high %v957_v24, %v957_v24 }
 0x17a   : >> { %v2137_v31 = vrot.slane %v752_v25, %v2095_v57  ;;  %v754_v32 = vcombine.high %v744_v22, %v744_v22  ;;  %v964_v44 = vrot.slane %v948_v26, %v713_v1  ;;  %v751_v47 = vrot.slane %v723_v41, %v713_v1 }
 0x17b   : >> { %v2144_v36 = vrot.slane %v971_v28, %v2095_v57  ;;  %v2147_v37 = vrot.slane %v979_v33, %v2095_v57  ;;  %v981_v40 = vcombine.high %v971_v28, %v971_v28  ;;  %v950_v49 = vcombine.high %v948_v26, %v948_v26 }
 0x17c   : >> { %875 = vbcast.lane.b32.xlu1 %v869_v10, 264  ;;  %871 = vbcast.lane.b32.xlu0 %v869_v10, 256  ;;  %v2150_v38 = vrot.slane %v754_v32, %v2095_v57  ;;  %v2159_v46 = vrot.slane %v964_v44, %v2095_v57  ;;  %v753_v50 = vcombine.high %v737_v19, %v737_v19  ;;  %v705_v10 = vld [vmem:[%s704_s13] sm:$0xff] }
 0x17d   : >> { %v2155_v43 = vrot.slane %v981_v40, %v2095_v57  ;;  %v980_v51 = vcombine.high %v964_v44, %v964_v44  ;;  %v2163_v52 = vrot.slane %v751_v47, %v2095_v57  ;;  %v755_v54 = vcombine.high %v751_v47, %v751_v47 }
 0x17e   : >> { %v978_v55 = vrot.slane %v950_v49, %v713_v1  ;;  %v2166_v59 = vrot.slane %v753_v50, %v2095_v57  ;;  %v1108_v12 = vrot.slane %v705_v10, %v857_v58  ;;  %v1119_v13 = vrot.slane %v705_v10, %v868_v62 }
 0x17f   : >> { %v2169_v60 = vrot.slane %v980_v51, %v2095_v57  ;;  %v2172_v61 = vrot.slane %v755_v54, %v2095_v57  ;;  %v1097_v56 = vrot.slane %v705_v10, %v2095_v57  ;;  %v1130_v14 = vrot.slane %v705_v10, %v879_v9 }
 0x180   : >> { %886 = vbcast.lane.b32.xlu1 %v880_v18, 264  ;;  %882 = vbcast.lane.b32.xlu0 %v880_v18, 256  ;;  %v2176_v6 = vrot.slane %v978_v55, %v2095_v57  ;;  %v982_v11 = vcombine.high %v978_v55, %v978_v55  ;;  %v1141_v15 = vrot.slane %v705_v10, %v890_v20 }
 0x181   : >> { %v1152_v58 = vrot.slane %v705_v10, %v901_v35  ;;  %v1163_v62 = vrot.slane %v705_v10, %v912_v39  ;;  %v1174_v16 = vrot.slane %v705_v10, %v923_v48  ;;  %v797_v17 = vmul.f32 %v2125_v23, %v1949_v3 }
 0x182   : >> { %v2180_v1 = vrot.slane %v982_v11, %v2095_v57  ;;  %v796_v57 = vmul.f32 %v2125_v23, %v1947_v2  ;;  %v798_v53 = vmul.f32 %v2131_v29, %v1947_v2  ;;  %v799_v19 = vmul.f32 %v2131_v29, %v1949_v3 }
 0x183   : >> { %v814_v18 = vmul.f32 1.442695, %v797_v17  ;;  %v800_v21 = vmul.f32 %v2137_v31, %v1947_v2  ;;  %v801_v24 = vmul.f32 %v2137_v31, %v1949_v3  ;;  %v802_v23 = vmul.f32 %v2150_v38, %v1947_v2 }
 0x184   : >> { %897 = vbcast.lane.b32.xlu1 %v891_v34, 264  ;;  %893 = vbcast.lane.b32.xlu0 %v891_v34, 256  ;;  %v812_v9 = vmul.f32 1.442695, %v796_v57  ;;  %v816_v20 = vmul.f32 1.442695, %v798_v53  ;;  %v803_v28 = vmul.f32 %v2150_v38, %v1949_v3  ;;  %v804_v33 = vmul.f32 %v2128_v27, %v1947_v2 }
 0x185   : >> { %v818_v22 = vmul.f32 1.442695, %v799_v19  ;;  %v820_v25 = vmul.f32 1.442695, %v800_v21  ;;  %v822_v26 = vmul.f32 1.442695, %v801_v24  ;;  %v805_v31 = vmul.f32 %v2128_v27, %v1949_v3 }
 0x186   : >> { %1771 = vpow2.f32 %v812_v9  ;;  %v824_v29 = vmul.f32 1.442695, %v802_v23  ;;  %v826_v34 = vmul.f32 1.442695, %v803_v28  ;;  %v828_v35 = vmul.f32 1.442695, %v804_v33 }
 0x187   : >> { %1773 = vpow2.f32 %v814_v18  ;;  %v806_v39 = vmul.f32 %v2163_v52, %v1947_v2  ;;  %v807_v38 = vmul.f32 %v2163_v52, %v1949_v3  ;;  %v808_v47 = vmul.f32 %v2166_v59, %v1947_v2 }
 0x188   : >> { %908 = vbcast.lane.b32.xlu1 %v902_v42, 264  ;;  %904 = vbcast.lane.b32.xlu0 %v902_v42, 256  ;;  %1775 = vpow2.f32 %v816_v20  ;;  %v809_v52 = vmul.f32 %v2166_v59, %v1949_v3  ;;  %v810_v10 = vmul.f32 %v2172_v61, %v1947_v2 }
 0x189   : >> { %1777 = vpow2.f32 %v818_v22  ;;  %v832_v48 = vmul.f32 1.442695, %v806_v39 }
 0x18a   : >> { %1779 = vpow2.f32 %v820_v25  ;;  %v838_v59 = vmul.f32 1.442695, %v809_v52  ;;  %v840_v57 = vmul.f32 1.442695, %v810_v10 }
 0x18b   : >> { %1781 = vpow2.f32 %v822_v26 }
 0x18c   : >> { %919 = vbcast.lane.b32.xlu1 %v913_v45, 264  ;;  %915 = vbcast.lane.b32.xlu0 %v913_v45, 256  ;;  %1783 = vpow2.f32 %v824_v29  ;;  %v830_v45 = vmul.f32 1.442695, %v805_v31 }
 0x18d   : >> { %1785 = vpow2.f32 %v826_v34 }
 0x18e   : >> { %1787 = vpow2.f32 %v828_v35 }
 0x18f   : >> { %1789 = vpow2.f32 %v830_v45 }
 0x190   : >> { %930 = vbcast.lane.b32.xlu1 %v924_v0, 264  ;;  %926 = vbcast.lane.b32.xlu0 %v924_v0, 256  ;;  %v836_v0 = vmul.f32 1.442695, %v808_v47  ;;  %1791 = vpow2.f32 %v832_v48 }
 0x193   : >> { %v1772_v32 = vpop.eup %1771 }
 0x194   : >> { %1114 = vbcast.lane.b32.xlu1 %v1108_v12, 264  ;;  %1110 = vbcast.lane.b32.xlu0 %v1108_v12, 256  ;;  %v1039_v40 = vmul.f32 %v1861_v7, %v1772_v32  ;;  %v1774_v41 = vpop.eup %1773  ;;  %v834_v7 = vmul.f32 1.442695, %v807_v38 }
 0x195   : >> { %v1776_v49 = vpop.eup %1775  ;;  %v1040_v51 = vmul.f32 %v1857_v8, %v1774_v41 }
 0x196   : >> { %v1778_v11 = vpop.eup %1777  ;;  %1793 = vpow2.f32 %v834_v7 }
 0x197   : >> { %v1780_v8 = vpop.eup %1779  ;;  %1795 = vpow2.f32 %v836_v0 }
 0x198   : >> { %1125 = vbcast.lane.b32.xlu1 %v1119_v13, 264  ;;  %1121 = vbcast.lane.b32.xlu0 %v1119_v13, 256  ;;  %v1782_v9 = vpop.eup %1781  ;;  %1797 = vpow2.f32 %v838_v59 }
 0x199   : >> { %v1784_v19 = vpop.eup %1783  ;;  %1799 = vpow2.f32 %v840_v57 }
 0x19c   : >> { %1103 = vbcast.lane.b32.xlu1 %v1097_v56, 264  ;;  %1099 = vbcast.lane.b32.xlu0 %v1097_v56, 256 }
 0x1a0   : >> { %1136 = vbcast.lane.b32.xlu1 %v1130_v14, 264  ;;  %1132 = vbcast.lane.b32.xlu0 %v1130_v14, 256 }
 0x1a4   : >> { %1147 = vbcast.lane.b32.xlu1 %v1141_v15, 264  ;;  %1143 = vbcast.lane.b32.xlu0 %v1141_v15, 256 }
 0x1a8   : >> { %1158 = vbcast.lane.b32.xlu1 %v1152_v58, 264  ;;  %1154 = vbcast.lane.b32.xlu0 %v1152_v58, 256 }
 0x1ac   : >> { %1169 = vbcast.lane.b32.xlu1 %v1163_v62, 264  ;;  %1165 = vbcast.lane.b32.xlu0 %v1163_v62, 256 }
 0x1b0   : >> { %1180 = vbcast.lane.b32.xlu1 %v1174_v16, 264  ;;  %1176 = vbcast.lane.b32.xlu0 %v1174_v16, 256  ;;  %v811_v16 = vmul.f32 %v2172_v61, %v1949_v3  ;;  %v1786_v61 = vpop.eup %1785 }
 0x1b1   : >> { %v1788_v29 = vpop.eup %1787 }
 0x1b2   : >> { %v842_v25 = vmul.f32 1.442695, %v811_v16  ;;  %v1790_v35 = vpop.eup %1789 }
 0x1b3   : >> { %v1792_v41 = vpop.eup %1791 }
 0x1b4   : >> { %1801 = vpow2.f32 %v842_v25  ;;  %v1794_v45 = vpop.eup %1793 }
 0x1b5   : >> { %v1796_v48 = vpop.eup %1795 }
 0x1e6   : >> { %v861_v42 = vpop.permute.xlu1 %860  ;;  %v850_v44 = vpop.permute.xlu0 %849 }
 0x1e7   : >> { %v1023_v27 = vmul.f32 %v2134_v30, %v850_v44  ;;  %v1025_v12 = vmul.f32 %v2144_v36, %v861_v42 }
 0x1e9   : >> { %v1041_v50 = vadd.f32 %v1039_v40, %v1023_v27 }
 0x1ea   : >> { %v865_v54 = vpop.permute.xlu1 %864  ;;  %v854_v55 = vpop.permute.xlu0 %853 }
 0x1eb   : >> { %1043 = vst.msk [vmem:[#allocation6] sm:$0xff] %vm367_vm0, %v1041_v50  ;;  %v1045_v13 = vmul.f32 %v1776_v49, %v1041_v50  ;;  %v1024_v56 = vmul.f32 %v2134_v30, %v854_v55  ;;  %v1026_v17 = vmul.f32 %v2144_v36, %v865_v54  ;;  %v1798_v54 = vpop.eup %1797 }
 0x1ec   : >> { %v1800_v10 = vpop.eup %1799 }
 0x1ed   : >> { %v1042_v14 = vadd.f32 %v1040_v51, %v1024_v56  ;;  %v1047_v15 = vadd.f32 %v1045_v13, %v1025_v12  ;;  %v1802_v59 = vpop.eup %1801 }
 0x1ee   : >> { %v876_v58 = vpop.permute.xlu1 %875  ;;  %v872_v62 = vpop.permute.xlu0 %871 }
 0x1ef   : >> { %1044 = vst.msk [vmem:[#allocation6 + $0x8] sm:$0xff] %vm367_vm0, %v1042_v14  ;;  %v1046_v53 = vmul.f32 %v1778_v11, %v1042_v14  ;;  %v1027_v30 = vmul.f32 %v2147_v37, %v872_v62  ;;  %1050 = vst.msk [vmem:[#allocation6 + $0x10] sm:$0xff] %vm367_vm0, %v1047_v15  ;;  %v1052_v18 = vmul.f32 %v1780_v8, %v1047_v15 }
 0x1f0   : >> { %v1028_v23 = vmul.f32 %v2147_v37, %v876_v58 }
 0x1f1   : >> { %v1048_v20 = vadd.f32 %v1046_v53, %v1026_v17  ;;  %v1054_v21 = vadd.f32 %v1052_v18, %v1027_v30 }
 0x1f2   : >> { %v887_v22 = vpop.permute.xlu1 %886  ;;  %v883_v24 = vpop.permute.xlu0 %882 }
 0x1f3   : >> { %1051 = vst.msk [vmem:[#allocation6 + $0x18] sm:$0xff] %vm367_vm0, %v1048_v20  ;;  %v1053_v36 = vmul.f32 %v1782_v9, %v1048_v20  ;;  %1057 = vst.msk [vmem:[#allocation6 + $0x20] sm:$0xff] %vm367_vm0, %v1054_v21  ;;  %v1029_v26 = vmul.f32 %v2155_v43, %v883_v24  ;;  %v1059_v28 = vmul.f32 %v1784_v19, %v1054_v21 }
 0x1f4   : >> { %v1030_v39 = vmul.f32 %v2155_v43, %v887_v22 }
 0x1f5   : >> { %v1055_v33 = vadd.f32 %v1053_v36, %v1028_v23  ;;  %v1061_v32 = vadd.f32 %v1059_v28, %v1029_v26 }
 0x1f6   : >> { %v898_v34 = vpop.permute.xlu1 %897  ;;  %v894_v31 = vpop.permute.xlu0 %893  ;;  %v1184_v18 = vld [vmem:[#allocation6 + $0x10] sm:$0xff] }
 0x1f7   : >> { %1058 = vst.msk [vmem:[#allocation6 + $0x28] sm:$0xff] %vm367_vm0, %v1055_v33  ;;  %v1060_v37 = vmul.f32 %v1786_v61, %v1055_v33  ;;  %1064 = vst.msk [vmem:[#allocation6 + $0x30] sm:$0xff] %vm367_vm0, %v1061_v32  ;;  %v1031_v40 = vmul.f32 %v2159_v46, %v894_v31  ;;  %v1066_v38 = vmul.f32 %v1788_v29, %v1061_v32 }
 0x1f8   : >> { %v1032_v49 = vmul.f32 %v2159_v46, %v898_v34 }
 0x1f9   : >> { %v1062_v42 = vadd.f32 %v1060_v37, %v1030_v39  ;;  %v1068_v44 = vadd.f32 %v1066_v38, %v1031_v40  ;;  %v1183_v39 = vld [vmem:[#allocation6 + $0x8] sm:$0xff]  ;;  %v1182_v40 = vld [vmem:[#allocation6] sm:$0xff] }
 0x1fa   : >> { %v909_v47 = vpop.permute.xlu1 %908  ;;  %v905_v27 = vpop.permute.xlu0 %904  ;;  %v1185_v53 = vld [vmem:[#allocation6 + $0x18] sm:$0xff]  ;;  %v1186_v28 = vld [vmem:[#allocation6 + $0x20] sm:$0xff] }
 0x1fb   : >> { %1065 = vst.msk [vmem:[#allocation6 + $0x38] sm:$0xff] %vm367_vm0, %v1062_v42  ;;  %v1067_v50 = vmul.f32 %v1790_v35, %v1062_v42  ;;  %1071 = vst.msk [vmem:[#allocation6 + $0x40] sm:$0xff] %vm367_vm0, %v1068_v44  ;;  %v1033_v43 = vmul.f32 %v2176_v6, %v905_v27  ;;  %v1073_v51 = vmul.f32 %v1792_v41, %v1068_v44 }
 0x1fc   : >> { %v1034_v11 = vmul.f32 %v2176_v6, %v909_v47 }
 0x1fd   : >> { %v1069_v7 = vadd.f32 %v1067_v50, %v1032_v49  ;;  %v1075_v52 = vadd.f32 %v1073_v51, %v1033_v43 }
 0x1fe   : >> { %v920_v55 = vpop.permute.xlu1 %919  ;;  %v916_v0 = vpop.permute.xlu0 %915  ;;  %v1187_v36 = vld [vmem:[#allocation6 + $0x28] sm:$0xff]  ;;  %v1188_v43 = vld [vmem:[#allocation6 + $0x30] sm:$0xff] }
 0x1ff   : >> { %1072 = vst.msk [vmem:[#allocation6 + $0x48] sm:$0xff] %vm367_vm0, %v1069_v7  ;;  %v1074_v12 = vmul.f32 %v1794_v45, %v1069_v7  ;;  %1078 = vst.msk [vmem:[#allocation6 + $0x50] sm:$0xff] %vm367_vm0, %v1075_v52  ;;  %v1035_v46 = vmul.f32 %v2169_v60, %v916_v0  ;;  %v1080_v13 = vmul.f32 %v1796_v48, %v1075_v52 }
 0x200   : >> { %v1036_v58 = vmul.f32 %v2169_v60, %v920_v55 }
 0x201   : >> { %v1076_v56 = vadd.f32 %v1074_v12, %v1034_v11  ;;  %v1082_v8 = vadd.f32 %v1080_v13, %v1035_v46 }
 0x202   : >> { %v931_v14 = vpop.permute.xlu1 %930  ;;  %v927_v15 = vpop.permute.xlu0 %926  ;;  %v1189_v49 = vld [vmem:[#allocation6 + $0x38] sm:$0xff] }
 0x203   : >> { %1079 = vst.msk [vmem:[#allocation6 + $0x58] sm:$0xff] %vm367_vm0, %v1076_v56  ;;  %v1081_v62 = vmul.f32 %v1798_v54, %v1076_v56  ;;  %1085 = vst.msk [vmem:[#allocation6 + $0x60] sm:$0xff] %vm367_vm0, %v1082_v8  ;;  %v1037_v6 = vmul.f32 %v2180_v1, %v927_v15  ;;  %v1087_v16 = vmul.f32 %v1800_v10, %v1082_v8 }
 0x204   : >> { %v1038_v19 = vmul.f32 %v2180_v1, %v931_v14 }
 0x205   : >> { %v1083_v57 = vadd.f32 %v1081_v62, %v1036_v58  ;;  %v2253_v7 = vadd.f32 %v1087_v16, %v1037_v6  }
 0x206   : >> { %v1115_v17 = vpop.permute.xlu1 %1114  ;;  %v1111_v30 = vpop.permute.xlu0 %1110  ;;  %v1191_v13 = vld [vmem:[#allocation6 + $0x48] sm:$0xff] }
 0x207   : >> { %v2328_v9 = vmov %v2253_v7  ;;  %1086 = vst.msk [vmem:[#allocation6 + $0x68] sm:$0xff] %vm367_vm0, %v1083_v57  ;;  %v1088_v20 = vmul.f32 %v1802_v59, %v1083_v57  ;;  %v1201_v60 = vmul.f32 %v1185_v53, %v1115_v17  ;;  %v1200_v21 = vmul.f32 %v1184_v18, %v1111_v30 }
 0x208   : >> { %1092 = vst.msk [vmem:[#allocation6 + $0x70] sm:$0xff] %vm367_vm0, %v2328_v9  ;;  %v2276_v57 = vmul.f32 %v1952_v4, %v699_v5  ;;  %1384 = vst.msk [vmem:[#allocation2] sm:$0xff] (%p687_p7), %vm367_vm0, %v2328_v9 }
 0x209   : >> { %v2259_v8 = vadd.f32 %v1088_v20, %v1038_v19   ;;  %v1224_v24 = vsel %vm367_vm0, %v1201_v60, 0.0  ;;  %v1223_v25 = vsel %vm367_vm0, %v1200_v21, 0.0  ;;  %v1192_v20 = vld [vmem:[#allocation6 + $0x50] sm:$0xff] }
 0x20a   : >> { %v1225_v61 = vadd.f32 %v1224_v24, %v1223_v25  ;;  %v1126_v23 = vpop.permute.xlu1 %1125  ;;  %v1122_v26 = vpop.permute.xlu0 %1121  ;;  %v1193_v18 = vld [vmem:[#allocation6 + $0x58] sm:$0xff]  ;;  %v1294_v5 = vrot.slane %v2276_v57, 1 }
 0x20b   : >> { %v2329_v22 = vmov %v2259_v8  ;;  %v1203_v1 = vmul.f32 %v1187_v36, %v1126_v23  ;;  %v1202_v29 = vmul.f32 %v1186_v28, %v1122_v26  ;;  %v1190_v8 = vld [vmem:[#allocation6 + $0x40] sm:$0xff] }
 0x20c   : >> { %1093 = vst.msk [vmem:[#allocation6 + $0x78] sm:$0xff] %vm367_vm0, %v2329_v22  ;;  %v1226_v34 = vrot.slane %v1225_v61, 4  ;;  %1385 = vst.msk [vmem:[#allocation2 + $0x8] sm:$0xff] (%p687_p7), %vm367_vm0, %v2329_v22 }
 0x20d   : >> { %v1233_v33 = vsel %vm367_vm0, %v1203_v1, 0.0  ;;  %v1232_v32 = vsel %vm367_vm0, %v1202_v29, 0.0 }
 0x20e   : >> { %v1234_v31 = vadd.f32 %v1233_v33, %v1232_v32  ;;  %v1104_v35 = vpop.permute.xlu1 %1103  ;;  %v1100_v37 = vpop.permute.xlu0 %1099  ;;  %v1227_v47 = vadd.f32 %v1226_v34, %v1225_v61  ;;  %v1195_v33 = vld [vmem:[#allocation6 + $0x68] sm:$0xff]  ;;  %v1194_v34 = vld [vmem:[#allocation6 + $0x60] sm:$0xff] }
 0x20f   : >> { %v1199_v38 = vmul.f32 %v1183_v39, %v1104_v35  ;;  %v1198_v41 = vmul.f32 %v1182_v40, %v1100_v37 }
 0x210   : >> { %v1235_v42 = vrot.slane %v1234_v31, 4  ;;  %v1228_v10 = vrot.slane %v1227_v47, 2 }
 0x211   : >> { %v1215_v44 = vsel %vm367_vm0, %v1199_v38, 0.0  ;;  %v1214_v45 = vsel %vm367_vm0, %v1198_v41, 0.0  ;;  %v1295_v38 = vrot.slane %v2276_v57, 2 }
 0x212   : >> { %v1216_v27 = vadd.f32 %v1215_v44, %v1214_v45  ;;  %v1137_v48 = vpop.permute.xlu1 %1136  ;;  %v1133_v50 = vpop.permute.xlu0 %1132  ;;  %v1236_v52 = vadd.f32 %v1235_v42, %v1234_v31  ;;  %v1229_v17 = vadd.f32 %v1228_v10, %v1227_v47 }
 0x213   : >> { %v1205_v51 = vmul.f32 %v1189_v49, %v1137_v48  ;;  %v1204_v7 = vmul.f32 %v1188_v43, %v1133_v50  ;;  %v1296_v49 = vrot.slane %v2276_v57, 3  ;;  %v1297_v50 = vrot.slane %v2276_v57, 4 }
 0x214   : >> { %v1217_v54 = vrot.slane %v1216_v27, 4  ;;  %v1237_v59 = vrot.slane %v1236_v52, 2  ;;  %v1230_v28 = vrot.slane %v1229_v17, 1 }
 0x215   : >> { %v1242_v55 = vsel %vm367_vm0, %v1205_v51, 0.0  ;;  %v1241_v0 = vsel %vm367_vm0, %v1204_v7, 0.0  ;;  %v1197_v7 = vld [vmem:[#allocation6 + $0x78] sm:$0xff] }
 0x216   : >> { %v1218_v11 = vadd.f32 %v1217_v54, %v1216_v27  ;;  %v1243_v12 = vadd.f32 %v1242_v55, %v1241_v0  ;;  %v1148_v46 = vpop.permute.xlu1 %1147  ;;  %v1144_v56 = vpop.permute.xlu0 %1143  ;;  %v1238_v25 = vadd.f32 %v1237_v59, %v1236_v52  ;;  %v1231_v48 = vadd.f32 %v1230_v28, %v1229_v17  ;;  %v1196_v54 = vld [vmem:[#allocation6 + $0x70] sm:$0xff] }
 0x217   : >> { %v1207_v14 = vmul.f32 %v1191_v13, %v1148_v46  ;;  %v1206_v15 = vmul.f32 %v1190_v8, %v1144_v56 }
 0x218   : >> { %v1219_v58 = vrot.slane %v1218_v11, 2  ;;  %v1244_v62 = vrot.slane %v1243_v12, 4  ;;  %v1239_v40 = vrot.slane %v1238_v25, 1 }
 0x219   : >> { %v1251_v6 = vsel %vm367_vm0, %v1207_v14, 0.0  ;;  %v1250_v16 = vsel %vm367_vm0, %v1206_v15, 0.0 }
 0x21a   : >> { %v1245_v53 = vadd.f32 %v1244_v62, %v1243_v12  ;;  %v1159_v30 = vpop.permute.xlu1 %1158  ;;  %v1155_v19 = vpop.permute.xlu0 %1154  ;;  %v1252_v60 = vadd.f32 %v1251_v6, %v1250_v16  ;;  %v1220_v61 = vadd.f32 %v1219_v58, %v1218_v11  ;;  %v1240_v12 = vadd.f32 %v1239_v40, %v1238_v25 }
 0x21b   : >> { %v1209_v21 = vmul.f32 %v1193_v18, %v1159_v30  ;;  %v1208_v24 = vmul.f32 %v1192_v20, %v1155_v19  ;;  %v1310_v58 = vadd.f32 %v1294_v5, %v1231_v48 }
 0x21c   : >> { %v1246_v23 = vrot.slane %v1245_v53, 2  ;;  %v1253_v36 = vrot.slane %v1252_v60, 4  ;;  %v1221_v41 = vrot.slane %v1220_v61, 1  ;;  %v1311_v20 = vadd.f32 %v1295_v38, %v1240_v12 }
 0x21d   : >> { %v1260_v26 = vsel %vm367_vm0, %v1209_v21, 0.0  ;;  %v1259_v63 = vsel %vm367_vm0, %v1208_v24, 0.0  ;;  %v1298_v24 = vrot.slane %v2276_v57, 5  ;;  %v1605_v25 = vpack.c.bf16 %v1310_v58, %v1310_v58 }
 0x21e   : >> { %v1247_v1 = vadd.f32 %v1246_v23, %v1245_v53  ;;  %v1170_v29 = vpop.permute.xlu1 %1169  ;;  %v1166_v32 = vpop.permute.xlu0 %1165  ;;  %v1254_v31 = vadd.f32 %v1253_v36, %v1252_v60  ;;  %v1261_v35 = vadd.f32 %v1260_v26, %v1259_v63  ;;  %v1222_v46 = vadd.f32 %v1221_v41, %v1220_v61 }
 0x21f   : >> { %v1211_v39 = vmul.f32 %v1195_v33, %v1170_v29  ;;  %v1210_v37 = vmul.f32 %v1194_v34, %v1166_v32  ;;  %v1299_v26 = vrot.slane %v2276_v57, 6  ;;  %v1606_v29 = vpack.c.bf16 %v1311_v20, %v1311_v20 }
 0x220   : >> { %v1248_v42 = vrot.slane %v1247_v1, 1  ;;  %v1255_v44 = vrot.slane %v1254_v31, 2  ;;  %v1262_v45 = vrot.slane %v1261_v35, 4  ;;  %v1309_v53 = vadd.f32 %v2276_v57, %v1222_v46 }
 0x221   : >> { %v1269_v47 = vsel %vm367_vm0, %v1211_v39, 0.0  ;;  %v1268_v27 = vsel %vm367_vm0, %v1210_v37, 0.0  ;;  %v1350_v34 = vunpack.c.l.b16 %v1605_v25  ;;  %v1300_v37 = vrot.slane %v2276_v57, 7 }
 0x222   : >> { %v1270_v43 = vadd.f32 %v1269_v47, %v1268_v27  ;;  %v1181_v51 = vpop.permute.xlu1 %1180  ;;  %v1177_v52 = vpop.permute.xlu0 %1176  ;;  %v1256_v55 = vadd.f32 %v1255_v44, %v1254_v31  ;;  %v1263_v0 = vadd.f32 %v1262_v45, %v1261_v35  ;;  %v1249_v13 = vadd.f32 %v1248_v42, %v1247_v1 }
 0x223   : >> { %v1213_v10 = vmul.f32 %v1197_v7, %v1181_v51  ;;  %v1212_v11 = vmul.f32 %v1196_v54, %v1177_v52  ;;  %v1604_v63 = vpack.c.bf16 %v1309_v53, %v1309_v53  ;;  %v1351_v44 = vunpack.c.l.b16 %v1606_v29 }
 0x224   : >> { %v1271_v56 = vrot.slane %v1270_v43, 4  ;;  %v1257_v8 = vrot.slane %v1256_v55, 1  ;;  %v1264_v14 = vrot.slane %v1263_v0, 2  ;;  %v1312_v30 = vadd.f32 %v1296_v49, %v1249_v13 }
 0x225   : >> { %v1278_v15 = vsel %vm367_vm0, %v1213_v10, 0.0  ;;  %v1277_v59 = vsel %vm367_vm0, %v1212_v11, 0.0  ;;  %v1349_v40 = vunpack.c.l.b16 %v1604_v63  ;;  %v1357_v47 = vrot.slane %v1350_v34, 7 }
 0x226   : >> { %v1272_v62 = vadd.f32 %v1271_v56, %v1270_v43  ;;  %v1279_v6 = vadd.f32 %v1278_v15, %v1277_v59  ;;  %v1258_v16 = vadd.f32 %v1257_v8, %v1256_v55  ;;  %v1265_v17 = vadd.f32 %v1264_v14, %v1263_v0 }
 0x227   : >> { %v1607_v28 = vpack.c.bf16 %v1312_v30, %v1312_v30  ;;  %v1360_v52 = vrot.slane %v1351_v44, 6 }
 0x228   : >> { %v1273_v18 = vrot.slane %v1272_v62, 2  ;;  %v1280_v19 = vrot.slane %v1279_v6, 4  ;;  %v1313_v60 = vadd.f32 %v1297_v50, %v1258_v16  ;;  %v1266_v21 = vrot.slane %v1265_v17, 1 }
 0x229   : >> { %v1352_v38 = vunpack.c.l.b16 %v1607_v28  ;;  %v1359_v50 = vsel %vm1358_vm10, %v1357_v47, %v1349_v40 }
 0x22a   : >> { %v1274_v61 = vadd.f32 %v1273_v18, %v1272_v62  ;;  %v1281_v23 = vadd.f32 %v1280_v19, %v1279_v6  ;;  %v1267_v36 = vadd.f32 %v1266_v21, %v1265_v17  ;;  %v1608_v33 = vpack.c.bf16 %v1313_v60, %v1313_v60 }
 0x22b   : >> { %v1363_v43 = vrot.slane %v1352_v38, 5  ;;  %v1362_v0 = vsel %vm1361_vm11, %v1360_v52, %v1359_v50 }
 0x22c   : >> { %v1275_v5 = vrot.slane %v1274_v61, 1  ;;  %v1282_v1 = vrot.slane %v1281_v23, 2  ;;  %v1314_v32 = vadd.f32 %v1298_v24, %v1267_v36  ;;  %v1353_v45 = vunpack.c.l.b16 %v1608_v33 }
 0x22d   : >> { %v1365_v11 = vsel %vm1364_vm12, %v1363_v43, %v1362_v0 }
 0x22e   : >> { %v1276_v31 = vadd.f32 %v1275_v5, %v1274_v61  ;;  %v1283_v35 = vadd.f32 %v1282_v1, %v1281_v23  ;;  %v1609_v39 = vpack.c.bf16 %v1314_v32, %v1314_v32  ;;  %v1366_v57 = vrot.slane %v1353_v45, 4 }
 0x230   : >> { %v1315_v41 = vadd.f32 %v1299_v26, %v1276_v31  ;;  %v1284_v42 = vrot.slane %v1283_v35, 1  ;;  %v1354_v27 = vunpack.c.l.b16 %v1609_v39  ;;  %v1368_v46 = vsel %vm1367_vm13, %v1366_v57, %v1365_v11 }
 0x232   : >> { %v1610_v48 = vpack.c.bf16 %v1315_v41, %v1315_v41  ;;  %v1285_v49 = vadd.f32 %v1284_v42, %v1283_v35  ;;  %v1369_v54 = vrot.slane %v1354_v27, 3 }
 0x234   : >> { %v1355_v51 = vunpack.c.l.b16 %v1610_v48  ;;  %v1316_v7 = vadd.f32 %v1300_v37, %v1285_v49  ;;  %v1371_v13 = vsel %vm1370_vm14, %v1369_v54, %v1368_v46 }
 0x236   : >> { %v1611_v55 = vpack.c.bf16 %v1316_v7, %v1316_v7  ;;  %v1372_v10 = vrot.slane %v1355_v51, 2  ;;  %v2331_v7 = vmov %v2328_v9 }
 0x238   : >> { %v1356_v12 = vunpack.c.l.b16 %v1611_v55  ;;  %v1374_v8 = vsel %vm1373_vm15, %v1372_v10, %v1371_v13 }
 0x23a   : >> { %v1375_v56 = vrot.slane %v1356_v12, 1 }
 0x23b   : > { %689 = sbr.rel (!%p687_p7) target bundleno = 364 (0x16c), region = 105 }
 0x23c   : >> { %v1377_v14 = vsel %vm1376_vm1, %v1375_v56, %v1374_v8  ;;  %v2330_v8 = vmov %v2329_v22 }
 0x23d   : >> { %v1378_v15 = vpack.c.b16 %v1377_v14, %v1377_v14 }
 0x23f   : >> { %1383 = vst.msk [vmem:[%s1381_s14] sm:$0xf] %vm1382_vm2, %v1378_v15 }
 0x240 PF: > { %s15_s22 = sadd.s32 1, %s1853_s22   ;;  %s2332_s18 = smov %s1845_s20 }
 0x241   : > { %p12_p8 = scmp.ge.s32.totalorder %s15_s22, 10   ;;  %s2333_s19 = smov %s1849_s21 }
 0x242   : > { %s2334_s20 = smov %s2337_s23  ;;  %s2335_s21 = smov %s2341_s24 }
 0x243   :  { %14 = sbr.rel (!%p12_p8) target bundleno = 3 (0x3), region = 116 }

// kernel: _lambda_.11
= control target key start
LH: loop header
LB: loop body
LE: loop exit
PB: predicated region body
PF: predicated region fallthrough
CT: control target
= control target key end

     0   :  { %vm55_vm0 = vcmask 261120   ;;  %s1689_s0 = inlined_call_operand.vmem [shape: bf16[128,32], index: 0, kind: input, shape index: {}]   ;;  %s1690_s4 = inlined_call_operand.vmem [shape: f32[32,16], index: 4, kind: input, shape index: {}]   ;;  %s1691_s1 = inlined_call_operand.vmem [shape: bf16[128,32], index: 1, kind: input, shape index: {}]   ;;  %s1692_s2 = inlined_call_operand.vmem [shape: f32[1,32], index: 2, kind: input, shape index: {}]   ;;  %s1693_s3 = inlined_call_operand.vmem [shape: f32[1,32], index: 3, kind: input, shape index: {}]   ;;  %s1694_s5 = inlined_call_operand.vmem [shape: f32[128,16], index: 5, kind: input, shape index: {}]   ;;  %s1695_s6 = inlined_call_operand.vmem [shape: f32[128,16], index: 6, kind: output, shape index: {}]  }
   0x1   :  { %v1059_v0 = vld [vmem:[%s1689_s0] sm:$0xff]   ;;  %v1073_v6 = vld [vmem:[%s1689_s0 + $0x8] sm:$0xff]   ;;  %v1101_v18 = vld [vmem:[%s1689_s0 + $0x10] sm:$0xff]  }
   0x2   :  { %v1064_v1 = vld [vmem:[%s1689_s0 + $0x20] sm:$0xff]   ;;  %v789_v2 = vunpack.c.l.bf16 %v1059_v0  ;;  %v790_v3 = vunpack.c.h.bf16 %v1059_v0  ;;  %v1078_v7 = vld [vmem:[%s1689_s0 + $0x28] sm:$0xff]   ;;  %v793_v12 = vunpack.c.l.bf16 %v1073_v6  ;;  %v794_v16 = vunpack.c.h.bf16 %v1073_v6  ;;  %v1106_v19 = vld [vmem:[%s1689_s0 + $0x30] sm:$0xff]  }
   0x3   :  { %v805_v4 = vunpack.c.l.bf16 %v1064_v1  ;;  %v806_v5 = vunpack.c.h.bf16 %v1064_v1  ;;  %v809_v13 = vunpack.c.l.bf16 %v1078_v7  ;;  %v810_v17 = vunpack.c.h.bf16 %v1078_v7  ;;  %v1127_v28 = vld [vmem:[%s1689_s0 + $0x18] sm:$0xff]  }
   0x4   :  { %v56_v8 = vsel %vm55_vm0, %v789_v2, 0.0  ;;  %v59_v9 = vsel %vm55_vm0, %v790_v3, 0.0  ;;  %v62_v14 = vsel %vm55_vm0, %v793_v12, 0.0  ;;  %v65_v20 = vsel %vm55_vm0, %v794_v16, 0.0  ;;  %v1132_v29 = vld [vmem:[%s1689_s0 + $0x38] sm:$0xff]  }
   0x5   :  { %57 = vadd.xlane.f32.xlu0 %v56_v8  ;;  %60 = vadd.xlane.f32.xlu1 %v59_v9  ;;  %v80_v10 = vsel %vm55_vm0, %v805_v4, 0.0  ;;  %v83_v11 = vsel %vm55_vm0, %v806_v5, 0.0  ;;  %v86_v15 = vsel %vm55_vm0, %v809_v13, 0.0  ;;  %v89_v21 = vsel %vm55_vm0, %v810_v17, 0.0 }
   0x6   :  { %v797_v22 = vunpack.c.l.bf16 %v1101_v18  ;;  %v813_v23 = vunpack.c.l.bf16 %v1106_v19  ;;  %v798_v26 = vunpack.c.h.bf16 %v1101_v18  ;;  %v814_v27 = vunpack.c.h.bf16 %v1106_v19 }
   0x7   :  { %v801_v32 = vunpack.c.l.bf16 %v1127_v28  ;;  %v817_v33 = vunpack.c.l.bf16 %v1132_v29  ;;  %v802_v36 = vunpack.c.h.bf16 %v1127_v28  ;;  %v818_v37 = vunpack.c.h.bf16 %v1132_v29 }
   0x8   :  { %v68_v24 = vsel %vm55_vm0, %v797_v22, 0.0  ;;  %v92_v25 = vsel %vm55_vm0, %v813_v23, 0.0  ;;  %v71_v30 = vsel %vm55_vm0, %v798_v26, 0.0  ;;  %v95_v31 = vsel %vm55_vm0, %v814_v27, 0.0 }
   0x9   :  { %81 = vadd.xlane.f32.xlu0 %v80_v10  ;;  %84 = vadd.xlane.f32.xlu1 %v83_v11  ;;  %v74_v34 = vsel %vm55_vm0, %v801_v32, 0.0  ;;  %v98_v35 = vsel %vm55_vm0, %v817_v33, 0.0  ;;  %v77_v38 = vsel %vm55_vm0, %v802_v36, 0.0  ;;  %v101_v39 = vsel %vm55_vm0, %v818_v37, 0.0 }
   0xd   :  { %63 = vadd.xlane.f32.xlu0 %v62_v14  ;;  %87 = vadd.xlane.f32.xlu1 %v86_v15 }
  0x11   :  { %66 = vadd.xlane.f32.xlu0 %v65_v20  ;;  %90 = vadd.xlane.f32.xlu1 %v89_v21 }
  0x15   :  { %69 = vadd.xlane.f32.xlu0 %v68_v24  ;;  %93 = vadd.xlane.f32.xlu1 %v92_v25 }
  0x19   :  { %72 = vadd.xlane.f32.xlu0 %v71_v30  ;;  %96 = vadd.xlane.f32.xlu1 %v95_v31 }
  0x1d   :  { %75 = vadd.xlane.f32.xlu0 %v74_v34  ;;  %99 = vadd.xlane.f32.xlu1 %v98_v35 }
  0x21   :  { %78 = vadd.xlane.f32.xlu0 %v77_v38  ;;  %102 = vadd.xlane.f32.xlu1 %v101_v39 }
  0x8e   :  { %v58_v40 = vpop.xlane.xlu0 %57  ;;  %v61_v41 = vpop.xlane.xlu1 %60 }
  0x8f   :  { %v105_v42 = vmul.f32 0.03125, %v58_v40  ;;  %v106_v43 = vmul.f32 0.03125, %v61_v41 }
  0x91   :  { %v1156_v44 = vsub.f32 %v789_v2, %v105_v42  ;;  %v1158_v45 = vsub.f32 %v790_v3, %v106_v43 }
  0x92   :  { %v82_v46 = vpop.xlane.xlu0 %81  ;;  %v85_v47 = vpop.xlane.xlu1 %84 }
  0x93   :  { %v113_v48 = vmul.f32 0.03125, %v82_v46  ;;  %v114_v49 = vmul.f32 0.03125, %v85_v47  ;;  %v137_v50 = vmul.f32 %v1156_v44, %v1156_v44  ;;  %v138_v51 = vmul.f32 %v1158_v45, %v1158_v45 }
  0x95   :  { %v1166_v52 = vsub.f32 %v805_v4, %v113_v48  ;;  %v1170_v53 = vsub.f32 %v806_v5, %v114_v49  ;;  %v153_v54 = vsel %vm55_vm0, %v137_v50, 0.0  ;;  %v156_v57 = vsel %vm55_vm0, %v138_v51, 0.0 }
  0x96   :  { %154 = vadd.xlane.f32.xlu0 %v153_v54  ;;  %v64_v55 = vpop.xlane.xlu0 %63  ;;  %v88_v56 = vpop.xlane.xlu1 %87 }
  0x97   :  { %v107_v58 = vmul.f32 0.03125, %v64_v55  ;;  %v115_v59 = vmul.f32 0.03125, %v88_v56  ;;  %v145_v60 = vmul.f32 %v1166_v52, %v1166_v52  ;;  %v146_v61 = vmul.f32 %v1170_v53, %v1170_v53 }
  0x99   :  { %v1180_v62 = vsub.f32 %v793_v12, %v107_v58  ;;  %v1184_v63 = vsub.f32 %v809_v13, %v115_v59  ;;  %v177_v0 = vsel %vm55_vm0, %v145_v60, 0.0  ;;  %v180_v3 = vsel %vm55_vm0, %v146_v61, 0.0 }
  0x9a   :  { %157 = vadd.xlane.f32.xlu0 %v156_v57  ;;  %178 = vadd.xlane.f32.xlu1 %v177_v0  ;;  %v67_v1 = vpop.xlane.xlu0 %66  ;;  %v91_v2 = vpop.xlane.xlu1 %90  ;;  %v520_v0 = vld [vmem:[%s1690_s4 + $0x8] sm:$0xff] }
  0x9b   :  { %v108_v4 = vmul.f32 0.03125, %v67_v1  ;;  %v116_v5 = vmul.f32 0.03125, %v91_v2  ;;  %v139_v8 = vmul.f32 %v1180_v62, %v1180_v62  ;;  %v147_v9 = vmul.f32 %v1184_v63, %v1184_v63  ;;  %v519_v1 = vld [vmem:[%s1690_s4] sm:$0xff] }
  0x9c   :  { %v820_v2 = vld [vmem:[%s1691_s1] sm:$0xff]  }
  0x9d   :  { %v1194_v10 = vsub.f32 %v794_v16, %v108_v4  ;;  %v1198_v11 = vsub.f32 %v810_v17, %v116_v5  ;;  %v159_v12 = vsel %vm55_vm0, %v139_v8, 0.0  ;;  %v183_v15 = vsel %vm55_vm0, %v147_v9, 0.0  ;;  %v861_v4 = vld [vmem:[%s1691_s1 + $0x20] sm:$0xff]  }
  0x9e   :  { %181 = vadd.xlane.f32.xlu1 %v180_v3  ;;  %160 = vadd.xlane.f32.xlu0 %v159_v12  ;;  %v70_v13 = vpop.xlane.xlu0 %69  ;;  %v94_v14 = vpop.xlane.xlu1 %93  ;;  %v1279_v3 = vunpack.c.l.bf16 %v820_v2  ;;  %v1284_v5 = vunpack.c.h.bf16 %v820_v2  ;;  %v1287_v9 = vunpack.c.l.bf16 %v861_v4  ;;  %v858_v12 = vld [vmem:[%s1691_s1 + $0x8] sm:$0xff]  }
  0x9f   :  { %v109_v20 = vmul.f32 0.03125, %v70_v13  ;;  %v117_v21 = vmul.f32 0.03125, %v94_v14  ;;  %v140_v24 = vmul.f32 %v1194_v10, %v1194_v10  ;;  %v148_v6 = vmul.f32 %v1198_v11, %v1198_v11 }
  0xa0   :  { %v343_v8 = vand.u32 2147483647, %v1279_v3  ;;  %v1292_v13 = vunpack.c.h.bf16 %v861_v4  ;;  %v344_v14 = vand.u32 2147483647, %v1284_v5  ;;  %vm407_vm1 = vcmp.ge.f32.partialorder %v1279_v3, 0.0 }
  0xa1   :  { %v1208_v7 = vsub.f32 %v797_v22, %v109_v20  ;;  %v1212_v16 = vsub.f32 %v813_v23, %v117_v21  ;;  %v162_v17 = vsel %vm55_vm0, %v140_v24, 0.0  ;;  %v186_v31 = vsel %vm55_vm0, %v148_v6, 0.0 }
  0xa2   :  { %184 = vadd.xlane.f32.xlu1 %v183_v15  ;;  %163 = vadd.xlane.f32.xlu0 %v162_v17  ;;  %v73_v25 = vpop.xlane.xlu0 %72  ;;  %v97_v30 = vpop.xlane.xlu1 %96  ;;  %v1295_v15 = vunpack.c.l.bf16 %v858_v12  ;;  %v359_v20 = vsub.f32 0.0, %v343_v8  ;;  %v351_v21 = vand.u32 2147483647, %v1287_v9  ;;  %v352_v24 = vand.u32 2147483647, %v1292_v13 }
  0xa3   :  { %v110_v34 = vmul.f32 0.03125, %v73_v25  ;;  %v118_v35 = vmul.f32 0.03125, %v97_v30  ;;  %v141_v38 = vmul.f32 %v1208_v7, %v1208_v7  ;;  %v149_v22 = vmul.f32 %v1212_v16, %v1212_v16 }
  0xa4   :  { %v360_v6 = vsub.f32 0.0, %v344_v14  ;;  %v345_v17 = vand.u32 2147483647, %v1295_v15  ;;  %v1300_v25 = vunpack.c.h.bf16 %v858_v12  ;;  %v375_v30 = vmul.f32 1.442695, %v359_v20 }
  0xa5   :  { %v1222_v23 = vsub.f32 %v798_v26, %v110_v34  ;;  %v1226_v39 = vsub.f32 %v814_v27, %v118_v35  ;;  %v165_v40 = vsel %vm55_vm0, %v141_v38, 0.0  ;;  %v189_v43 = vsel %vm55_vm0, %v149_v22, 0.0  ;;  %v862_v34 = vld [vmem:[%s1691_s1 + $0x28] sm:$0xff]  }
  0xa6   :  { %187 = vadd.xlane.f32.xlu1 %v186_v31  ;;  %166 = vadd.xlane.f32.xlu0 %v165_v40  ;;  %v76_v41 = vpop.xlane.xlu0 %75  ;;  %v100_v42 = vpop.xlane.xlu1 %99  ;;  %v367_v31 = vsub.f32 0.0, %v351_v21  ;;  %v368_v35 = vsub.f32 0.0, %v352_v24  ;;  %v377_v38 = vmul.f32 1.442695, %v360_v6  ;;  %v361_v22 = vsub.f32 0.0, %v345_v17 }
  0xa7   :  { %v111_v46 = vmul.f32 0.03125, %v76_v41  ;;  %v119_v47 = vmul.f32 0.03125, %v100_v42  ;;  %v142_v48 = vmul.f32 %v1222_v23, %v1222_v23  ;;  %v150_v18 = vmul.f32 %v1226_v39, %v1226_v39 }
  0xa8   :  { %v346_v40 = vand.u32 2147483647, %v1300_v25  ;;  %925 = vpow2.f32 %v375_v30  ;;  %v391_v41 = vmul.f32 1.442695, %v367_v31  ;;  %v1306_v42 = vunpack.c.l.bf16 %v862_v34  ;;  %v864_v31 = vld [vmem:[%s1691_s1 + $0x38] sm:$0xff]  }
  0xa9   :  { %v1236_v19 = vsub.f32 %v801_v32, %v111_v46  ;;  %v1240_v26 = vsub.f32 %v817_v33, %v119_v47  ;;  %v168_v27 = vsel %vm55_vm0, %v142_v48, 0.0  ;;  %v192_v51 = vsel %vm55_vm0, %v150_v18, 0.0  ;;  %v859_v46 = vld [vmem:[%s1691_s1 + $0x10] sm:$0xff]  }
  0xaa   :  { %190 = vadd.xlane.f32.xlu1 %v189_v43  ;;  %169 = vadd.xlane.f32.xlu0 %v168_v27  ;;  %v79_v49 = vpop.xlane.xlu0 %78  ;;  %v103_v50 = vpop.xlane.xlu1 %102  ;;  %v393_v43 = vmul.f32 1.442695, %v368_v35  ;;  %927 = vpow2.f32 %v377_v38  ;;  %v379_v47 = vmul.f32 1.442695, %v361_v22  ;;  %v362_v48 = vsub.f32 0.0, %v346_v40 }
  0xab   :  { %v112_v54 = vmul.f32 0.03125, %v79_v49  ;;  %v120_v55 = vmul.f32 0.03125, %v103_v50  ;;  %v143_v56 = vmul.f32 %v1236_v19, %v1236_v19  ;;  %v151_v32 = vmul.f32 %v1240_v26, %v1240_v26 }
  0xac   :  { %929 = vpow2.f32 %v391_v41  ;;  %v353_v18 = vand.u32 2147483647, %v1306_v42  ;;  %v1312_v27 = vunpack.c.l.bf16 %v859_v46  ;;  %v381_v49 = vmul.f32 1.442695, %v362_v48 }
  0xad   :  { %v1250_v33 = vsub.f32 %v802_v36, %v112_v54  ;;  %v1254_v57 = vsub.f32 %v818_v37, %v120_v55  ;;  %v171_v58 = vsel %vm55_vm0, %v143_v56, 0.0  ;;  %v195_v59 = vsel %vm55_vm0, %v151_v32, 0.0  ;;  %v522_v36 = vld [vmem:[%s1690_s4 + $0x18] sm:$0xff]  ;;  %v521_v37 = vld [vmem:[%s1690_s4 + $0x10] sm:$0xff] }
  0xae   :  { %193 = vadd.xlane.f32.xlu1 %v192_v51  ;;  %172 = vadd.xlane.f32.xlu0 %v171_v58  ;;  %931 = vpow2.f32 %v393_v43  ;;  %v1314_v50 = vunpack.c.h.bf16 %v862_v34  ;;  %v369_v51 = vsub.f32 0.0, %v353_v18  ;;  %v347_v54 = vand.u32 2147483647, %v1312_v27  ;;  %v863_v55 = vld [vmem:[%s1691_s1 + $0x30] sm:$0xff]  }
  0xaf   :  { %v144_v60 = vmul.f32 %v1250_v33, %v1250_v33  ;;  %v152_v61 = vmul.f32 %v1254_v57, %v1254_v57  ;;  %885 = vmatprep.subr.mxu0 %v522_v36  ;;  %917 = vmatprep.subr.mxu1 %v522_v36  ;;  %933 = vpow2.f32 %v379_v47  ;;  %v1321_v58 = vunpack.c.h.bf16 %v859_v46 }
  0xb0   :  { %886 = vmatpush3.msra.mxu0 %v522_v36  ;;  %921 = vmatpush3.msra.mxu1 %v522_v36  ;;  %935 = vpow2.f32 %v381_v49  ;;  %v354_v56 = vand.u32 2147483647, %v1314_v50  ;;  %v395_v32 = vmul.f32 1.442695, %v369_v51  ;;  %v1339_v12 = vunpack.c.h.bf16 %v863_v55 }
  0xb1   :  { %v174_v28 = vsel %vm55_vm0, %v144_v60, 0.0  ;;  %v198_v29 = vsel %vm55_vm0, %v152_v61, 0.0  ;;  %887 = vmatprep.subr.mxu0 %v521_v37  ;;  %918 = vmatprep.subr.mxu1 %v521_v37  ;;  %v363_v60 = vsub.f32 0.0, %v347_v54  ;;  %v1325_v61 = vunpack.c.l.bf16 %v863_v55 }
  0xb2   :  { %196 = vadd.xlane.f32.xlu1 %v195_v59  ;;  %175 = vadd.xlane.f32.xlu0 %v174_v28  ;;  %v860_v28 = vld [vmem:[%s1691_s1 + $0x18] sm:$0xff]   ;;  %937 = vpow2.f32 %v395_v32  ;;  %v356_v35 = vand.u32 2147483647, %v1339_v12  ;;  %v1356_v41 = vunpack.c.l.bf16 %v864_v31  ;;  %vm408_vm2 = vcmp.ge.f32.partialorder %v1284_v5, 0.0 }
  0xb3   :  { %888 = vmatpush3.msra.mxu0 %v521_v37  ;;  %922 = vmatpush3.msra.mxu1 %v521_v37  ;;  %v383_v4 = vmul.f32 1.442695, %v363_v60  ;;  %v355_v8 = vand.u32 2147483647, %v1325_v61  ;;  %v1352_v38 = vunpack.c.h.bf16 %v860_v28  ;;  %vm415_vm3 = vcmp.ge.f32.partialorder %v1287_v9, 0.0 }
  0xb4   :  { %889 = vmatprep.subr.mxu0 %v520_v0  ;;  %919 = vmatprep.subr.mxu1 %v520_v0  ;;  %v372_v18 = vsub.f32 0.0, %v356_v35  ;;  %v357_v54 = vand.u32 2147483647, %v1356_v41  ;;  %vm416_vm4 = vcmp.ge.f32.partialorder %v1292_v13, 0.0  ;;  %vm409_vm5 = vcmp.ge.f32.partialorder %v1295_v15, 0.0 }
  0xb5   :  { %890 = vmatpush3.msra.mxu0 %v520_v0  ;;  %923 = vmatpush3.msra.mxu1 %v520_v0  ;;  %v1323_v59 = vpop.eup %925  ;;  %v348_v0 = vand.u32 2147483647, %v1321_v58  ;;  %v371_v34 = vsub.f32 0.0, %v355_v8  ;;  %v350_v49 = vand.u32 2147483647, %v1352_v38  ;;  %vm410_vm6 = vcmp.ge.f32.partialorder %v1300_v25, 0.0 }
  0xb6   :  { %199 = vadd.xlane.f32.xlu1 %v198_v29  ;;  %891 = vmatprep.subr.mxu0 %v519_v1  ;;  %v370_v29 = vsub.f32 0.0, %v354_v56  ;;  %v439_v37 = vadd.f32 1.0, %v1323_v59  ;;  %v401_v32 = vmul.f32 1.442695, %v372_v18  ;;  %vm417_vm7 = vcmp.ge.f32.partialorder %v1306_v42, 0.0 }
  0xb7   :  { %920 = vmatprep.subr.mxu1 %v519_v1  ;;  %892 = vmatpush3.msra.mxu0 %v519_v1  ;;  %v1330_v36 = vpop.eup %927  ;;  %v364_v17 = vsub.f32 0.0, %v348_v0  ;;  %v399_v48 = vmul.f32 1.442695, %v371_v34  ;;  %v366_v60 = vsub.f32 0.0, %v350_v49  ;;  %vm411_vm8 = vcmp.ge.f32.partialorder %v1312_v27, 0.0 }
  0xb8   :  { %924 = vmatpush3.msra.mxu1 %v519_v1  ;;  %v1334_v1 = vunpack.c.l.bf16 %v860_v28  ;;  %v440_v20 = vadd.f32 1.0, %v1330_v36  ;;  %v397_v21 = vmul.f32 1.442695, %v370_v29  ;;  %939 = vrcp.f32 %v439_v37 }
  0xb9   :  { %v1336_v2 = vpop.eup %929  ;;  %941 = vpow2.f32 %v383_v4  ;;  %v385_v46 = vmul.f32 1.442695, %v364_v17  ;;  %v1365_v28 = vunpack.c.h.bf16 %v864_v31  ;;  %v373_v29 = vsub.f32 0.0, %v357_v54 }
  0xba   :  { %v447_v6 = vadd.f32 1.0, %v1336_v2  ;;  %v349_v30 = vand.u32 2147483647, %v1334_v1  ;;  %943 = vrcp.f32 %v440_v20  ;;  %v389_v8 = vmul.f32 1.442695, %v366_v60 }
  0xbb   :  { %v1341_v14 = vpop.eup %931  ;;  %945 = vpow2.f32 %v397_v21  ;;  %v358_v20 = vand.u32 2147483647, %v1365_v28  ;;  %v423_v17 = vsel %vm407_vm1, 1.0, %v1323_v59  ;;  %v424_v35 = vsel %vm408_vm2, 1.0, %v1330_v36 }
  0xbc   :  { %v1344_v24 = vpop.eup %933  ;;  %v448_v22 = vadd.f32 1.0, %v1341_v14  ;;  %v365_v47 = vsub.f32 0.0, %v349_v30  ;;  %947 = vrcp.f32 %v447_v6  ;;  %v403_v30 = vmul.f32 1.442695, %v373_v29 }
  0xbd   :  { %v441_v40 = vadd.f32 1.0, %v1344_v24  ;;  %v1358_v43 = vpop.eup %935  ;;  %v374_v18 = vsub.f32 0.0, %v358_v20  ;;  %v431_v36 = vsel %vm415_vm3, 1.0, %v1336_v2  ;;  %vm418_vm9 = vcmp.ge.f32.partialorder %v1314_v50, 0.0 }
  0xbe   :  { %949 = vrcp.f32 %v448_v22  ;;  %v442_v51 = vadd.f32 1.0, %v1358_v43  ;;  %v387_v55 = vmul.f32 1.442695, %v365_v47  ;;  %vm412_vm10 = vcmp.ge.f32.partialorder %v1321_v58, 0.0 }
  0xbf   :  { %951 = vrcp.f32 %v441_v40  ;;  %v1363_v56 = vpop.eup %937  ;;  %vm419_vm11 = vcmp.ge.f32.partialorder %v1325_v61, 0.0  ;;  %vm420_vm12 = vcmp.ge.f32.partialorder %v1339_v12, 0.0  ;;  %vm413_vm13 = vcmp.ge.f32.partialorder %v1334_v1, 0.0 }
  0xc0   :  { %953 = vpow2.f32 %v385_v46  ;;  %v449_v37 = vadd.f32 1.0, %v1363_v56  ;;  %vm421_vm14 = vcmp.ge.f32.partialorder %v1356_v41, 0.0  ;;  %vm414_vm15 = vcmp.ge.f32.partialorder %v1352_v38, 0.0 }
  0xc1   :  { %955 = vpow2.f32 %v399_v48  ;;  %vm422_vm1 = vcmp.ge.f32.partialorder %v1365_v28, 0.0  ;;  %vm748_vm2 = vcmask 130048  }
  0xc2   :  { %957 = vrcp.f32 %v442_v51 }
  0xc3   :  { %959 = vpow2.f32 %v387_v55 }
  0xc4   :  { %961 = vpow2.f32 %v401_v32  ;;  %v432_v32 = vsel %vm416_vm4, 1.0, %v1341_v14 }
  0xc5   :  { %v940_v0 = vpop.eup %939  ;;  %963 = vrcp.f32 %v449_v37 }
  0xc6   :  { %v1371_v21 = vpop.eup %941  ;;  %v456_v47 = vmul.f32 %v940_v0, %v423_v17  ;;  %965 = vpow2.f32 %v389_v8  ;;  %v405_v17 = vmul.f32 1.442695, %v374_v18 }
  0xc7   :  { %v944_v31 = vpop.eup %943  ;;  %v443_v48 = vadd.f32 1.0, %v1371_v21 }
  0xc8   :  { %v1377_v22 = vpop.eup %945  ;;  %v458_v55 = vmul.f32 %v944_v31, %v424_v35  ;;  %v1392_v20 = vmul.f32 %v1279_v3, %v456_v47  ;;  %v426_v3 = vsel %vm410_vm6, 1.0, %v1358_v43 }
  0xc9   :  { %v948_v59 = vpop.eup %947  ;;  %v450_v0 = vadd.f32 1.0, %v1377_v22 }
  0xca   :  { %v1400_v35 = vmul.f32 %v1284_v5, %v458_v55 }
  0xcb   :  { %v950_v54 = vpop.eup %949 }
  0xcc   :  { %v952_v60 = vpop.eup %951 }
 0x11f   :  { %v155_v4 = vpop.xlane.xlu0 %154 }
 0x120   :  { %v201_v6 = vmul.f32 0.03125, %v155_v4  ;;  %v1389_v4 = vpop.eup %953 }
 0x121   :  { %v1394_v31 = vpop.eup %955  ;;  %v444_v18 = vadd.f32 1.0, %v1389_v4 }
 0x122   :  { %v217_v34 = vadd.f32 1e-05, %v201_v6  ;;  %v472_v6 = vmul.f32 %v948_v59, %v431_v36  ;;  %v451_v36 = vadd.f32 1.0, %v1394_v31 }
 0x123   :  { %v179_v40 = vpop.xlane.xlu1 %178  ;;  %v158_v46 = vpop.xlane.xlu0 %157 }
 0x124   :  { %967 = vrsqrt.f32 %v217_v34  ;;  %v209_v49 = vmul.f32 0.03125, %v179_v40  ;;  %v202_v51 = vmul.f32 0.03125, %v158_v46  ;;  %v425_v34 = vsel %vm409_vm5, 1.0, %v1344_v24  ;;  %v958_v46 = vpop.eup %957 }
 0x125   :  { %969 = vpow2.f32 %v403_v30  ;;  %v474_v40 = vmul.f32 %v950_v54, %v432_v32  ;;  %v1406_v59 = vpop.eup %959  ;;  %v1409_v24 = vmul.f32 %v1287_v9, %v472_v6  ;;  %v460_v5 = vmul.f32 %v952_v60, %v425_v34 }
 0x126   :  { %v225_v29 = vadd.f32 1e-05, %v209_v49  ;;  %v218_v37 = vadd.f32 1e-05, %v202_v51  ;;  %971 = vrcp.f32 %v443_v48  ;;  %v1412_v54 = vpop.eup %961  ;;  %v445_v60 = vadd.f32 1.0, %v1406_v59 }
 0x127   :  { %v182_v8 = vpop.xlane.xlu1 %181  ;;  %v161_v2 = vpop.xlane.xlu0 %160  ;;  %v1416_v32 = vmul.f32 %v1292_v13, %v474_v40  ;;  %v1421_v6 = vmul.f32 %v1295_v15, %v460_v5  ;;  %v452_v13 = vadd.f32 1.0, %v1412_v54 }
 0x128   :  { %973 = vrsqrt.f32 %v225_v29  ;;  %v210_v14 = vmul.f32 0.03125, %v182_v8  ;;  %v203_v30 = vmul.f32 0.03125, %v161_v2  ;;  %v462_v29 = vmul.f32 %v958_v46, %v426_v3  ;;  %v1431_v3 = vld [vmem:[%s1692_s2] ss:$0 sm:$0xff] }
 0x129   :  { %975 = vrsqrt.f32 %v218_v37 }
 0x12a   :  { %v226_v47 = vadd.f32 1e-05, %v210_v14  ;;  %v219_v48 = vadd.f32 1e-05, %v203_v30  ;;  %977 = vrcp.f32 %v450_v0  ;;  %v964_v0 = vpop.eup %963  ;;  %v1434_v15 = vmul.f32 %v1300_v25, %v462_v29  ;;  %v1448_v25 = vld [vmem:[%s1693_s3] ss:$0 sm:$0xff] }
 0x12b   :  { %v185_v49 = vpop.xlane.xlu1 %184  ;;  %v164_v51 = vpop.xlane.xlu0 %163  ;;  %979 = vpow2.f32 %v405_v17  ;;  %v433_v17 = vsel %vm417_vm7, 1.0, %v1363_v56  ;;  %v1439_v56 = vsel %vm411_vm8, 1.0, %v1371_v21 }
 0x12c   :  { %981 = vrsqrt.f32 %v226_v47  ;;  %v211_v43 = vmul.f32 0.03125, %v185_v49  ;;  %v204_v55 = vmul.f32 0.03125, %v164_v51  ;;  %v1425_v14 = vpop.eup %965  ;;  %v476_v5 = vmul.f32 %v964_v0, %v433_v17 }
 0x12d   :  { %983 = vrsqrt.f32 %v219_v48  ;;  %v446_v21 = vadd.f32 1.0, %v1425_v14 }
 0x12e   :  { %v227_v9 = vadd.f32 1e-05, %v211_v43  ;;  %v220_v37 = vadd.f32 1e-05, %v204_v55  ;;  %985 = vrcp.f32 %v444_v18 }
 0x12f   :  { %v188_v8 = vpop.xlane.xlu1 %187  ;;  %v167_v2 = vpop.xlane.xlu0 %166  ;;  %987 = vrcp.f32 %v451_v36 }
 0x130   :  { %989 = vrsqrt.f32 %v227_v9  ;;  %v212_v30 = vmul.f32 0.03125, %v188_v8  ;;  %v205_v34 = vmul.f32 0.03125, %v167_v2  ;;  %v434_v9 = vsel %vm418_vm9, 1.0, %v1377_v22 }
 0x131   :  { %v968_v40 = vpop.eup %967  ;;  %991 = vrsqrt.f32 %v220_v37  ;;  %v1461_v37 = vsel %vm412_vm10, 1.0, %v1389_v4  ;;  %v1468_v22 = vmul.f32 %v1306_v42, %v476_v5  ;;  %v1473_v4 = vsel %vm419_vm11, 1.0, %v1394_v31 }
 0x132   :  { %v1442_v46 = vpop.eup %969  ;;  %v228_v47 = vadd.f32 1e-05, %v212_v30  ;;  %v221_v48 = vadd.f32 1e-05, %v205_v34  ;;  %v249_v18 = vmul.f32 %v968_v40, %v1156_v44  ;;  %993 = vrcp.f32 %v445_v60 }
 0x133   :  { %v191_v49 = vpop.xlane.xlu1 %190  ;;  %v170_v51 = vpop.xlane.xlu0 %169  ;;  %995 = vrcp.f32 %v452_v13  ;;  %v453_v60 = vadd.f32 1.0, %v1442_v46 }
 0x134   :  { %v1452_v36 = vpop.eup %971  ;;  %997 = vrsqrt.f32 %v228_v47  ;;  %v213_v43 = vmul.f32 0.03125, %v191_v49  ;;  %v206_v55 = vmul.f32 0.03125, %v170_v51  ;;  %v272_v44 = vmul.f32 %v1431_v3, %v249_v18 }
 0x135   :  { %v974_v29 = vpop.eup %973  ;;  %999 = vrsqrt.f32 %v221_v48 }
 0x136   :  { %v976_v0 = vpop.eup %975  ;;  %v229_v8 = vadd.f32 1e-05, %v213_v43  ;;  %v222_v2 = vadd.f32 1e-05, %v206_v55  ;;  %v295_v17 = vadd.f32 %v1448_v25, %v272_v44  ;;  %v257_v13 = vmul.f32 %v974_v29, %v1166_v52 }
 0x137   :  { %v978_v30 = vpop.eup %977  ;;  %v194_v34 = vpop.xlane.xlu1 %193  ;;  %v250_v47 = vmul.f32 %v976_v0, %v1158_v45  ;;  %1001 = vrcp.f32 %v446_v21 }
 0x138   :  { %v173_v40 = vpop.xlane.xlu0 %172  ;;  %v1475_v48 = vpop.eup %979  ;;  %1003 = vrsqrt.f32 %v229_v8  ;;  %v214_v18 = vmul.f32 0.03125, %v194_v34  ;;  %v503_v52 = vmul.f32 %v1392_v20, %v295_v17  ;;  %v280_v42 = vmul.f32 %v1431_v3, %v257_v13 }
 0x139   :  { %v207_v49 = vmul.f32 0.03125, %v173_v40  ;;  %v982_v51 = vpop.eup %981  ;;  %1005 = vrsqrt.f32 %v222_v2  ;;  %v273_v45 = vmul.f32 %v1431_v3, %v250_v47  ;;  %v454_v2 = vadd.f32 1.0, %v1475_v48 }
 0x13a   :  { %v984_v5 = vpop.eup %983  ;;  %v230_v43 = vadd.f32 1e-05, %v214_v18  ;;  %893 = vmatprep.mubr.msk.f32.mxu0 %vm55_vm0, %v503_v52  ;;  %v258_v21 = vmul.f32 %v982_v51, %v1170_v53  ;;  %1007 = vrcp.f32 %v453_v60  ;;  %v303_v0 = vadd.f32 %v1448_v25, %v280_v42 }
 0x13b   :  { %v223_v31 = vadd.f32 1e-05, %v207_v49  ;;  %v986_v55 = vpop.eup %985  ;;  %v197_v44 = vpop.xlane.xlu1 %196  ;;  %v296_v20 = vadd.f32 %v1448_v25, %v273_v45  ;;  %v251_v8 = vmul.f32 %v984_v5, %v1180_v62 }
 0x13c   :  { %v176_v29 = vpop.xlane.xlu0 %175  ;;  %v988_v17 = vpop.eup %987  ;;  %1009 = vrsqrt.f32 %v230_v43  ;;  %v215_v13 = vmul.f32 0.03125, %v197_v44  ;;  %v281_v53 = vmul.f32 %v1431_v3, %v258_v21  ;;  %v511_v47 = vmul.f32 %v1409_v24, %v303_v0 }
 0x13d   :  { %v208_v34 = vmul.f32 0.03125, %v176_v29  ;;  %v990_v60 = vpop.eup %989  ;;  %1011 = vrsqrt.f32 %v223_v31  ;;  %v504_v40 = vmul.f32 %v1400_v35, %v296_v20  ;;  %v274_v18 = vmul.f32 %v1431_v3, %v251_v8 }
 0x13e   :  { %v992_v49 = vpop.eup %991  ;;  %v231_v62 = vadd.f32 1e-05, %v215_v13  ;;  %v304_v51 = vadd.f32 %v1448_v25, %v281_v53  ;;  %v259_v45 = vmul.f32 %v990_v60, %v1184_v63  ;;  %905 = vmatprep.mubr.msk.f32.mxu1 %vm55_vm0, %v511_v47  ;;  %v478_v24 = vmul.f32 %v978_v30, %v434_v9 }
 0x13f   :  { %v224_v52 = vadd.f32 1e-05, %v208_v34  ;;  %v994_v42 = vpop.eup %993  ;;  %894 = vmatmul.mubr.msk.f32.vlgmr.msra.gmra.mxu0 %vm55_vm0, %v504_v40  ;;  %v200_v5 = vpop.xlane.xlu1 %199  ;;  %v297_v43 = vadd.f32 %v1448_v25, %v274_v18  ;;  %v252_v35 = vmul.f32 %v992_v49, %v1194_v10  ;;  %1013 = vrcp.f32 %v454_v2 }
 0x140   :  { %v996_v31 = vpop.eup %995  ;;  %1015 = vrsqrt.f32 %v231_v62  ;;  %v216_v21 = vmul.f32 0.03125, %v200_v5  ;;  %v512_v44 = vmul.f32 %v1416_v32, %v304_v51  ;;  %v282_v29 = vmul.f32 %v1431_v3, %v259_v45 }
 0x141   :  { %v998_v63 = vpop.eup %997  ;;  %1017 = vrsqrt.f32 %v224_v52  ;;  %v505_v20 = vmul.f32 %v1421_v6, %v297_v43  ;;  %v275_v0 = vmul.f32 %v1431_v3, %v252_v35  ;;  %v464_v8 = vmul.f32 %v1452_v36, %v1439_v56 }
 0x142   :  { %v1000_v13 = vpop.eup %999  ;;  %v232_v10 = vadd.f32 1e-05, %v216_v21  ;;  %906 = vmatmul.mubr.msk.f32.vlgmr.msra.gmra.mxu1 %vm55_vm0, %v512_v44  ;;  %v305_v9 = vadd.f32 %v1448_v25, %v282_v29  ;;  %v260_v30 = vmul.f32 %v998_v63, %v1198_v11  ;;  %v436_v32 = vsel %vm420_vm12, 1.0, %v1412_v54 }
 0x143   :  { %896 = vmatprep.mubr.msk.f32.mxu0 %vm55_vm0, %v505_v20  ;;  %v298_v6 = vadd.f32 %v1448_v25, %v275_v0  ;;  %v253_v2 = vmul.f32 %v1000_v13, %v1208_v7  ;;  %v498_v56 = vmul.f32 %v1314_v50, %v478_v24  ;;  %v480_v53 = vmul.f32 %v988_v17, %v1473_v4 }
 0x144   :  { %v1002_v36 = vpop.eup %1001  ;;  %1019 = vrsqrt.f32 %v232_v10  ;;  %v513_v34 = vmul.f32 %v1468_v22, %v305_v9  ;;  %v283_v11 = vmul.f32 %v1431_v3, %v260_v30  ;;  %v491_v47 = vmul.f32 %v1312_v27, %v464_v8 }
 0x145   :  { %v1004_v60 = vpop.eup %1003  ;;  %v506_v54 = vmul.f32 %v1434_v15, %v298_v6  ;;  %v276_v40 = vmul.f32 %v1431_v3, %v253_v2  ;;  %v466_v7 = vmul.f32 %v986_v55, %v1461_v37  ;;  %v429_v4 = vsel %vm413_vm13, 1.0, %v1406_v59 }
 0x146   :  { %v1006_v50 = vpop.eup %1005  ;;  %908 = vmatprep.mubr.msk.f32.mxu1 %vm55_vm0, %v513_v34  ;;  %v306_v18 = vadd.f32 %v1448_v25, %v283_v11  ;;  %v261_v22 = vmul.f32 %v1004_v60, %v1212_v16  ;;  %v437_v55 = vsel %vm421_vm14, 1.0, %v1442_v46  ;;  %v499_v59 = vmul.f32 %v1325_v61, %v480_v53 }
 0x147   :  { %v1008_v15 = vpop.eup %1007  ;;  %897 = vmatmul.mubr.msk.f32.gmra.mxu0 %vm55_vm0, %v506_v54  ;;  %v299_v27 = vadd.f32 %v1448_v25, %v276_v40  ;;  %v254_v37 = vmul.f32 %v1006_v50, %v1222_v23  ;;  %v482_v49 = vmul.f32 %v996_v31, %v436_v32  ;;  %v492_v45 = vmul.f32 %v1321_v58, %v466_v7  ;;  %v724_v50 = vld [vmem:[%s1694_s5 + $0x40] sm:$0xff] }
 0x148   :  { %v514_v16 = vmul.f32 %v498_v56, %v306_v18  ;;  %v284_v17 = vmul.f32 %v1431_v3, %v261_v22  ;;  %v468_v5 = vmul.f32 %v994_v42, %v429_v4  ;;  %v430_v35 = vsel %vm414_vm15, 1.0, %v1425_v14 }
 0x149   :  { %v1010_v62 = vpop.eup %1009  ;;  %v507_v52 = vmul.f32 %v491_v47, %v299_v27  ;;  %v277_v51 = vmul.f32 %v1431_v3, %v254_v37  ;;  %v438_v58 = vsel %vm422_vm1, 1.0, %v1475_v48  ;;  %v484_v44 = vmul.f32 %v1008_v15, %v437_v55  ;;  %v719_v15 = vld [vmem:[%s1694_s5 + $0x18] sm:$0xff]  ;;  %v718_v37 = vld [vmem:[%s1694_s5 + $0x10] sm:$0xff] }
 0x14a   :  { %v1012_v23 = vpop.eup %1011  ;;  %909 = vmatmul.mubr.msk.f32.gmra.mxu1 %vm55_vm0, %v514_v16  ;;  %v307_v46 = vadd.f32 %v1448_v25, %v284_v17  ;;  %v262_v43 = vmul.f32 %v1010_v62, %v1226_v39  ;;  %v500_v39 = vmul.f32 %v1339_v12, %v482_v49  ;;  %v493_v20 = vmul.f32 %v1334_v1, %v468_v5  ;;  %v727_v16 = vld [vmem:[%s1694_s5 + $0x58] sm:$0xff]  ;;  %v726_v62 = vld [vmem:[%s1694_s5 + $0x50] sm:$0xff]  ;;  %v721_v5 = vld [vmem:[%s1694_s5 + $0x28] sm:$0xff] }
 0x14b   :  { %899 = vmatprep.mubr.msk.f32.mxu0 %vm55_vm0, %v507_v52  ;;  %v300_v61 = vadd.f32 %v1448_v25, %v277_v51  ;;  %v255_v24 = vmul.f32 %v1012_v23, %v1236_v19  ;;  %v470_v0 = vmul.f32 %v1002_v36, %v430_v35  ;;  %v501_v30 = vmul.f32 %v1356_v41, %v484_v44  ;;  %v729_v35 = vld [vmem:[%s1694_s5 + $0x68] sm:$0xff]  ;;  %v723_v44 = vld [vmem:[%s1694_s5 + $0x38] sm:$0xff] }
 0x14c   :  { %v1014_v42 = vpop.eup %1013  ;;  %v515_v31 = vmul.f32 %v499_v59, %v307_v46  ;;  %v285_v21 = vmul.f32 %v1431_v3, %v262_v43  ;;  %v720_v46 = vld [vmem:[%s1694_s5 + $0x20] sm:$0xff] }
 0x14d   :  { %v1016_v29 = vpop.eup %1015  ;;  %v508_v63 = vmul.f32 %v492_v45, %v300_v61  ;;  %v278_v14 = vmul.f32 %v1431_v3, %v255_v24  ;;  %v486_v1 = vmul.f32 %v1014_v42, %v438_v58  ;;  %v494_v56 = vmul.f32 %v1352_v38, %v470_v0  ;;  %v728_v42 = vld [vmem:[%s1694_s5 + $0x60] sm:$0xff] }
 0x14e   :  { %v1018_v8 = vpop.eup %1017  ;;  %911 = vmatprep.mubr.msk.f32.mxu1 %vm55_vm0, %v515_v31  ;;  %v308_v19 = vadd.f32 %v1448_v25, %v285_v21  ;;  %v263_v48 = vmul.f32 %v1016_v29, %v1240_v26 }
 0x14f   :  { %900 = vmatmul.mubr.msk.f32.gmra.mxu0 %vm55_vm0, %v508_v63  ;;  %v301_v13 = vadd.f32 %v1448_v25, %v278_v14  ;;  %v256_v12 = vmul.f32 %v1018_v8, %v1250_v33  ;;  %v502_v11 = vmul.f32 %v1365_v28, %v486_v1  ;;  %v716_v28 = vld [vmem:[%s1694_s5] sm:$0xff]  ;;  %v722_v63 = vld [vmem:[%s1694_s5 + $0x30] sm:$0xff] }
 0x150   :  { %v516_v10 = vmul.f32 %v500_v39, %v308_v19  ;;  %v286_v9 = vmul.f32 %v1431_v3, %v263_v48  ;;  %v730_v48 = vld [vmem:[%s1694_s5 + $0x70] sm:$0xff] }
 0x151   :  { %v1020_v32 = vpop.eup %1019  ;;  %v509_v6 = vmul.f32 %v493_v20, %v301_v13  ;;  %v279_v2 = vmul.f32 %v1431_v3, %v256_v12  ;;  %v731_v20 = vld [vmem:[%s1694_s5 + $0x78] sm:$0xff] }
 0x152   :  { %912 = vmatmul.mubr.msk.f32.gmra.mxu1 %vm55_vm0, %v516_v10  ;;  %v309_v26 = vadd.f32 %v1448_v25, %v286_v9  ;;  %v264_v36 = vmul.f32 %v1020_v32, %v1254_v57  ;;  %v717_v57 = vld [vmem:[%s1694_s5 + $0x8] sm:$0xff] }
 0x153   :  { %902 = vmatprep.mubr.msk.f32.mxu0 %vm55_vm0, %v509_v6  ;;  %v302_v33 = vadd.f32 %v1448_v25, %v279_v2 }
 0x154   :  { %v517_v34 = vmul.f32 %v501_v30, %v309_v26  ;;  %v287_v41 = vmul.f32 %v1431_v3, %v264_v36 }
 0x155   :  { %v510_v53 = vmul.f32 %v494_v56, %v302_v33 }
 0x156   :  { %914 = vmatprep.mubr.msk.f32.mxu1 %vm55_vm0, %v517_v34  ;;  %v310_v38 = vadd.f32 %v1448_v25, %v287_v41  ;;  %v725_v25 = vld [vmem:[%s1694_s5 + $0x48] sm:$0xff] }
 0x157   :  { %903 = vmatmul.mubr.msk.f32.gmra.mxu0 %vm55_vm0, %v510_v53 }
 0x158   :  { %v518_v60 = vmul.f32 %v502_v11, %v310_v38 }
 0x15a   :  { %915 = vmatmul.mubr.msk.f32.gmra.mxu1 %vm55_vm0, %v518_v60 }
 0x1ff   :  { %v895_v54 = vpop.f32.mrf.mxu0 }
 0x200   :  { %v733_v3 = vadd.f32 %v895_v54, %v717_v57 }
 0x201   :  { %v637_v40 = vpop.f32.mrf.mxu0 }
 0x202   :  { %750 = vst.msk [vmem:[%s1695_s6 + $0x8] sm:$0xff] %vm748_vm2, %v733_v3  ;;  %v732_v47 = vadd.f32 %v716_v28, %v637_v40  ;;  %v907_v7 = vpop.f32.mrf.mxu1 }
 0x203   :  { %v741_v18 = vadd.f32 %v907_v7, %v725_v25 }
 0x204   :  { %749 = vst.msk [vmem:[%s1695_s6] sm:$0xff] %vm748_vm2, %v732_v47  ;;  %v677_v22 = vpop.f32.mrf.mxu1 }
 0x205   :  { %758 = vst.msk [vmem:[%s1695_s6 + $0x48] sm:$0xff] %vm748_vm2, %v741_v18  ;;  %v740_v4 = vadd.f32 %v724_v50, %v677_v22 }
 0x207   :  { %757 = vst.msk [vmem:[%s1695_s6 + $0x40] sm:$0xff] %vm748_vm2, %v740_v4  ;;  %v898_v27 = vpop.f32.mrf.mxu0 }
 0x208   :  { %v735_v55 = vadd.f32 %v898_v27, %v719_v15 }
 0x209   :  { %v647_v17 = vpop.f32.mrf.mxu0 }
 0x20a   :  { %752 = vst.msk [vmem:[%s1695_s6 + $0x18] sm:$0xff] %vm748_vm2, %v735_v55  ;;  %v734_v59 = vadd.f32 %v718_v37, %v647_v17  ;;  %v910_v49 = vpop.f32.mrf.mxu1 }
 0x20b   :  { %v743_v52 = vadd.f32 %v910_v49, %v727_v16 }
 0x20c   :  { %751 = vst.msk [vmem:[%s1695_s6 + $0x10] sm:$0xff] %vm748_vm2, %v734_v59  ;;  %v687_v51 = vpop.f32.mrf.mxu1 }
 0x20d   :  { %760 = vst.msk [vmem:[%s1695_s6 + $0x58] sm:$0xff] %vm748_vm2, %v743_v52  ;;  %v742_v45 = vadd.f32 %v726_v62, %v687_v51 }
 0x20f   :  { %759 = vst.msk [vmem:[%s1695_s6 + $0x50] sm:$0xff] %vm748_vm2, %v742_v45  ;;  %v901_v23 = vpop.f32.mrf.mxu0 }
 0x210   :  { %v737_v43 = vadd.f32 %v901_v23, %v721_v5 }
 0x211   :  { %v657_v61 = vpop.f32.mrf.mxu0 }
 0x212   :  { %754 = vst.msk [vmem:[%s1695_s6 + $0x28] sm:$0xff] %vm748_vm2, %v737_v43  ;;  %v736_v24 = vadd.f32 %v720_v46, %v657_v61  ;;  %v913_v58 = vpop.f32.mrf.mxu1 }
 0x213   :  { %v745_v31 = vadd.f32 %v913_v58, %v729_v35 }
 0x214   :  { %753 = vst.msk [vmem:[%s1695_s6 + $0x20] sm:$0xff] %vm748_vm2, %v736_v24  ;;  %v697_v21 = vpop.f32.mrf.mxu1 }
 0x215   :  { %762 = vst.msk [vmem:[%s1695_s6 + $0x68] sm:$0xff] %vm748_vm2, %v745_v31  ;;  %v744_v39 = vadd.f32 %v728_v42, %v697_v21 }
 0x217   :  { %761 = vst.msk [vmem:[%s1695_s6 + $0x60] sm:$0xff] %vm748_vm2, %v744_v39  ;;  %v904_v29 = vpop.f32.mrf.mxu0 }
 0x218   :  { %v739_v14 = vadd.f32 %v904_v29, %v723_v44 }
 0x219   :  { %v667_v0 = vpop.f32.mrf.mxu0 }
 0x21a   :  { %756 = vst.msk [vmem:[%s1695_s6 + $0x38] sm:$0xff] %vm748_vm2, %v739_v14  ;;  %v738_v8 = vadd.f32 %v722_v63, %v667_v0  ;;  %v916_v19 = vpop.f32.mrf.mxu1 }
 0x21b   :  { %v747_v13 = vadd.f32 %v916_v19, %v731_v20 }
 0x21c   :  { %755 = vst.msk [vmem:[%s1695_s6 + $0x30] sm:$0xff] %vm748_vm2, %v738_v8  ;;  %v707_v12 = vpop.f32.mrf.mxu1 }
 0x21d   :  { %764 = vst.msk [vmem:[%s1695_s6 + $0x78] sm:$0xff] %vm748_vm2, %v747_v13  ;;  %v746_v10 = vadd.f32 %v730_v48, %v707_v12 }
 0x21f   :  { %763 = vst.msk [vmem:[%s1695_s6 + $0x70] sm:$0xff] %vm748_vm2, %v746_v10 }

// kernel: _lambda_.15
= control target key start
LH: loop header
LB: loop body
LE: loop exit
PB: predicated region body
PF: predicated region fallthrough
CT: control target
= control target key end

     0   :  { %vm56_vm0 = vcmask 261120   ;;  %s1685_s0 = inlined_call_operand.vmem [shape: bf16[128,32], index: 0, kind: input, shape index: {}]   ;;  %s1686_s1 = inlined_call_operand.vmem [shape: bf16[128,32], index: 1, kind: input, shape index: {}]   ;;  %s1687_s2 = inlined_call_operand.vmem [shape: f32[1,32], index: 2, kind: input, shape index: {}]   ;;  %s1688_s3 = inlined_call_operand.vmem [shape: f32[1,32], index: 3, kind: input, shape index: {}]   ;;  %s1689_s4 = inlined_call_operand.vmem [shape: f32[32,16], index: 4, kind: input, shape index: {}]   ;;  %s1690_s5 = inlined_call_operand.vmem [shape: f32[128,16], index: 5, kind: input, shape index: {}]   ;;  %s1691_s6 = inlined_call_operand.hbm [shape: f32[128,16], index: 6, kind: output, shape index: {}]  }
   0x1   :  { %v1100_v0 = vld [vmem:[%s1685_s0] sm:$0xff]   ;;  %v1114_v6 = vld [vmem:[%s1685_s0 + $0x8] sm:$0xff]  }
   0x2   :  { %v1105_v1 = vld [vmem:[%s1685_s0 + $0x20] sm:$0xff]   ;;  %v802_v2 = vunpack.c.l.bf16 %v1100_v0  ;;  %v803_v3 = vunpack.c.h.bf16 %v1100_v0  ;;  %v1119_v7 = vld [vmem:[%s1685_s0 + $0x28] sm:$0xff]  }
   0x3   :  { %v818_v4 = vunpack.c.l.bf16 %v1105_v1  ;;  %v819_v5 = vunpack.c.h.bf16 %v1105_v1 }
   0x4   :  { %11 = vsyncpa [#allocation3], 0  ;;  %v57_v8 = vsel %vm56_vm0, %v802_v2, 0.0  ;;  %v60_v9 = vsel %vm56_vm0, %v803_v3, 0.0  ;;  %v806_v12 = vunpack.c.l.bf16 %v1114_v6  ;;  %v822_v13 = vunpack.c.l.bf16 %v1119_v7  ;;  %v1142_v18 = vld [vmem:[%s1685_s0 + $0x10] sm:$0xff]   ;;  %v1168_v28 = vld [vmem:[%s1685_s0 + $0x18] sm:$0xff]  }
   0x5   :  { %58 = vadd.xlane.f32.xlu0 %v57_v8  ;;  %61 = vadd.xlane.f32.xlu1 %v60_v9  ;;  %v81_v10 = vsel %vm56_vm0, %v818_v4, 0.0  ;;  %v84_v11 = vsel %vm56_vm0, %v819_v5, 0.0  ;;  %v807_v16 = vunpack.c.h.bf16 %v1114_v6  ;;  %v823_v17 = vunpack.c.h.bf16 %v1119_v7  ;;  %v1147_v19 = vld [vmem:[%s1685_s0 + $0x30] sm:$0xff]   ;;  %v1173_v29 = vld [vmem:[%s1685_s0 + $0x38] sm:$0xff]   ;;  %s1059_s14 = smov [#allocation2]  }
   0x6   :  { %v63_v14 = vsel %vm56_vm0, %v806_v12, 0.0  ;;  %v87_v15 = vsel %vm56_vm0, %v822_v13, 0.0  ;;  %v810_v22 = vunpack.c.l.bf16 %v1142_v18  ;;  %v826_v23 = vunpack.c.l.bf16 %v1147_v19  ;;  %s771_s15 = sshll.u32 %s1059_s14, 4  ;;  %s772_s15 = int_to_ptr.vmem [resolvable:$true] %s771_s15 }
   0x7   :  { %v66_v20 = vsel %vm56_vm0, %v807_v16, 0.0  ;;  %v90_v21 = vsel %vm56_vm0, %v823_v17, 0.0  ;;  %v811_v26 = vunpack.c.h.bf16 %v1142_v18  ;;  %v827_v27 = vunpack.c.h.bf16 %v1147_v19  ;;  %s1037_s16 = scalar_lea.vmem %s772_s15, 2048  ;;  %p1042_p1 = scmp.lt.s32.totalorder %s772_s15, %s772_s15 }
   0x8   :  { %v69_v24 = vsel %vm56_vm0, %v810_v22, 0.0  ;;  %v93_v25 = vsel %vm56_vm0, %v826_v23, 0.0  ;;  %v814_v32 = vunpack.c.l.bf16 %v1168_v28  ;;  %v830_v33 = vunpack.c.l.bf16 %v1173_v29  ;;  %p1038_p0 = scmp.ne.s32.totalorder %s772_s15, %s1037_s16  ;;  %p1043_p2 = scmp.lt.s32.totalorder %s1037_s16, %s1037_s16 }
   0x9   :  { %82 = vadd.xlane.f32.xlu0 %v81_v10  ;;  %85 = vadd.xlane.f32.xlu1 %v84_v11  ;;  %v72_v30 = vsel %vm56_vm0, %v811_v26, 0.0  ;;  %v96_v31 = vsel %vm56_vm0, %v827_v27, 0.0  ;;  %v815_v36 = vunpack.c.h.bf16 %v1168_v28  ;;  %v831_v37 = vunpack.c.h.bf16 %v1173_v29 }
   0xa   :  { %v75_v34 = vsel %vm56_vm0, %v814_v32, 0.0  ;;  %v99_v35 = vsel %vm56_vm0, %v830_v33, 0.0  ;;  %p1044_p3 = por %p1043_p2, %p1042_p1 }
   0xb   :  { %v78_v38 = vsel %vm56_vm0, %v815_v36, 0.0  ;;  %v102_v39 = vsel %vm56_vm0, %v831_v37, 0.0 }
   0xc   :  { %p1045_p4 = pnand %p1044_p3, %p1038_p0 }
   0xd   :  { %64 = vadd.xlane.f32.xlu0 %v63_v14  ;;  %88 = vadd.xlane.f32.xlu1 %v87_v15 }
  0x11   :  { %67 = vadd.xlane.f32.xlu0 %v66_v20  ;;  %91 = vadd.xlane.f32.xlu1 %v90_v21 }
  0x15   :  { %70 = vadd.xlane.f32.xlu0 %v69_v24  ;;  %94 = vadd.xlane.f32.xlu1 %v93_v25 }
  0x19   :  { %73 = vadd.xlane.f32.xlu0 %v72_v30  ;;  %97 = vadd.xlane.f32.xlu1 %v96_v31 }
  0x1d   :  { %76 = vadd.xlane.f32.xlu0 %v75_v34  ;;  %100 = vadd.xlane.f32.xlu1 %v99_v35 }
  0x21   :  { %79 = vadd.xlane.f32.xlu0 %v78_v38  ;;  %103 = vadd.xlane.f32.xlu1 %v102_v39 }
  0x8e   :  { %v59_v40 = vpop.xlane.xlu0 %58  ;;  %v62_v41 = vpop.xlane.xlu1 %61 }
  0x8f   :  { %v106_v42 = vmul.f32 0.03125, %v59_v40  ;;  %v107_v43 = vmul.f32 0.03125, %v62_v41 }
  0x91   :  { %v1197_v44 = vsub.f32 %v802_v2, %v106_v42  ;;  %v1199_v45 = vsub.f32 %v803_v3, %v107_v43 }
  0x92   :  { %v83_v46 = vpop.xlane.xlu0 %82  ;;  %v86_v47 = vpop.xlane.xlu1 %85 }
  0x93   :  { %v114_v48 = vmul.f32 0.03125, %v83_v46  ;;  %v115_v49 = vmul.f32 0.03125, %v86_v47  ;;  %v138_v50 = vmul.f32 %v1197_v44, %v1197_v44  ;;  %v139_v51 = vmul.f32 %v1199_v45, %v1199_v45 }
  0x95   :  { %v1207_v52 = vsub.f32 %v818_v4, %v114_v48  ;;  %v1211_v53 = vsub.f32 %v819_v5, %v115_v49  ;;  %v154_v54 = vsel %vm56_vm0, %v138_v50, 0.0  ;;  %v157_v57 = vsel %vm56_vm0, %v139_v51, 0.0 }
  0x96   :  { %155 = vadd.xlane.f32.xlu0 %v154_v54  ;;  %v65_v55 = vpop.xlane.xlu0 %64  ;;  %v89_v56 = vpop.xlane.xlu1 %88 }
  0x97   :  { %v108_v58 = vmul.f32 0.03125, %v65_v55  ;;  %v116_v59 = vmul.f32 0.03125, %v89_v56  ;;  %v146_v60 = vmul.f32 %v1207_v52, %v1207_v52  ;;  %v147_v61 = vmul.f32 %v1211_v53, %v1211_v53 }
  0x99   :  { %v1221_v62 = vsub.f32 %v806_v12, %v108_v58  ;;  %v1225_v63 = vsub.f32 %v822_v13, %v116_v59  ;;  %v178_v0 = vsel %vm56_vm0, %v146_v60, 0.0  ;;  %v181_v3 = vsel %vm56_vm0, %v147_v61, 0.0 }
  0x9a   :  { %158 = vadd.xlane.f32.xlu0 %v157_v57  ;;  %179 = vadd.xlane.f32.xlu1 %v178_v0  ;;  %v68_v1 = vpop.xlane.xlu0 %67  ;;  %v92_v2 = vpop.xlane.xlu1 %91  ;;  %v521_v0 = vld [vmem:[%s1689_s4 + $0x8] sm:$0xff] }
  0x9b   :  { %v109_v4 = vmul.f32 0.03125, %v68_v1  ;;  %v117_v5 = vmul.f32 0.03125, %v92_v2  ;;  %v140_v8 = vmul.f32 %v1221_v62, %v1221_v62  ;;  %v148_v9 = vmul.f32 %v1225_v63, %v1225_v63  ;;  %v520_v1 = vld [vmem:[%s1689_s4] sm:$0xff] }
  0x9c   :  { %v833_v2 = vld [vmem:[%s1686_s1] sm:$0xff]  }
  0x9d   :  { %v1235_v10 = vsub.f32 %v807_v16, %v109_v4  ;;  %v1239_v11 = vsub.f32 %v823_v17, %v117_v5  ;;  %v160_v12 = vsel %vm56_vm0, %v140_v8, 0.0  ;;  %v184_v15 = vsel %vm56_vm0, %v148_v9, 0.0  ;;  %v874_v4 = vld [vmem:[%s1686_s1 + $0x20] sm:$0xff]  }
  0x9e   :  { %182 = vadd.xlane.f32.xlu1 %v181_v3  ;;  %161 = vadd.xlane.f32.xlu0 %v160_v12  ;;  %v71_v13 = vpop.xlane.xlu0 %70  ;;  %v95_v14 = vpop.xlane.xlu1 %94  ;;  %v1320_v3 = vunpack.c.l.bf16 %v833_v2  ;;  %v1325_v5 = vunpack.c.h.bf16 %v833_v2  ;;  %v1328_v9 = vunpack.c.l.bf16 %v874_v4  ;;  %v871_v12 = vld [vmem:[%s1686_s1 + $0x8] sm:$0xff]  }
  0x9f   :  { %v110_v20 = vmul.f32 0.03125, %v71_v13  ;;  %v118_v21 = vmul.f32 0.03125, %v95_v14  ;;  %v141_v24 = vmul.f32 %v1235_v10, %v1235_v10  ;;  %v149_v6 = vmul.f32 %v1239_v11, %v1239_v11 }
  0xa0   :  { %v344_v8 = vand.u32 2147483647, %v1320_v3  ;;  %v1333_v13 = vunpack.c.h.bf16 %v874_v4  ;;  %v345_v14 = vand.u32 2147483647, %v1325_v5  ;;  %vm408_vm1 = vcmp.ge.f32.partialorder %v1320_v3, 0.0 }
  0xa1   :  { %v1249_v7 = vsub.f32 %v810_v22, %v110_v20  ;;  %v1253_v16 = vsub.f32 %v826_v23, %v118_v21  ;;  %v163_v17 = vsel %vm56_vm0, %v141_v24, 0.0  ;;  %v187_v31 = vsel %vm56_vm0, %v149_v6, 0.0 }
  0xa2   :  { %185 = vadd.xlane.f32.xlu1 %v184_v15  ;;  %164 = vadd.xlane.f32.xlu0 %v163_v17  ;;  %v74_v25 = vpop.xlane.xlu0 %73  ;;  %v98_v30 = vpop.xlane.xlu1 %97  ;;  %v1336_v15 = vunpack.c.l.bf16 %v871_v12  ;;  %v360_v20 = vsub.f32 0.0, %v344_v8  ;;  %v352_v21 = vand.u32 2147483647, %v1328_v9  ;;  %v353_v24 = vand.u32 2147483647, %v1333_v13 }
  0xa3   :  { %v111_v34 = vmul.f32 0.03125, %v74_v25  ;;  %v119_v35 = vmul.f32 0.03125, %v98_v30  ;;  %v142_v38 = vmul.f32 %v1249_v7, %v1249_v7  ;;  %v150_v22 = vmul.f32 %v1253_v16, %v1253_v16 }
  0xa4   :  { %v361_v6 = vsub.f32 0.0, %v345_v14  ;;  %v346_v17 = vand.u32 2147483647, %v1336_v15  ;;  %v1341_v25 = vunpack.c.h.bf16 %v871_v12  ;;  %v376_v30 = vmul.f32 1.442695, %v360_v20 }
  0xa5   :  { %v1263_v23 = vsub.f32 %v811_v26, %v111_v34  ;;  %v1267_v39 = vsub.f32 %v827_v27, %v119_v35  ;;  %v166_v40 = vsel %vm56_vm0, %v142_v38, 0.0  ;;  %v190_v43 = vsel %vm56_vm0, %v150_v22, 0.0  ;;  %v875_v34 = vld [vmem:[%s1686_s1 + $0x28] sm:$0xff]  }
  0xa6   :  { %188 = vadd.xlane.f32.xlu1 %v187_v31  ;;  %167 = vadd.xlane.f32.xlu0 %v166_v40  ;;  %v77_v41 = vpop.xlane.xlu0 %76  ;;  %v101_v42 = vpop.xlane.xlu1 %100  ;;  %v368_v31 = vsub.f32 0.0, %v352_v21  ;;  %v369_v35 = vsub.f32 0.0, %v353_v24  ;;  %v378_v38 = vmul.f32 1.442695, %v361_v6  ;;  %v362_v22 = vsub.f32 0.0, %v346_v17 }
  0xa7   :  { %v112_v46 = vmul.f32 0.03125, %v77_v41  ;;  %v120_v47 = vmul.f32 0.03125, %v101_v42  ;;  %v143_v48 = vmul.f32 %v1263_v23, %v1263_v23  ;;  %v151_v18 = vmul.f32 %v1267_v39, %v1267_v39 }
  0xa8   :  { %v347_v40 = vand.u32 2147483647, %v1341_v25  ;;  %941 = vpow2.f32 %v376_v30  ;;  %v392_v41 = vmul.f32 1.442695, %v368_v31  ;;  %v1347_v42 = vunpack.c.l.bf16 %v875_v34  ;;  %v877_v31 = vld [vmem:[%s1686_s1 + $0x38] sm:$0xff]  }
  0xa9   :  { %v1277_v19 = vsub.f32 %v814_v32, %v112_v46  ;;  %v1281_v26 = vsub.f32 %v830_v33, %v120_v47  ;;  %v169_v27 = vsel %vm56_vm0, %v143_v48, 0.0  ;;  %v193_v51 = vsel %vm56_vm0, %v151_v18, 0.0  ;;  %v872_v46 = vld [vmem:[%s1686_s1 + $0x10] sm:$0xff]  }
  0xaa   :  { %191 = vadd.xlane.f32.xlu1 %v190_v43  ;;  %170 = vadd.xlane.f32.xlu0 %v169_v27  ;;  %v80_v49 = vpop.xlane.xlu0 %79  ;;  %v104_v50 = vpop.xlane.xlu1 %103  ;;  %v394_v43 = vmul.f32 1.442695, %v369_v35  ;;  %943 = vpow2.f32 %v378_v38  ;;  %v380_v47 = vmul.f32 1.442695, %v362_v22  ;;  %v363_v48 = vsub.f32 0.0, %v347_v40 }
  0xab   :  { %v113_v54 = vmul.f32 0.03125, %v80_v49  ;;  %v121_v55 = vmul.f32 0.03125, %v104_v50  ;;  %v144_v56 = vmul.f32 %v1277_v19, %v1277_v19  ;;  %v152_v32 = vmul.f32 %v1281_v26, %v1281_v26 }
  0xac   :  { %945 = vpow2.f32 %v392_v41  ;;  %v354_v18 = vand.u32 2147483647, %v1347_v42  ;;  %v1353_v27 = vunpack.c.l.bf16 %v872_v46  ;;  %v382_v49 = vmul.f32 1.442695, %v363_v48 }
  0xad   :  { %v1291_v33 = vsub.f32 %v815_v36, %v113_v54  ;;  %v1295_v57 = vsub.f32 %v831_v37, %v121_v55  ;;  %v172_v58 = vsel %vm56_vm0, %v144_v56, 0.0  ;;  %v196_v59 = vsel %vm56_vm0, %v152_v32, 0.0  ;;  %v523_v36 = vld [vmem:[%s1689_s4 + $0x18] sm:$0xff]  ;;  %v522_v37 = vld [vmem:[%s1689_s4 + $0x10] sm:$0xff] }
  0xae   :  { %194 = vadd.xlane.f32.xlu1 %v193_v51  ;;  %173 = vadd.xlane.f32.xlu0 %v172_v58  ;;  %947 = vpow2.f32 %v394_v43  ;;  %v1355_v50 = vunpack.c.h.bf16 %v875_v34  ;;  %v370_v51 = vsub.f32 0.0, %v354_v18  ;;  %v348_v54 = vand.u32 2147483647, %v1353_v27  ;;  %v876_v55 = vld [vmem:[%s1686_s1 + $0x30] sm:$0xff]  }
  0xaf   :  { %v145_v60 = vmul.f32 %v1291_v33, %v1291_v33  ;;  %v153_v61 = vmul.f32 %v1295_v57, %v1295_v57  ;;  %898 = vmatprep.subr.mxu0 %v523_v36  ;;  %930 = vmatprep.subr.mxu1 %v523_v36  ;;  %949 = vpow2.f32 %v380_v47  ;;  %v1362_v58 = vunpack.c.h.bf16 %v872_v46 }
  0xb0   :  { %899 = vmatpush3.msra.mxu0 %v523_v36  ;;  %934 = vmatpush3.msra.mxu1 %v523_v36  ;;  %951 = vpow2.f32 %v382_v49  ;;  %v355_v56 = vand.u32 2147483647, %v1355_v50  ;;  %v396_v32 = vmul.f32 1.442695, %v370_v51  ;;  %v1380_v12 = vunpack.c.h.bf16 %v876_v55 }
  0xb1   :  { %v175_v28 = vsel %vm56_vm0, %v145_v60, 0.0  ;;  %v199_v29 = vsel %vm56_vm0, %v153_v61, 0.0  ;;  %900 = vmatprep.subr.mxu0 %v522_v37  ;;  %931 = vmatprep.subr.mxu1 %v522_v37  ;;  %v364_v60 = vsub.f32 0.0, %v348_v54  ;;  %v1366_v61 = vunpack.c.l.bf16 %v876_v55 }
  0xb2   :  { %197 = vadd.xlane.f32.xlu1 %v196_v59  ;;  %176 = vadd.xlane.f32.xlu0 %v175_v28  ;;  %v873_v28 = vld [vmem:[%s1686_s1 + $0x18] sm:$0xff]   ;;  %953 = vpow2.f32 %v396_v32  ;;  %v357_v35 = vand.u32 2147483647, %v1380_v12  ;;  %v1397_v41 = vunpack.c.l.bf16 %v877_v31  ;;  %vm409_vm2 = vcmp.ge.f32.partialorder %v1325_v5, 0.0 }
  0xb3   :  { %901 = vmatpush3.msra.mxu0 %v522_v37  ;;  %935 = vmatpush3.msra.mxu1 %v522_v37  ;;  %v384_v4 = vmul.f32 1.442695, %v364_v60  ;;  %v356_v8 = vand.u32 2147483647, %v1366_v61  ;;  %v1393_v38 = vunpack.c.h.bf16 %v873_v28  ;;  %vm416_vm3 = vcmp.ge.f32.partialorder %v1328_v9, 0.0 }
  0xb4   :  { %902 = vmatprep.subr.mxu0 %v521_v0  ;;  %932 = vmatprep.subr.mxu1 %v521_v0  ;;  %v373_v18 = vsub.f32 0.0, %v357_v35  ;;  %v358_v54 = vand.u32 2147483647, %v1397_v41  ;;  %vm417_vm4 = vcmp.ge.f32.partialorder %v1333_v13, 0.0  ;;  %vm410_vm5 = vcmp.ge.f32.partialorder %v1336_v15, 0.0 }
  0xb5   :  { %903 = vmatpush3.msra.mxu0 %v521_v0  ;;  %936 = vmatpush3.msra.mxu1 %v521_v0  ;;  %v1364_v59 = vpop.eup %941  ;;  %v349_v0 = vand.u32 2147483647, %v1362_v58  ;;  %v372_v34 = vsub.f32 0.0, %v356_v8  ;;  %v351_v49 = vand.u32 2147483647, %v1393_v38  ;;  %vm411_vm6 = vcmp.ge.f32.partialorder %v1341_v25, 0.0 }
  0xb6   :  { %200 = vadd.xlane.f32.xlu1 %v199_v29  ;;  %904 = vmatprep.subr.mxu0 %v520_v1  ;;  %v371_v29 = vsub.f32 0.0, %v355_v56  ;;  %v440_v37 = vadd.f32 1.0, %v1364_v59  ;;  %v402_v32 = vmul.f32 1.442695, %v373_v18  ;;  %vm418_vm7 = vcmp.ge.f32.partialorder %v1347_v42, 0.0 }
  0xb7   :  { %933 = vmatprep.subr.mxu1 %v520_v1  ;;  %905 = vmatpush3.msra.mxu0 %v520_v1  ;;  %v1371_v36 = vpop.eup %943  ;;  %v365_v17 = vsub.f32 0.0, %v349_v0  ;;  %v400_v48 = vmul.f32 1.442695, %v372_v34  ;;  %v367_v60 = vsub.f32 0.0, %v351_v49  ;;  %vm412_vm8 = vcmp.ge.f32.partialorder %v1353_v27, 0.0 }
  0xb8   :  { %937 = vmatpush3.msra.mxu1 %v520_v1  ;;  %v1375_v1 = vunpack.c.l.bf16 %v873_v28  ;;  %v441_v20 = vadd.f32 1.0, %v1371_v36  ;;  %v398_v21 = vmul.f32 1.442695, %v371_v29  ;;  %955 = vrcp.f32 %v440_v37 }
  0xb9   :  { %v1377_v2 = vpop.eup %945  ;;  %957 = vpow2.f32 %v384_v4  ;;  %v386_v46 = vmul.f32 1.442695, %v365_v17  ;;  %v1406_v28 = vunpack.c.h.bf16 %v877_v31  ;;  %v374_v29 = vsub.f32 0.0, %v358_v54 }
  0xba   :  { %v448_v6 = vadd.f32 1.0, %v1377_v2  ;;  %v350_v30 = vand.u32 2147483647, %v1375_v1  ;;  %959 = vrcp.f32 %v441_v20  ;;  %v390_v8 = vmul.f32 1.442695, %v367_v60 }
  0xbb   :  { %v1382_v14 = vpop.eup %947  ;;  %961 = vpow2.f32 %v398_v21  ;;  %v359_v20 = vand.u32 2147483647, %v1406_v28  ;;  %v424_v17 = vsel %vm408_vm1, 1.0, %v1364_v59  ;;  %v425_v35 = vsel %vm409_vm2, 1.0, %v1371_v36 }
  0xbc   :  { %v1385_v24 = vpop.eup %949  ;;  %v449_v22 = vadd.f32 1.0, %v1382_v14  ;;  %v366_v47 = vsub.f32 0.0, %v350_v30  ;;  %963 = vrcp.f32 %v448_v6  ;;  %v404_v30 = vmul.f32 1.442695, %v374_v29 }
  0xbd   :  { %v442_v40 = vadd.f32 1.0, %v1385_v24  ;;  %v1399_v43 = vpop.eup %951  ;;  %v375_v18 = vsub.f32 0.0, %v359_v20  ;;  %v432_v36 = vsel %vm416_vm3, 1.0, %v1377_v2  ;;  %vm419_vm9 = vcmp.ge.f32.partialorder %v1355_v50, 0.0 }
  0xbe   :  { %965 = vrcp.f32 %v449_v22  ;;  %v443_v51 = vadd.f32 1.0, %v1399_v43  ;;  %v388_v55 = vmul.f32 1.442695, %v366_v47  ;;  %vm413_vm10 = vcmp.ge.f32.partialorder %v1362_v58, 0.0 }
  0xbf   :  { %967 = vrcp.f32 %v442_v40  ;;  %v1404_v56 = vpop.eup %953  ;;  %vm420_vm11 = vcmp.ge.f32.partialorder %v1366_v61, 0.0  ;;  %vm421_vm12 = vcmp.ge.f32.partialorder %v1380_v12, 0.0  ;;  %vm414_vm13 = vcmp.ge.f32.partialorder %v1375_v1, 0.0 }
  0xc0   :  { %969 = vpow2.f32 %v386_v46  ;;  %v450_v37 = vadd.f32 1.0, %v1404_v56  ;;  %vm422_vm14 = vcmp.ge.f32.partialorder %v1397_v41, 0.0  ;;  %vm415_vm15 = vcmp.ge.f32.partialorder %v1393_v38, 0.0 }
  0xc1   :  { %971 = vpow2.f32 %v400_v48  ;;  %vm423_vm1 = vcmp.ge.f32.partialorder %v1406_v28, 0.0  ;;  %vm749_vm2 = vcmask 130048  }
  0xc2   :  { %973 = vrcp.f32 %v443_v51 }
  0xc3   :  { %975 = vpow2.f32 %v388_v55 }
  0xc4   :  { %977 = vpow2.f32 %v402_v32  ;;  %v433_v32 = vsel %vm417_vm4, 1.0, %v1382_v14 }
  0xc5   :  { %v956_v0 = vpop.eup %955  ;;  %979 = vrcp.f32 %v450_v37 }
  0xc6   :  { %v1412_v21 = vpop.eup %957  ;;  %v457_v47 = vmul.f32 %v956_v0, %v424_v17  ;;  %981 = vpow2.f32 %v390_v8  ;;  %v406_v17 = vmul.f32 1.442695, %v375_v18 }
  0xc7   :  { %v960_v31 = vpop.eup %959  ;;  %v444_v48 = vadd.f32 1.0, %v1412_v21 }
  0xc8   :  { %v1418_v22 = vpop.eup %961  ;;  %v459_v55 = vmul.f32 %v960_v31, %v425_v35  ;;  %v1433_v20 = vmul.f32 %v1320_v3, %v457_v47  ;;  %v427_v3 = vsel %vm411_vm6, 1.0, %v1399_v43 }
  0xc9   :  { %v964_v59 = vpop.eup %963  ;;  %v451_v0 = vadd.f32 1.0, %v1418_v22 }
  0xca   :  { %v1441_v35 = vmul.f32 %v1325_v5, %v459_v55 }
  0xcb   :  { %v966_v54 = vpop.eup %965 }
  0xcc   :  { %v968_v60 = vpop.eup %967 }
 0x11f   :  { %v156_v4 = vpop.xlane.xlu0 %155 }
 0x120   :  { %v202_v6 = vmul.f32 0.03125, %v156_v4  ;;  %v1430_v4 = vpop.eup %969 }
 0x121   :  { %v1435_v31 = vpop.eup %971  ;;  %v445_v18 = vadd.f32 1.0, %v1430_v4 }
 0x122   :  { %v218_v34 = vadd.f32 1e-05, %v202_v6  ;;  %v473_v6 = vmul.f32 %v964_v59, %v432_v36  ;;  %v452_v36 = vadd.f32 1.0, %v1435_v31 }
 0x123   :  { %v180_v40 = vpop.xlane.xlu1 %179  ;;  %v159_v46 = vpop.xlane.xlu0 %158 }
 0x124   :  { %983 = vrsqrt.f32 %v218_v34  ;;  %v210_v49 = vmul.f32 0.03125, %v180_v40  ;;  %v203_v51 = vmul.f32 0.03125, %v159_v46  ;;  %v426_v34 = vsel %vm410_vm5, 1.0, %v1385_v24  ;;  %v974_v46 = vpop.eup %973 }
 0x125   :  { %985 = vpow2.f32 %v404_v30  ;;  %v475_v40 = vmul.f32 %v966_v54, %v433_v32  ;;  %v1447_v59 = vpop.eup %975  ;;  %v1450_v24 = vmul.f32 %v1328_v9, %v473_v6  ;;  %v461_v5 = vmul.f32 %v968_v60, %v426_v34 }
 0x126   :  { %v226_v29 = vadd.f32 1e-05, %v210_v49  ;;  %v219_v37 = vadd.f32 1e-05, %v203_v51  ;;  %987 = vrcp.f32 %v444_v48  ;;  %v1453_v54 = vpop.eup %977  ;;  %v446_v60 = vadd.f32 1.0, %v1447_v59 }
 0x127   :  { %v183_v8 = vpop.xlane.xlu1 %182  ;;  %v162_v2 = vpop.xlane.xlu0 %161  ;;  %v1457_v32 = vmul.f32 %v1333_v13, %v475_v40  ;;  %v1462_v6 = vmul.f32 %v1336_v15, %v461_v5  ;;  %v453_v13 = vadd.f32 1.0, %v1453_v54 }
 0x128   :  { %989 = vrsqrt.f32 %v226_v29  ;;  %v211_v14 = vmul.f32 0.03125, %v183_v8  ;;  %v204_v30 = vmul.f32 0.03125, %v162_v2  ;;  %v463_v29 = vmul.f32 %v974_v46, %v427_v3  ;;  %v1472_v3 = vld [vmem:[%s1687_s2] ss:$0 sm:$0xff] }
 0x129   :  { %991 = vrsqrt.f32 %v219_v37 }
 0x12a   :  { %v227_v47 = vadd.f32 1e-05, %v211_v14  ;;  %v220_v48 = vadd.f32 1e-05, %v204_v30  ;;  %993 = vrcp.f32 %v451_v0  ;;  %v980_v0 = vpop.eup %979  ;;  %v1475_v15 = vmul.f32 %v1341_v25, %v463_v29  ;;  %v1489_v25 = vld [vmem:[%s1688_s3] ss:$0 sm:$0xff] }
 0x12b   :  { %v186_v49 = vpop.xlane.xlu1 %185  ;;  %v165_v51 = vpop.xlane.xlu0 %164  ;;  %995 = vpow2.f32 %v406_v17  ;;  %v434_v17 = vsel %vm418_vm7, 1.0, %v1404_v56  ;;  %v1480_v56 = vsel %vm412_vm8, 1.0, %v1412_v21 }
 0x12c   :  { %997 = vrsqrt.f32 %v227_v47  ;;  %v212_v43 = vmul.f32 0.03125, %v186_v49  ;;  %v205_v55 = vmul.f32 0.03125, %v165_v51  ;;  %v1466_v14 = vpop.eup %981  ;;  %v477_v5 = vmul.f32 %v980_v0, %v434_v17 }
 0x12d   :  { %999 = vrsqrt.f32 %v220_v48  ;;  %v447_v21 = vadd.f32 1.0, %v1466_v14 }
 0x12e   :  { %v228_v9 = vadd.f32 1e-05, %v212_v43  ;;  %v221_v37 = vadd.f32 1e-05, %v205_v55  ;;  %1001 = vrcp.f32 %v445_v18 }
 0x12f   :  { %v189_v8 = vpop.xlane.xlu1 %188  ;;  %v168_v2 = vpop.xlane.xlu0 %167  ;;  %1003 = vrcp.f32 %v452_v36 }
 0x130   :  { %1005 = vrsqrt.f32 %v228_v9  ;;  %v213_v30 = vmul.f32 0.03125, %v189_v8  ;;  %v206_v34 = vmul.f32 0.03125, %v168_v2  ;;  %v435_v9 = vsel %vm419_vm9, 1.0, %v1418_v22 }
 0x131   :  { %v984_v40 = vpop.eup %983  ;;  %1007 = vrsqrt.f32 %v221_v37  ;;  %v1502_v37 = vsel %vm413_vm10, 1.0, %v1430_v4  ;;  %v1509_v22 = vmul.f32 %v1347_v42, %v477_v5  ;;  %v1514_v4 = vsel %vm420_vm11, 1.0, %v1435_v31 }
 0x132   :  { %v1483_v46 = vpop.eup %985  ;;  %v229_v47 = vadd.f32 1e-05, %v213_v30  ;;  %v222_v48 = vadd.f32 1e-05, %v206_v34  ;;  %v250_v18 = vmul.f32 %v984_v40, %v1197_v44  ;;  %1009 = vrcp.f32 %v446_v60 }
 0x133   :  { %v192_v49 = vpop.xlane.xlu1 %191  ;;  %v171_v51 = vpop.xlane.xlu0 %170  ;;  %1011 = vrcp.f32 %v453_v13  ;;  %v454_v60 = vadd.f32 1.0, %v1483_v46 }
 0x134   :  { %v1493_v36 = vpop.eup %987  ;;  %1013 = vrsqrt.f32 %v229_v47  ;;  %v214_v43 = vmul.f32 0.03125, %v192_v49  ;;  %v207_v55 = vmul.f32 0.03125, %v171_v51  ;;  %v273_v44 = vmul.f32 %v1472_v3, %v250_v18 }
 0x135   :  { %v990_v29 = vpop.eup %989  ;;  %1015 = vrsqrt.f32 %v222_v48 }
 0x136   :  { %v992_v0 = vpop.eup %991  ;;  %v230_v8 = vadd.f32 1e-05, %v214_v43  ;;  %v223_v2 = vadd.f32 1e-05, %v207_v55  ;;  %v296_v17 = vadd.f32 %v1489_v25, %v273_v44  ;;  %v258_v13 = vmul.f32 %v990_v29, %v1207_v52 }
 0x137   :  { %v994_v30 = vpop.eup %993  ;;  %v195_v34 = vpop.xlane.xlu1 %194  ;;  %v251_v47 = vmul.f32 %v992_v0, %v1199_v45  ;;  %1017 = vrcp.f32 %v447_v21 }
 0x138   :  { %v174_v40 = vpop.xlane.xlu0 %173  ;;  %v1516_v48 = vpop.eup %995  ;;  %1019 = vrsqrt.f32 %v230_v8  ;;  %v215_v18 = vmul.f32 0.03125, %v195_v34  ;;  %v504_v52 = vmul.f32 %v1433_v20, %v296_v17  ;;  %v281_v42 = vmul.f32 %v1472_v3, %v258_v13 }
 0x139   :  { %v208_v49 = vmul.f32 0.03125, %v174_v40  ;;  %v998_v51 = vpop.eup %997  ;;  %1021 = vrsqrt.f32 %v223_v2  ;;  %v274_v45 = vmul.f32 %v1472_v3, %v251_v47  ;;  %v455_v2 = vadd.f32 1.0, %v1516_v48 }
 0x13a   :  { %v1000_v5 = vpop.eup %999  ;;  %v231_v43 = vadd.f32 1e-05, %v215_v18  ;;  %906 = vmatprep.mubr.msk.f32.mxu0 %vm56_vm0, %v504_v52  ;;  %v259_v21 = vmul.f32 %v998_v51, %v1211_v53  ;;  %1023 = vrcp.f32 %v454_v60  ;;  %v304_v0 = vadd.f32 %v1489_v25, %v281_v42 }
 0x13b   :  { %v224_v31 = vadd.f32 1e-05, %v208_v49  ;;  %v1002_v55 = vpop.eup %1001  ;;  %v198_v44 = vpop.xlane.xlu1 %197  ;;  %v297_v20 = vadd.f32 %v1489_v25, %v274_v45  ;;  %v252_v8 = vmul.f32 %v1000_v5, %v1221_v62 }
 0x13c   :  { %v177_v29 = vpop.xlane.xlu0 %176  ;;  %v1004_v17 = vpop.eup %1003  ;;  %1025 = vrsqrt.f32 %v231_v43  ;;  %v216_v13 = vmul.f32 0.03125, %v198_v44  ;;  %v282_v53 = vmul.f32 %v1472_v3, %v259_v21  ;;  %v512_v47 = vmul.f32 %v1450_v24, %v304_v0 }
 0x13d   :  { %v209_v34 = vmul.f32 0.03125, %v177_v29  ;;  %v1006_v60 = vpop.eup %1005  ;;  %1027 = vrsqrt.f32 %v224_v31  ;;  %v505_v40 = vmul.f32 %v1441_v35, %v297_v20  ;;  %v275_v18 = vmul.f32 %v1472_v3, %v252_v8 }
 0x13e   :  { %v1008_v49 = vpop.eup %1007  ;;  %v232_v62 = vadd.f32 1e-05, %v216_v13  ;;  %v305_v51 = vadd.f32 %v1489_v25, %v282_v53  ;;  %v260_v45 = vmul.f32 %v1006_v60, %v1225_v63  ;;  %918 = vmatprep.mubr.msk.f32.mxu1 %vm56_vm0, %v512_v47  ;;  %v479_v24 = vmul.f32 %v994_v30, %v435_v9 }
 0x13f   :  { %v225_v52 = vadd.f32 1e-05, %v209_v34  ;;  %v1010_v42 = vpop.eup %1009  ;;  %907 = vmatmul.mubr.msk.f32.vlgmr.msra.gmra.mxu0 %vm56_vm0, %v505_v40  ;;  %v201_v5 = vpop.xlane.xlu1 %200  ;;  %v298_v43 = vadd.f32 %v1489_v25, %v275_v18  ;;  %v253_v35 = vmul.f32 %v1008_v49, %v1235_v10  ;;  %1029 = vrcp.f32 %v455_v2 }
 0x140   :  { %v1012_v31 = vpop.eup %1011  ;;  %1031 = vrsqrt.f32 %v232_v62  ;;  %v217_v21 = vmul.f32 0.03125, %v201_v5  ;;  %v513_v44 = vmul.f32 %v1457_v32, %v305_v51  ;;  %v283_v29 = vmul.f32 %v1472_v3, %v260_v45 }
 0x141   :  { %v1014_v63 = vpop.eup %1013  ;;  %1033 = vrsqrt.f32 %v225_v52  ;;  %v506_v20 = vmul.f32 %v1462_v6, %v298_v43  ;;  %v276_v0 = vmul.f32 %v1472_v3, %v253_v35  ;;  %v465_v8 = vmul.f32 %v1493_v36, %v1480_v56 }
 0x142   :  { %v1016_v13 = vpop.eup %1015  ;;  %v233_v10 = vadd.f32 1e-05, %v217_v21  ;;  %919 = vmatmul.mubr.msk.f32.vlgmr.msra.gmra.mxu1 %vm56_vm0, %v513_v44  ;;  %v306_v9 = vadd.f32 %v1489_v25, %v283_v29  ;;  %v261_v30 = vmul.f32 %v1014_v63, %v1239_v11  ;;  %v437_v32 = vsel %vm421_vm12, 1.0, %v1453_v54 }
 0x143   :  { %909 = vmatprep.mubr.msk.f32.mxu0 %vm56_vm0, %v506_v20  ;;  %v299_v6 = vadd.f32 %v1489_v25, %v276_v0  ;;  %v254_v2 = vmul.f32 %v1016_v13, %v1249_v7  ;;  %v499_v56 = vmul.f32 %v1355_v50, %v479_v24  ;;  %v481_v53 = vmul.f32 %v1004_v17, %v1514_v4 }
 0x144   :  { %v1018_v36 = vpop.eup %1017  ;;  %1035 = vrsqrt.f32 %v233_v10  ;;  %v514_v34 = vmul.f32 %v1509_v22, %v306_v9  ;;  %v284_v11 = vmul.f32 %v1472_v3, %v261_v30  ;;  %v492_v47 = vmul.f32 %v1353_v27, %v465_v8 }
 0x145   :  { %v1020_v60 = vpop.eup %1019  ;;  %v507_v54 = vmul.f32 %v1475_v15, %v299_v6  ;;  %v277_v40 = vmul.f32 %v1472_v3, %v254_v2  ;;  %v467_v7 = vmul.f32 %v1002_v55, %v1502_v37  ;;  %v430_v4 = vsel %vm414_vm13, 1.0, %v1447_v59 }
 0x146   :  { %v1022_v50 = vpop.eup %1021  ;;  %921 = vmatprep.mubr.msk.f32.mxu1 %vm56_vm0, %v514_v34  ;;  %v307_v18 = vadd.f32 %v1489_v25, %v284_v11  ;;  %v262_v22 = vmul.f32 %v1020_v60, %v1253_v16  ;;  %v438_v55 = vsel %vm422_vm14, 1.0, %v1483_v46  ;;  %v500_v59 = vmul.f32 %v1366_v61, %v481_v53 }
 0x147   :  { %v1024_v15 = vpop.eup %1023  ;;  %910 = vmatmul.mubr.msk.f32.gmra.mxu0 %vm56_vm0, %v507_v54  ;;  %v300_v27 = vadd.f32 %v1489_v25, %v277_v40  ;;  %v255_v37 = vmul.f32 %v1022_v50, %v1263_v23  ;;  %v483_v49 = vmul.f32 %v1012_v31, %v437_v32  ;;  %v493_v45 = vmul.f32 %v1362_v58, %v467_v7  ;;  %v725_v50 = vld [vmem:[%s1690_s5 + $0x40] sm:$0xff] }
 0x148   :  { %v515_v16 = vmul.f32 %v499_v56, %v307_v18  ;;  %v285_v17 = vmul.f32 %v1472_v3, %v262_v22  ;;  %v469_v5 = vmul.f32 %v1010_v42, %v430_v4  ;;  %v431_v35 = vsel %vm415_vm15, 1.0, %v1466_v14 }
 0x149   :  { %v1026_v62 = vpop.eup %1025  ;;  %v508_v52 = vmul.f32 %v492_v47, %v300_v27  ;;  %v278_v51 = vmul.f32 %v1472_v3, %v255_v37  ;;  %v439_v58 = vsel %vm423_vm1, 1.0, %v1516_v48  ;;  %v485_v44 = vmul.f32 %v1024_v15, %v438_v55  ;;  %v720_v15 = vld [vmem:[%s1690_s5 + $0x18] sm:$0xff]  ;;  %v719_v37 = vld [vmem:[%s1690_s5 + $0x10] sm:$0xff] }
 0x14a   :  { %v1028_v23 = vpop.eup %1027  ;;  %922 = vmatmul.mubr.msk.f32.gmra.mxu1 %vm56_vm0, %v515_v16  ;;  %v308_v46 = vadd.f32 %v1489_v25, %v285_v17  ;;  %v263_v43 = vmul.f32 %v1026_v62, %v1267_v39  ;;  %v501_v39 = vmul.f32 %v1380_v12, %v483_v49  ;;  %v494_v20 = vmul.f32 %v1375_v1, %v469_v5  ;;  %v728_v16 = vld [vmem:[%s1690_s5 + $0x58] sm:$0xff]  ;;  %v727_v62 = vld [vmem:[%s1690_s5 + $0x50] sm:$0xff]  ;;  %v722_v5 = vld [vmem:[%s1690_s5 + $0x28] sm:$0xff] }
 0x14b   :  { %912 = vmatprep.mubr.msk.f32.mxu0 %vm56_vm0, %v508_v52  ;;  %v301_v61 = vadd.f32 %v1489_v25, %v278_v51  ;;  %v256_v24 = vmul.f32 %v1028_v23, %v1277_v19  ;;  %v471_v0 = vmul.f32 %v1018_v36, %v431_v35  ;;  %v502_v30 = vmul.f32 %v1397_v41, %v485_v44  ;;  %v730_v35 = vld [vmem:[%s1690_s5 + $0x68] sm:$0xff]  ;;  %v724_v44 = vld [vmem:[%s1690_s5 + $0x38] sm:$0xff] }
 0x14c   :  { %v1030_v42 = vpop.eup %1029  ;;  %v516_v31 = vmul.f32 %v500_v59, %v308_v46  ;;  %v286_v21 = vmul.f32 %v1472_v3, %v263_v43  ;;  %v721_v46 = vld [vmem:[%s1690_s5 + $0x20] sm:$0xff] }
 0x14d   :  { %v1032_v29 = vpop.eup %1031  ;;  %v509_v63 = vmul.f32 %v493_v45, %v301_v61  ;;  %v279_v14 = vmul.f32 %v1472_v3, %v256_v24  ;;  %v487_v1 = vmul.f32 %v1030_v42, %v439_v58  ;;  %v495_v56 = vmul.f32 %v1393_v38, %v471_v0  ;;  %v729_v42 = vld [vmem:[%s1690_s5 + $0x60] sm:$0xff] }
 0x14e   :  { %v1034_v8 = vpop.eup %1033  ;;  %924 = vmatprep.mubr.msk.f32.mxu1 %vm56_vm0, %v516_v31  ;;  %v309_v19 = vadd.f32 %v1489_v25, %v286_v21  ;;  %v264_v48 = vmul.f32 %v1032_v29, %v1281_v26 }
 0x14f   :  { %913 = vmatmul.mubr.msk.f32.gmra.mxu0 %vm56_vm0, %v509_v63  ;;  %v302_v13 = vadd.f32 %v1489_v25, %v279_v14  ;;  %v257_v12 = vmul.f32 %v1034_v8, %v1291_v33  ;;  %v503_v11 = vmul.f32 %v1406_v28, %v487_v1  ;;  %v717_v28 = vld [vmem:[%s1690_s5] sm:$0xff]  ;;  %v723_v63 = vld [vmem:[%s1690_s5 + $0x30] sm:$0xff] }
 0x150   :  { %v517_v10 = vmul.f32 %v501_v39, %v309_v19  ;;  %v287_v9 = vmul.f32 %v1472_v3, %v264_v48  ;;  %v731_v48 = vld [vmem:[%s1690_s5 + $0x70] sm:$0xff] }
 0x151   :  { %v1036_v32 = vpop.eup %1035  ;;  %v510_v6 = vmul.f32 %v494_v20, %v302_v13  ;;  %v280_v2 = vmul.f32 %v1472_v3, %v257_v12  ;;  %v732_v20 = vld [vmem:[%s1690_s5 + $0x78] sm:$0xff] }
 0x152   :  { %925 = vmatmul.mubr.msk.f32.gmra.mxu1 %vm56_vm0, %v517_v10  ;;  %v310_v26 = vadd.f32 %v1489_v25, %v287_v9  ;;  %v265_v36 = vmul.f32 %v1036_v32, %v1295_v57  ;;  %v718_v57 = vld [vmem:[%s1690_s5 + $0x8] sm:$0xff] }
 0x153   :  { %915 = vmatprep.mubr.msk.f32.mxu0 %vm56_vm0, %v510_v6  ;;  %v303_v33 = vadd.f32 %v1489_v25, %v280_v2 }
 0x154   :  { %v518_v34 = vmul.f32 %v502_v30, %v310_v26  ;;  %v288_v41 = vmul.f32 %v1472_v3, %v265_v36 }
 0x155   :  { %v511_v53 = vmul.f32 %v495_v56, %v303_v33 }
 0x156   :  { %927 = vmatprep.mubr.msk.f32.mxu1 %vm56_vm0, %v518_v34  ;;  %v311_v38 = vadd.f32 %v1489_v25, %v288_v41  ;;  %v726_v25 = vld [vmem:[%s1690_s5 + $0x48] sm:$0xff] }
 0x157   :  { %916 = vmatmul.mubr.msk.f32.gmra.mxu0 %vm56_vm0, %v511_v53 }
 0x158   :  { %v519_v60 = vmul.f32 %v503_v11, %v311_v38 }
 0x15a   :  { %928 = vmatmul.mubr.msk.f32.gmra.mxu1 %vm56_vm0, %v519_v60 }
 0x1ff   :  { %v908_v54 = vpop.f32.mrf.mxu0 }
 0x200   :  { %v734_v3 = vadd.f32 %v908_v54, %v718_v57 }
 0x201   :  { %v638_v40 = vpop.f32.mrf.mxu0 }
 0x202   :  { %751 = vst.msk [vmem:[#allocation2 + $0x8] sm:$0xff] %vm749_vm2, %v734_v3  ;;  %v733_v47 = vadd.f32 %v717_v28, %v638_v40  ;;  %v920_v7 = vpop.f32.mrf.mxu1 }
 0x203   :  { %v742_v18 = vadd.f32 %v920_v7, %v726_v25 }
 0x204   :  { %750 = vst.msk [vmem:[#allocation2] sm:$0xff] %vm749_vm2, %v733_v47  ;;  %v678_v22 = vpop.f32.mrf.mxu1 }
 0x205   :  { %759 = vst.msk [vmem:[#allocation2 + $0x48] sm:$0xff] %vm749_vm2, %v742_v18  ;;  %v741_v4 = vadd.f32 %v725_v50, %v678_v22 }
 0x207   :  { %758 = vst.msk [vmem:[#allocation2 + $0x40] sm:$0xff] %vm749_vm2, %v741_v4  ;;  %v911_v27 = vpop.f32.mrf.mxu0 }
 0x208   :  { %v736_v55 = vadd.f32 %v911_v27, %v720_v15 }
 0x209   :  { %v648_v17 = vpop.f32.mrf.mxu0 }
 0x20a   :  { %753 = vst.msk [vmem:[#allocation2 + $0x18] sm:$0xff] %vm749_vm2, %v736_v55  ;;  %v735_v59 = vadd.f32 %v719_v37, %v648_v17  ;;  %v923_v49 = vpop.f32.mrf.mxu1 }
 0x20b   :  { %v744_v52 = vadd.f32 %v923_v49, %v728_v16 }
 0x20c   :  { %752 = vst.msk [vmem:[#allocation2 + $0x10] sm:$0xff] %vm749_vm2, %v735_v59  ;;  %v688_v51 = vpop.f32.mrf.mxu1 }
 0x20d   :  { %761 = vst.msk [vmem:[#allocation2 + $0x58] sm:$0xff] %vm749_vm2, %v744_v52  ;;  %v743_v45 = vadd.f32 %v727_v62, %v688_v51 }
 0x20f   :  { %760 = vst.msk [vmem:[#allocation2 + $0x50] sm:$0xff] %vm749_vm2, %v743_v45  ;;  %v914_v23 = vpop.f32.mrf.mxu0 }
 0x210   :  { %v738_v43 = vadd.f32 %v914_v23, %v722_v5 }
 0x211   :  { %v658_v61 = vpop.f32.mrf.mxu0 }
 0x212   :  { %755 = vst.msk [vmem:[#allocation2 + $0x28] sm:$0xff] %vm749_vm2, %v738_v43  ;;  %v737_v24 = vadd.f32 %v721_v46, %v658_v61  ;;  %v926_v58 = vpop.f32.mrf.mxu1 }
 0x213   :  { %v746_v31 = vadd.f32 %v926_v58, %v730_v35 }
 0x214   :  { %754 = vst.msk [vmem:[#allocation2 + $0x20] sm:$0xff] %vm749_vm2, %v737_v24  ;;  %v698_v21 = vpop.f32.mrf.mxu1 }
 0x215   :  { %763 = vst.msk [vmem:[#allocation2 + $0x68] sm:$0xff] %vm749_vm2, %v746_v31  ;;  %v745_v39 = vadd.f32 %v729_v42, %v698_v21 }
 0x217   :  { %762 = vst.msk [vmem:[#allocation2 + $0x60] sm:$0xff] %vm749_vm2, %v745_v39  ;;  %v917_v29 = vpop.f32.mrf.mxu0 }
 0x218   :  { %v740_v14 = vadd.f32 %v917_v29, %v724_v44 }
 0x219   :  { %v668_v0 = vpop.f32.mrf.mxu0 }
 0x21a   :  { %757 = vst.msk [vmem:[#allocation2 + $0x38] sm:$0xff] %vm749_vm2, %v740_v14  ;;  %v739_v8 = vadd.f32 %v723_v63, %v668_v0  ;;  %v929_v19 = vpop.f32.mrf.mxu1 }
 0x21b   :  { %v748_v13 = vadd.f32 %v929_v19, %v732_v20 }
 0x21c   :  { %756 = vst.msk [vmem:[#allocation2 + $0x30] sm:$0xff] %vm749_vm2, %v739_v8  ;;  %v708_v12 = vpop.f32.mrf.mxu1 }
 0x21d   :  { %765 = vst.msk [vmem:[#allocation2 + $0x78] sm:$0xff] %vm749_vm2, %v748_v13  ;;  %v747_v10 = vadd.f32 %v731_v48, %v708_v12 }
 0x21f   :  { %764 = vst.msk [vmem:[#allocation2 + $0x70] sm:$0xff] %vm749_vm2, %v747_v10 }
 0x220   :  { %1048 = shalt.err (!%p1045_p4)
}
 0x221   :  { %s1060_s5 = smov 128   ;;  %s1061_s17 = smov 8  }
 0x222   :  { %777 = dma.vmem_to_hbm [thread:$0]  %s772_s15, 2048, %s1691_s6, [#allocation3], %s1060_s5, %s1060_s5, %s1061_s17  }
 0x223   :  { %1057 = dma.done.wait [#allocation3], 2048  }
 0x224   :  { %1058 = vsyncadd [#allocation3], 4294965248 }
 0x225   :  { %781 = vsyncpa [#allocation3], 1 }

// kernel: _lambda_.12
= control target key start
LH: loop header
LB: loop body
LE: loop exit
PB: predicated region body
PF: predicated region fallthrough
CT: control target
= control target key end

     0   :  { %vm35_vm0 = vcmask 130048   ;;  %vm550_vm1 = vcmask 257024   ;;  %s772_s6 = smov 96   ;;  %s1211_s0 = inlined_call_operand.vmem [shape: f32[128,16], index: 0, kind: input, shape index: {}]   ;;  %s1212_s3 = inlined_call_operand.vmem [shape: f32[16,64], index: 3, kind: input, shape index: {}]   ;;  %s1213_s1 = inlined_call_operand.vmem [shape: f32[1,16], index: 1, kind: input, shape index: {}]   ;;  %s1214_s2 = inlined_call_operand.vmem [shape: f32[1,16], index: 2, kind: input, shape index: {}]   ;;  %s1215_s4 = inlined_call_operand.vmem [shape: bf16[128,32], index: 4, kind: output, shape index: {0}]   ;;  %s1216_s5 = inlined_call_operand.vmem [shape: bf16[128,32], index: 5, kind: output, shape index: {1}]  }
   0x1   :  { %v19_v0 = vld [vmem:[%s1211_s0] sm:$0xff]  ;;  %v20_v1 = vld [vmem:[%s1211_s0 + $0x8] sm:$0xff]  ;;  %v21_v8 = vld [vmem:[%s1211_s0 + $0x10] sm:$0xff] }
   0x2   :  { %v27_v2 = vld [vmem:[%s1211_s0 + $0x40] sm:$0xff]  ;;  %v36_v3 = vsel %vm35_vm0, %v19_v0, 0.0  ;;  %v39_v4 = vsel %vm35_vm0, %v20_v1, 0.0  ;;  %v28_v5 = vld [vmem:[%s1211_s0 + $0x48] sm:$0xff]  ;;  %v29_v9 = vld [vmem:[%s1211_s0 + $0x50] sm:$0xff]  ;;  %v42_v10 = vsel %vm35_vm0, %v21_v8, 0.0 }
   0x3   :  { %37 = vadd.xlane.f32.xlu0 %v36_v3  ;;  %40 = vadd.xlane.f32.xlu1 %v39_v4  ;;  %v60_v6 = vsel %vm35_vm0, %v27_v2, 0.0  ;;  %v63_v7 = vsel %vm35_vm0, %v28_v5, 0.0  ;;  %v66_v11 = vsel %vm35_vm0, %v29_v9, 0.0  ;;  %v830_v12 = vld [vmem:[%s1211_s0 + $0x18] sm:$0xff]  ;;  %v844_v16 = vld [vmem:[%s1211_s0 + $0x20] sm:$0xff]  ;;  %v858_v20 = vld [vmem:[%s1211_s0 + $0x28] sm:$0xff] }
   0x4   :  { %v835_v13 = vld [vmem:[%s1211_s0 + $0x58] sm:$0xff]  ;;  %v45_v14 = vsel %vm35_vm0, %v830_v12, 0.0  ;;  %v849_v17 = vld [vmem:[%s1211_s0 + $0x60] sm:$0xff]  ;;  %v48_v18 = vsel %vm35_vm0, %v844_v16, 0.0  ;;  %v863_v21 = vld [vmem:[%s1211_s0 + $0x68] sm:$0xff]  ;;  %v51_v22 = vsel %vm35_vm0, %v858_v20, 0.0 }
   0x5   :  { %v69_v15 = vsel %vm35_vm0, %v835_v13, 0.0  ;;  %v72_v19 = vsel %vm35_vm0, %v849_v17, 0.0  ;;  %v75_v23 = vsel %vm35_vm0, %v863_v21, 0.0  ;;  %v872_v24 = vld [vmem:[%s1211_s0 + $0x30] sm:$0xff]  ;;  %v886_v28 = vld [vmem:[%s1211_s0 + $0x38] sm:$0xff] }
   0x6   :  { %v877_v25 = vld [vmem:[%s1211_s0 + $0x70] sm:$0xff]  ;;  %v54_v26 = vsel %vm35_vm0, %v872_v24, 0.0  ;;  %v891_v29 = vld [vmem:[%s1211_s0 + $0x78] sm:$0xff]  ;;  %v57_v30 = vsel %vm35_vm0, %v886_v28, 0.0 }
   0x7   :  { %61 = vadd.xlane.f32.xlu0 %v60_v6  ;;  %64 = vadd.xlane.f32.xlu1 %v63_v7  ;;  %v78_v27 = vsel %vm35_vm0, %v877_v25, 0.0  ;;  %v81_v31 = vsel %vm35_vm0, %v891_v29, 0.0 }
   0xb   :  { %43 = vadd.xlane.f32.xlu0 %v42_v10  ;;  %67 = vadd.xlane.f32.xlu1 %v66_v11 }
   0xf   :  { %46 = vadd.xlane.f32.xlu0 %v45_v14  ;;  %70 = vadd.xlane.f32.xlu1 %v69_v15 }
  0x13   :  { %49 = vadd.xlane.f32.xlu0 %v48_v18  ;;  %73 = vadd.xlane.f32.xlu1 %v72_v19 }
  0x17   :  { %52 = vadd.xlane.f32.xlu0 %v51_v22  ;;  %76 = vadd.xlane.f32.xlu1 %v75_v23 }
  0x1b   :  { %55 = vadd.xlane.f32.xlu0 %v54_v26  ;;  %79 = vadd.xlane.f32.xlu1 %v78_v27 }
  0x1f   :  { %58 = vadd.xlane.f32.xlu0 %v57_v30  ;;  %82 = vadd.xlane.f32.xlu1 %v81_v31 }
  0x8c   :  { %v38_v32 = vpop.xlane.xlu0 %37  ;;  %v41_v33 = vpop.xlane.xlu1 %40 }
  0x8d   :  { %v85_v34 = vmul.f32 0.0625, %v38_v32  ;;  %v86_v35 = vmul.f32 0.0625, %v41_v33 }
  0x8f   :  { %v897_v36 = vsub.f32 %v19_v0, %v85_v34  ;;  %v899_v37 = vsub.f32 %v20_v1, %v86_v35 }
  0x90   :  { %v62_v38 = vpop.xlane.xlu0 %61  ;;  %v65_v39 = vpop.xlane.xlu1 %64 }
  0x91   :  { %v93_v40 = vmul.f32 0.0625, %v62_v38  ;;  %v94_v41 = vmul.f32 0.0625, %v65_v39  ;;  %v117_v42 = vmul.f32 %v897_v36, %v897_v36  ;;  %v118_v43 = vmul.f32 %v899_v37, %v899_v37 }
  0x93   :  { %v905_v44 = vsub.f32 %v27_v2, %v93_v40  ;;  %v907_v45 = vsub.f32 %v28_v5, %v94_v41  ;;  %v133_v46 = vsel %vm35_vm0, %v117_v42, 0.0  ;;  %v136_v49 = vsel %vm35_vm0, %v118_v43, 0.0 }
  0x94   :  { %134 = vadd.xlane.f32.xlu0 %v133_v46  ;;  %v44_v47 = vpop.xlane.xlu0 %43  ;;  %v68_v48 = vpop.xlane.xlu1 %67 }
  0x95   :  { %v87_v50 = vmul.f32 0.0625, %v44_v47  ;;  %v95_v51 = vmul.f32 0.0625, %v68_v48  ;;  %v125_v52 = vmul.f32 %v905_v44, %v905_v44  ;;  %v126_v53 = vmul.f32 %v907_v45, %v907_v45 }
  0x97   :  { %v915_v54 = vsub.f32 %v21_v8, %v87_v50  ;;  %v917_v55 = vsub.f32 %v29_v9, %v95_v51  ;;  %v157_v56 = vsel %vm35_vm0, %v125_v52, 0.0  ;;  %v160_v59 = vsel %vm35_vm0, %v126_v53, 0.0  ;;  %v291_v53 = vld [vmem:[%s1212_s3] sm:$0xff] }
  0x98   :  { %137 = vadd.xlane.f32.xlu0 %v136_v49  ;;  %158 = vadd.xlane.f32.xlu1 %v157_v56  ;;  %v47_v57 = vpop.xlane.xlu0 %46  ;;  %v71_v58 = vpop.xlane.xlu1 %70 }
  0x99   :  { %v88_v60 = vmul.f32 0.0625, %v47_v57  ;;  %v96_v61 = vmul.f32 0.0625, %v71_v58  ;;  %v119_v62 = vmul.f32 %v915_v54, %v915_v54  ;;  %v127_v63 = vmul.f32 %v917_v55, %v917_v55 }
  0x9b   :  { %v926_v0 = vsub.f32 %v830_v12, %v88_v60  ;;  %v929_v1 = vsub.f32 %v835_v13, %v96_v61  ;;  %v139_v2 = vsel %vm35_vm0, %v119_v62, 0.0  ;;  %v163_v5 = vsel %vm35_vm0, %v127_v63, 0.0 }
  0x9c   :  { %161 = vadd.xlane.f32.xlu1 %v160_v59  ;;  %140 = vadd.xlane.f32.xlu0 %v139_v2  ;;  %v50_v3 = vpop.xlane.xlu0 %49  ;;  %v74_v4 = vpop.xlane.xlu1 %73 }
  0x9d   :  { %v89_v6 = vmul.f32 0.0625, %v50_v3  ;;  %v97_v7 = vmul.f32 0.0625, %v74_v4  ;;  %v120_v8 = vmul.f32 %v926_v0, %v926_v0  ;;  %v128_v9 = vmul.f32 %v929_v1, %v929_v1 }
  0x9f   :  { %v938_v10 = vsub.f32 %v844_v16, %v89_v6  ;;  %v941_v11 = vsub.f32 %v849_v17, %v97_v7  ;;  %v142_v12 = vsel %vm35_vm0, %v120_v8, 0.0  ;;  %v166_v15 = vsel %vm35_vm0, %v128_v9, 0.0 }
  0xa0   :  { %164 = vadd.xlane.f32.xlu1 %v163_v5  ;;  %143 = vadd.xlane.f32.xlu0 %v142_v12  ;;  %v53_v13 = vpop.xlane.xlu0 %52  ;;  %v77_v14 = vpop.xlane.xlu1 %76 }
  0xa1   :  { %v90_v18 = vmul.f32 0.0625, %v53_v13  ;;  %v98_v19 = vmul.f32 0.0625, %v77_v14  ;;  %v121_v22 = vmul.f32 %v938_v10, %v938_v10  ;;  %v129_v16 = vmul.f32 %v941_v11, %v941_v11 }
  0xa3   :  { %v950_v23 = vsub.f32 %v858_v20, %v90_v18  ;;  %v953_v17 = vsub.f32 %v863_v21, %v98_v19  ;;  %v145_v26 = vsel %vm35_vm0, %v121_v22, 0.0  ;;  %v169_v31 = vsel %vm35_vm0, %v129_v16, 0.0 }
  0xa4   :  { %167 = vadd.xlane.f32.xlu1 %v166_v15  ;;  %146 = vadd.xlane.f32.xlu0 %v145_v26  ;;  %v56_v27 = vpop.xlane.xlu0 %55  ;;  %v80_v30 = vpop.xlane.xlu1 %79 }
  0xa5   :  { %v91_v32 = vmul.f32 0.0625, %v56_v27  ;;  %v99_v33 = vmul.f32 0.0625, %v80_v30  ;;  %v122_v34 = vmul.f32 %v950_v23, %v950_v23  ;;  %v130_v20 = vmul.f32 %v953_v17, %v953_v17  ;;  %v996_v30 = vld [vmem:[%s1213_s1] ss:$0 sm:$0xff] }
  0xa7   :  { %v962_v35 = vsub.f32 %v872_v24, %v91_v32  ;;  %v965_v21 = vsub.f32 %v877_v25, %v99_v33  ;;  %v148_v38 = vsel %vm35_vm0, %v122_v34, 0.0  ;;  %v172_v41 = vsel %vm35_vm0, %v130_v20, 0.0 }
  0xa8   :  { %170 = vadd.xlane.f32.xlu1 %v169_v31  ;;  %149 = vadd.xlane.f32.xlu0 %v148_v38  ;;  %v59_v39 = vpop.xlane.xlu0 %58  ;;  %v83_v40 = vpop.xlane.xlu1 %82  ;;  %v1002_v38 = vld [vmem:[%s1214_s2] ss:$0 sm:$0xff] }
  0xa9   :  { %v92_v42 = vmul.f32 0.0625, %v59_v39  ;;  %v100_v43 = vmul.f32 0.0625, %v83_v40  ;;  %v123_v46 = vmul.f32 %v962_v35, %v962_v35  ;;  %v131_v24 = vmul.f32 %v965_v21, %v965_v21 }
  0xab   :  { %v974_v47 = vsub.f32 %v886_v28, %v92_v42  ;;  %v977_v25 = vsub.f32 %v891_v29, %v100_v43  ;;  %v151_v48 = vsel %vm35_vm0, %v123_v46, 0.0  ;;  %v175_v49 = vsel %vm35_vm0, %v131_v24, 0.0  ;;  %v292_v29 = vld [vmem:[%s1212_s3 + $0x8] sm:$0xff] }
  0xac   :  { %173 = vadd.xlane.f32.xlu1 %v172_v41  ;;  %152 = vadd.xlane.f32.xlu0 %v151_v48 }
  0xad   :  { %v124_v50 = vmul.f32 %v974_v47, %v974_v47  ;;  %v132_v51 = vmul.f32 %v977_v25, %v977_v25  ;;  %707 = vmatprep.subr.mxu0 %v292_v29  ;;  %735 = vmatprep.subr.mxu1 %v292_v29 }
  0xae   :  { %708 = vmatpush3.msra.mxu0 %v292_v29  ;;  %737 = vmatpush3.msra.mxu1 %v292_v29 }
  0xaf   :  { %v154_v52 = vsel %vm35_vm0, %v124_v50, 0.0  ;;  %v178_v28 = vsel %vm35_vm0, %v132_v51, 0.0  ;;  %709 = vmatprep.subr.mxu0 %v291_v53  ;;  %736 = vmatprep.subr.mxu1 %v291_v53 }
  0xb0   :  { %176 = vadd.xlane.f32.xlu1 %v175_v49  ;;  %155 = vadd.xlane.f32.xlu0 %v154_v52 }
  0xb1   :  { %710 = vmatpush3.msra.mxu0 %v291_v53  ;;  %738 = vmatpush3.msra.mxu1 %v291_v53 }
  0xb4   :  { %179 = vadd.xlane.f32.xlu1 %v178_v28 }
 0x11d   :  { %v135_v56 = vpop.xlane.xlu0 %134 }
 0x11e   :  { %v181_v57 = vmul.f32 0.0625, %v135_v56 }
 0x120   :  { %v197_v58 = vadd.f32 1e-05, %v181_v57 }
 0x121   :  { %v159_v59 = vpop.xlane.xlu1 %158  ;;  %v138_v60 = vpop.xlane.xlu0 %137 }
 0x122   :  { %740 = vrsqrt.f32 %v197_v58  ;;  %v189_v61 = vmul.f32 0.0625, %v159_v59  ;;  %v182_v62 = vmul.f32 0.0625, %v138_v60 }
 0x124   :  { %v205_v63 = vadd.f32 1e-05, %v189_v61  ;;  %v198_v2 = vadd.f32 1e-05, %v182_v62 }
 0x125   :  { %v162_v3 = vpop.xlane.xlu1 %161  ;;  %v141_v4 = vpop.xlane.xlu0 %140 }
 0x126   :  { %742 = vrsqrt.f32 %v205_v63  ;;  %v190_v5 = vmul.f32 0.0625, %v162_v3  ;;  %v183_v6 = vmul.f32 0.0625, %v141_v4 }
 0x127   :  { %744 = vrsqrt.f32 %v198_v2 }
 0x128   :  { %v206_v7 = vadd.f32 1e-05, %v190_v5  ;;  %v199_v8 = vadd.f32 1e-05, %v183_v6 }
 0x129   :  { %v165_v9 = vpop.xlane.xlu1 %164  ;;  %v144_v12 = vpop.xlane.xlu0 %143 }
 0x12a   :  { %746 = vrsqrt.f32 %v206_v7  ;;  %v191_v13 = vmul.f32 0.0625, %v165_v9  ;;  %v184_v14 = vmul.f32 0.0625, %v144_v12 }
 0x12b   :  { %748 = vrsqrt.f32 %v199_v8 }
 0x12c   :  { %v207_v15 = vadd.f32 1e-05, %v191_v13  ;;  %v200_v18 = vadd.f32 1e-05, %v184_v14 }
 0x12d   :  { %v168_v19 = vpop.xlane.xlu1 %167  ;;  %v147_v22 = vpop.xlane.xlu0 %146 }
 0x12e   :  { %750 = vrsqrt.f32 %v207_v15  ;;  %v192_v16 = vmul.f32 0.0625, %v168_v19  ;;  %v185_v26 = vmul.f32 0.0625, %v147_v22 }
 0x12f   :  { %v741_v27 = vpop.eup %740  ;;  %752 = vrsqrt.f32 %v200_v18 }
 0x130   :  { %v208_v31 = vadd.f32 1e-05, %v192_v16  ;;  %v201_v32 = vadd.f32 1e-05, %v185_v26  ;;  %v229_v33 = vmul.f32 %v741_v27, %v897_v36 }
 0x131   :  { %v171_v34 = vpop.xlane.xlu1 %170  ;;  %v150_v20 = vpop.xlane.xlu0 %149 }
 0x132   :  { %754 = vrsqrt.f32 %v208_v31  ;;  %v193_v39 = vmul.f32 0.0625, %v171_v34  ;;  %v186_v40 = vmul.f32 0.0625, %v150_v20  ;;  %v252_v41 = vmul.f32 %v996_v30, %v229_v33 }
 0x133   :  { %v743_v42 = vpop.eup %742  ;;  %756 = vrsqrt.f32 %v201_v32 }
 0x134   :  { %v745_v43 = vpop.eup %744  ;;  %v209_v46 = vadd.f32 1e-05, %v193_v39  ;;  %v202_v24 = vadd.f32 1e-05, %v186_v40  ;;  %v275_v48 = vadd.f32 %v1002_v38, %v252_v41  ;;  %v237_v36 = vmul.f32 %v743_v42, %v905_v44 }
 0x135   :  { %v174_v49 = vpop.xlane.xlu1 %173  ;;  %v153_v50 = vpop.xlane.xlu0 %152  ;;  %v230_v51 = vmul.f32 %v745_v43, %v899_v37 }
 0x136   :  { %758 = vrsqrt.f32 %v209_v46  ;;  %v194_v52 = vmul.f32 0.0625, %v174_v49  ;;  %v187_v28 = vmul.f32 0.0625, %v153_v50  ;;  %711 = vmatprep.mubr.msk.f32.mxu0 %vm35_vm0, %v275_v48  ;;  %v260_v29 = vmul.f32 %v996_v30, %v237_v36 }
 0x137   :  { %v747_v53 = vpop.eup %746  ;;  %760 = vrsqrt.f32 %v202_v24  ;;  %v253_v56 = vmul.f32 %v996_v30, %v230_v51 }
 0x138   :  { %v749_v57 = vpop.eup %748  ;;  %v210_v58 = vadd.f32 1e-05, %v194_v52  ;;  %v203_v59 = vadd.f32 1e-05, %v187_v28  ;;  %v283_v44 = vadd.f32 %v1002_v38, %v260_v29  ;;  %v238_v60 = vmul.f32 %v747_v53, %v907_v45 }
 0x139   :  { %v177_v61 = vpop.xlane.xlu1 %176  ;;  %v156_v37 = vpop.xlane.xlu0 %155  ;;  %v276_v62 = vadd.f32 %v1002_v38, %v253_v56  ;;  %v231_v63 = vmul.f32 %v749_v57, %v915_v54 }
 0x13a   :  { %762 = vrsqrt.f32 %v210_v58  ;;  %v195_v2 = vmul.f32 0.0625, %v177_v61  ;;  %v188_v3 = vmul.f32 0.0625, %v156_v37  ;;  %723 = vmatprep.mubr.msk.f32.mxu1 %vm35_vm0, %v283_v44  ;;  %v261_v4 = vmul.f32 %v996_v30, %v238_v60 }
 0x13b   :  { %v751_v5 = vpop.eup %750  ;;  %764 = vrsqrt.f32 %v203_v59  ;;  %712 = vmatmul.mubr.msk.f32.vlgmr.msra.gmra.mxu0 %vm35_vm0, %v276_v62  ;;  %v254_v6 = vmul.f32 %v996_v30, %v231_v63 }
 0x13c   :  { %v753_v45 = vpop.eup %752  ;;  %v211_v7 = vadd.f32 1e-05, %v195_v2  ;;  %v204_v8 = vadd.f32 1e-05, %v188_v3  ;;  %v284_v9 = vadd.f32 %v1002_v38, %v261_v4  ;;  %v239_v54 = vmul.f32 %v751_v5, %v917_v55 }
 0x13d   :  { %v180_v12 = vpop.xlane.xlu1 %179  ;;  %v277_v13 = vadd.f32 %v1002_v38, %v254_v6  ;;  %v232_v14 = vmul.f32 %v753_v45, %v926_v0 }
 0x13e   :  { %766 = vrsqrt.f32 %v211_v7  ;;  %v196_v15 = vmul.f32 0.0625, %v180_v12  ;;  %724 = vmatmul.mubr.msk.f32.vlgmr.msra.gmra.mxu1 %vm35_vm0, %v284_v9  ;;  %v262_v18 = vmul.f32 %v996_v30, %v239_v54 }
 0x13f   :  { %v755_v19 = vpop.eup %754  ;;  %768 = vrsqrt.f32 %v204_v8  ;;  %714 = vmatprep.mubr.msk.f32.mxu0 %vm35_vm0, %v277_v13  ;;  %v255_v22 = vmul.f32 %v996_v30, %v232_v14 }
 0x140   :  { %v757_v16 = vpop.eup %756  ;;  %v212_v26 = vadd.f32 1e-05, %v196_v15  ;;  %v285_v55 = vadd.f32 %v1002_v38, %v262_v18  ;;  %v240_v27 = vmul.f32 %v755_v19, %v929_v1 }
 0x141   :  { %v278_v0 = vadd.f32 %v1002_v38, %v255_v22  ;;  %v233_v31 = vmul.f32 %v757_v16, %v938_v10 }
 0x142   :  { %770 = vrsqrt.f32 %v212_v26  ;;  %726 = vmatprep.mubr.msk.f32.mxu1 %vm35_vm0, %v285_v55  ;;  %v263_v32 = vmul.f32 %v996_v30, %v240_v27 }
 0x143   :  { %v759_v33 = vpop.eup %758  ;;  %715 = vmatmul.mubr.msk.f32.gmra.mxu0 %vm35_vm0, %v278_v0  ;;  %v256_v34 = vmul.f32 %v996_v30, %v233_v31 }
 0x144   :  { %v761_v20 = vpop.eup %760  ;;  %v286_v39 = vadd.f32 %v1002_v38, %v263_v32  ;;  %v241_v40 = vmul.f32 %v759_v33, %v941_v11 }
 0x145   :  { %v279_v1 = vadd.f32 %v1002_v38, %v256_v34  ;;  %v234_v41 = vmul.f32 %v761_v20, %v950_v23 }
 0x146   :  { %727 = vmatmul.mubr.msk.f32.gmra.mxu1 %vm35_vm0, %v286_v39  ;;  %v264_v10 = vmul.f32 %v996_v30, %v241_v40 }
 0x147   :  { %v763_v42 = vpop.eup %762  ;;  %717 = vmatprep.mubr.msk.f32.mxu0 %vm35_vm0, %v279_v1  ;;  %v257_v43 = vmul.f32 %v996_v30, %v234_v41 }
 0x148   :  { %v765_v46 = vpop.eup %764  ;;  %v287_v24 = vadd.f32 %v1002_v38, %v264_v10  ;;  %v242_v48 = vmul.f32 %v763_v42, %v953_v17 }
 0x149   :  { %v280_v11 = vadd.f32 %v1002_v38, %v257_v43  ;;  %v235_v36 = vmul.f32 %v765_v46, %v962_v35 }
 0x14a   :  { %729 = vmatprep.mubr.msk.f32.mxu1 %vm35_vm0, %v287_v24  ;;  %v265_v23 = vmul.f32 %v996_v30, %v242_v48 }
 0x14b   :  { %v767_v49 = vpop.eup %766  ;;  %718 = vmatmul.mubr.msk.f32.gmra.mxu0 %vm35_vm0, %v280_v11  ;;  %v258_v50 = vmul.f32 %v996_v30, %v235_v36 }
 0x14c   :  { %v769_v51 = vpop.eup %768  ;;  %v288_v52 = vadd.f32 %v1002_v38, %v265_v23  ;;  %v243_v28 = vmul.f32 %v767_v49, %v965_v21 }
 0x14d   :  { %v281_v17 = vadd.f32 %v1002_v38, %v258_v50  ;;  %v236_v29 = vmul.f32 %v769_v51, %v974_v47 }
 0x14e   :  { %730 = vmatmul.mubr.msk.f32.gmra.mxu1 %vm35_vm0, %v288_v52  ;;  %v266_v35 = vmul.f32 %v996_v30, %v243_v28 }
 0x14f   :  { %v771_v53 = vpop.eup %770  ;;  %720 = vmatprep.mubr.msk.f32.mxu0 %vm35_vm0, %v281_v17  ;;  %v259_v56 = vmul.f32 %v996_v30, %v236_v29 }
 0x150   :  { %v289_v57 = vadd.f32 %v1002_v38, %v266_v35  ;;  %v244_v58 = vmul.f32 %v771_v53, %v977_v25 }
 0x151   :  { %v282_v59 = vadd.f32 %v1002_v38, %v259_v56 }
 0x152   :  { %732 = vmatprep.mubr.msk.f32.mxu1 %vm35_vm0, %v289_v57  ;;  %v267_v21 = vmul.f32 %v996_v30, %v244_v58 }
 0x153   :  { %721 = vmatmul.mubr.msk.f32.gmra.mxu0 %vm35_vm0, %v282_v59 }
 0x154   :  { %v290_v47 = vadd.f32 %v1002_v38, %v267_v21 }
 0x156   :  { %733 = vmatmul.mubr.msk.f32.gmra.mxu1 %vm35_vm0, %v290_v47 }
 0x1fb   :  { %v713_v44 = vpop.f32.mrf.mxu0 }
 0x1fc   :  { %v674_v60 = vpack.c.bf16 %v713_v44, %v713_v44 }
 0x1fd   :  { %v407_v61 = vpop.f32.mrf.mxu0 }
 0x1fe   :  { %552 = vst.msk [vmem:[%s1215_s4 + $0x4] sm:$0xf] %vm550_vm1, %v674_v60  ;;  %v673_v25 = vpack.c.bf16 %v407_v61, %v407_v61  ;;  %569 = vrot.lane.b32.xlu1 %v674_v60, %s772_s6  ;;  %v725_v30 = vpop.f32.mrf.mxu1 }
 0x1ff   :  { %v682_v37 = vpack.c.bf16 %v725_v30, %v725_v30 }
 0x200   :  { %551 = vst.msk [vmem:[%s1215_s4] sm:$0xf] %vm550_vm1, %v673_v25  ;;  %567 = vrot.lane.b32.xlu0 %v673_v25, %s772_s6  ;;  %v447_v38 = vpop.f32.mrf.mxu1 }
 0x201   :  { %560 = vst.msk [vmem:[%s1215_s4 + $0x24] sm:$0xf] %vm550_vm1, %v682_v37  ;;  %v681_v62 = vpack.c.bf16 %v447_v38, %v447_v38 }
 0x202   :  { %585 = vrot.lane.b32.xlu1 %v682_v37, %s772_s6 }
 0x203   :  { %559 = vst.msk [vmem:[%s1215_s4 + $0x20] sm:$0xf] %vm550_vm1, %v681_v62  ;;  %v716_v63 = vpop.f32.mrf.mxu0 }
 0x204   :  { %v676_v2 = vpack.c.bf16 %v716_v63, %v716_v63  ;;  %583 = vrot.lane.b32.xlu0 %v681_v62, %s772_s6 }
 0x205   :  { %v417_v3 = vpop.f32.mrf.mxu0 }
 0x206   :  { %554 = vst.msk [vmem:[%s1215_s4 + $0xc] sm:$0xf] %vm550_vm1, %v676_v2  ;;  %v675_v4 = vpack.c.bf16 %v417_v3, %v417_v3  ;;  %573 = vrot.lane.b32.xlu1 %v676_v2, %s772_s6  ;;  %v728_v5 = vpop.f32.mrf.mxu1 }
 0x207   :  { %v684_v6 = vpack.c.bf16 %v728_v5, %v728_v5 }
 0x208   :  { %553 = vst.msk [vmem:[%s1215_s4 + $0x8] sm:$0xf] %vm550_vm1, %v675_v4  ;;  %v457_v45 = vpop.f32.mrf.mxu1 }
 0x209   :  { %562 = vst.msk [vmem:[%s1215_s4 + $0x2c] sm:$0xf] %vm550_vm1, %v684_v6  ;;  %v683_v7 = vpack.c.bf16 %v457_v45, %v457_v45 }
 0x20a   :  { %589 = vrot.lane.b32.xlu1 %v684_v6, %s772_s6 }
 0x20b   :  { %561 = vst.msk [vmem:[%s1215_s4 + $0x28] sm:$0xf] %vm550_vm1, %v683_v7  ;;  %v719_v8 = vpop.f32.mrf.mxu0  ;;  %587 = vrot.lane.b32.xlu0 %v683_v7, %s772_s6 }
 0x20c   :  { %v678_v9 = vpack.c.bf16 %v719_v8, %v719_v8 }
 0x20d   :  { %v427_v54 = vpop.f32.mrf.mxu0 }
 0x20e   :  { %556 = vst.msk [vmem:[%s1215_s4 + $0x14] sm:$0xf] %vm550_vm1, %v678_v9  ;;  %v677_v12 = vpack.c.bf16 %v427_v54, %v427_v54  ;;  %571 = vrot.lane.b32.xlu1 %v675_v4, %s772_s6  ;;  %v731_v13 = vpop.f32.mrf.mxu1 }
 0x20f   :  { %v686_v14 = vpack.c.bf16 %v731_v13, %v731_v13 }
 0x210   :  { %555 = vst.msk [vmem:[%s1215_s4 + $0x10] sm:$0xf] %vm550_vm1, %v677_v12  ;;  %575 = vrot.lane.b32.xlu0 %v677_v12, %s772_s6  ;;  %v467_v15 = vpop.f32.mrf.mxu1 }
 0x211   :  { %564 = vst.msk [vmem:[%s1215_s4 + $0x34] sm:$0xf] %vm550_vm1, %v686_v14  ;;  %v685_v18 = vpack.c.bf16 %v467_v15, %v467_v15 }
 0x212   :  { %577 = vrot.lane.b32.xlu1 %v678_v9, %s772_s6 }
 0x213   :  { %563 = vst.msk [vmem:[%s1215_s4 + $0x30] sm:$0xf] %vm550_vm1, %v685_v18  ;;  %v722_v19 = vpop.f32.mrf.mxu0 }
 0x214   :  { %v680_v22 = vpack.c.bf16 %v722_v19, %v722_v19  ;;  %591 = vrot.lane.b32.xlu0 %v685_v18, %s772_s6 }
 0x215   :  { %v437_v16 = vpop.f32.mrf.mxu0 }
 0x216   :  { %558 = vst.msk [vmem:[%s1215_s4 + $0x1c] sm:$0xf] %vm550_vm1, %v680_v22  ;;  %v679_v26 = vpack.c.bf16 %v437_v16, %v437_v16  ;;  %593 = vrot.lane.b32.xlu1 %v686_v14, %s772_s6  ;;  %v734_v55 = vpop.f32.mrf.mxu1 }
 0x217   :  { %v688_v27 = vpack.c.bf16 %v734_v55, %v734_v55 }
 0x218   :  { %557 = vst.msk [vmem:[%s1215_s4 + $0x18] sm:$0xf] %vm550_vm1, %v679_v26  ;;  %579 = vrot.lane.b32.xlu0 %v679_v26, %s772_s6  ;;  %v477_v0 = vpop.f32.mrf.mxu1 }
 0x219   :  { %566 = vst.msk [vmem:[%s1215_s4 + $0x3c] sm:$0xf] %vm550_vm1, %v688_v27  ;;  %v687_v31 = vpack.c.bf16 %v477_v0, %v477_v0 }
 0x21a   :  { %581 = vrot.lane.b32.xlu1 %v680_v22, %s772_s6 }
 0x21b   :  { %565 = vst.msk [vmem:[%s1215_s4 + $0x38] sm:$0xf] %vm550_vm1, %v687_v31 }
 0x21c   :  { %595 = vrot.lane.b32.xlu0 %v687_v31, %s772_s6 }
 0x21e   :  { %597 = vrot.lane.b32.xlu1 %v688_v27, %s772_s6 }
 0x270   :  { %v570_v32 = vpop.permute.xlu1 %569 }
 0x271   :  { %616 = vst.msk [vmem:[%s1216_s5 + $0x4] sm:$0xf] %vm550_vm1, %v570_v32 }
 0x272   :  { %v568_v33 = vpop.permute.xlu0 %567 }
 0x273   :  { %615 = vst.msk [vmem:[%s1216_s5] sm:$0xf] %vm550_vm1, %v568_v33 }
 0x274   :  { %v586_v34 = vpop.permute.xlu1 %585 }
 0x275   :  { %624 = vst.msk [vmem:[%s1216_s5 + $0x24] sm:$0xf] %vm550_vm1, %v586_v34 }
 0x276   :  { %v584_v20 = vpop.permute.xlu0 %583 }
 0x277   :  { %623 = vst.msk [vmem:[%s1216_s5 + $0x20] sm:$0xf] %vm550_vm1, %v584_v20 }
 0x278   :  { %v574_v39 = vpop.permute.xlu1 %573 }
 0x279   :  { %618 = vst.msk [vmem:[%s1216_s5 + $0xc] sm:$0xf] %vm550_vm1, %v574_v39 }
 0x27c   :  { %v590_v40 = vpop.permute.xlu1 %589 }
 0x27d   :  { %626 = vst.msk [vmem:[%s1216_s5 + $0x2c] sm:$0xf] %vm550_vm1, %v590_v40  ;;  %v588_v1 = vpop.permute.xlu0 %587 }
 0x27e   :  { %625 = vst.msk [vmem:[%s1216_s5 + $0x28] sm:$0xf] %vm550_vm1, %v588_v1 }
 0x280   :  { %v572_v41 = vpop.permute.xlu1 %571 }
 0x281   :  { %617 = vst.msk [vmem:[%s1216_s5 + $0x8] sm:$0xf] %vm550_vm1, %v572_v41 }
 0x282   :  { %v576_v10 = vpop.permute.xlu0 %575 }
 0x283   :  { %619 = vst.msk [vmem:[%s1216_s5 + $0x10] sm:$0xf] %vm550_vm1, %v576_v10 }
 0x284   :  { %v578_v42 = vpop.permute.xlu1 %577 }
 0x285   :  { %620 = vst.msk [vmem:[%s1216_s5 + $0x14] sm:$0xf] %vm550_vm1, %v578_v42 }
 0x286   :  { %v592_v43 = vpop.permute.xlu0 %591 }
 0x287   :  { %627 = vst.msk [vmem:[%s1216_s5 + $0x30] sm:$0xf] %vm550_vm1, %v592_v43 }
 0x288   :  { %v594_v46 = vpop.permute.xlu1 %593 }
 0x289   :  { %628 = vst.msk [vmem:[%s1216_s5 + $0x34] sm:$0xf] %vm550_vm1, %v594_v46 }
 0x28a   :  { %v580_v24 = vpop.permute.xlu0 %579 }
 0x28b   :  { %621 = vst.msk [vmem:[%s1216_s5 + $0x18] sm:$0xf] %vm550_vm1, %v580_v24 }
 0x28c   :  { %v582_v48 = vpop.permute.xlu1 %581 }
 0x28d   :  { %622 = vst.msk [vmem:[%s1216_s5 + $0x1c] sm:$0xf] %vm550_vm1, %v582_v48 }
 0x28e   :  { %v596_v11 = vpop.permute.xlu0 %595 }
 0x28f   :  { %629 = vst.msk [vmem:[%s1216_s5 + $0x38] sm:$0xf] %vm550_vm1, %v596_v11 }
 0x290   :  { %v598_v36 = vpop.permute.xlu1 %597 }
 0x291   :  { %630 = vst.msk [vmem:[%s1216_s5 + $0x3c] sm:$0xf] %vm550_vm1, %v598_v36 }

</bundles_post_ra>
